<compile_context>
chip_gen: v6e
topology: v6e:2x2x1
jax: 0.10.0
libtpu: 0.0.40
codegen_flags: <defaults>
</compile_context>

<pallas_src>
import functools

import numpy as np
import jax
import jax.numpy as jnp
from jax.experimental import pallas as pl
from jax.experimental.pallas import tpu as pltpu


def _round_up(x, m):
    return (x + m - 1) // m * m


# ---------------------------------------------------------------------------
# Fused kernel: conv1+bn1+relu1 -> conv2+bn2+relu2 for one batch element.
# ---------------------------------------------------------------------------
def _conv_block_kernel(x_ref, w1_ref, b1_ref, w2_ref, b2_ref, out_ref,
                       xe_ref, h_ref, st_ref,
                       *, lead, sp, spad, phw, pw, dsz, hsz, wsz, rels):
    cin = x_ref.shape[1]
    c1 = h_ref.shape[0]

    # One-time hygiene: zero the persistent margins of the scratch buffers.
    # (Scratch persists across grid steps.  Interior outputs never read the
    # margins, so correctness does not depend on this; jnp.where below keeps
    # any margin garbage out of h even if it were NaN/Inf.)
    @pl.when(pl.program_id(0) == 0)
    def _init():
        xe_ref[...] = jnp.zeros_like(xe_ref)
        h_ref[...] = jnp.zeros_like(h_ref)

    # Embed this batch element's zero-padded flat volume in the margined buffer.
    xe_ref[:, lead:lead + sp] = x_ref[0]

    # Interior mask computed in-kernel (no HBM mask input).  Coordinates come
    # from f32 division of exact small integers; the only lanes a 1-ulp
    # misrounding could affect are border lanes that the remaining coordinate
    # tests exclude anyway, so the mask is exact.
    lane = jax.lax.broadcasted_iota(jnp.int32, (1, spad), 1)
    flane = lane.astype(jnp.float32)
    dd = jnp.floor(flane / float(phw))
    rem = flane - dd * float(phw)
    hh = jnp.floor(rem / float(pw))
    ww = rem - hh * float(pw)
    interior = ((lane < sp)
                & (dd >= 1.0) & (dd <= float(dsz))
                & (hh >= 1.0) & (hh <= float(hsz))
                & (ww >= 1.0) & (ww <= float(wsz)))

    # ---- stage 1: im2col staging + ONE (C1, 27*Cin)@(27*Cin, SPAD) matmul ----
    for t, rel in enumerate(rels):                       # 27 static taps
        st_ref[t * cin:(t + 1) * cin, :] = xe_ref[:, lead + rel:lead + rel + spad]
    acc1 = jnp.dot(w1_ref[...], st_ref[0:27 * cin, :],
                   preferred_element_type=jnp.float32)
    # BN1 scale already folded into w1; epilogue = bias + ReLU + border mask.
    h_val = jnp.where(interior, jnp.maximum(acc1 + b1_ref[...], 0.0), 0.0)
    h_ref[:, lead:lead + spad] = h_val.astype(h_ref.dtype)

    # ---- stage 2: im2col staging + ONE (C2, 27*C1)@(27*C1, SPAD) matmul ------
    for t, rel in enumerate(rels):
        st_ref[t * c1:(t + 1) * c1, :] = h_ref[:, lead + rel:lead + rel + spad]
    acc2 = jnp.dot(w2_ref[...], st_ref[0:27 * c1, :],
                   preferred_element_type=jnp.float32)
    # Border/overrun lanes are garbage here; the wrapper crops them.
    out_ref[0] = jnp.maximum(acc2 + b2_ref[...], 0.0).astype(out_ref.dtype)


# ---------------------------------------------------------------------------
# Wrapper
# ---------------------------------------------------------------------------
def conv_block_3d_db4(x, w1, b1c, g1, be1, m1, v1,
                      w2, b2c, g2, be2, m2, v2, eps=1e-5):
    """x: (N, Cin, D, H, W) f32.  w1: (C1, Cin, 3,3,3), w2: (C2, C1, 3,3,3).
    b*c: conv biases; g/be/m/v: BN gamma/beta/running_mean/running_var (eval)."""
    n, cin, d, h, w = x.shape
    c1 = w1.shape[0]
    c2 = w2.shape[0]

    pw_ = w + 2
    phw = (h + 2) * pw_
    sp = (d + 2) * phw                      # flattened padded volume size
    maxoff = phw + pw_ + 1                  # max |tap offset| in flat coords
    lead = _round_up(maxoff, 128)           # 128-aligned head margin
    spad = _round_up(sp, 128)               # lane-dense computation window
    tail = _round_up(maxoff, 128)
    total = lead + spad + tail

    # Single host-side zero pad (spatial); flatten is free; bf16 for the MXU.
    xflat = jnp.pad(x, ((0, 0), (0, 0), (1, 1), (1, 1), (1, 1))
                    ).reshape(n, cin, sp).astype(jnp.bfloat16)

    # Fold conv bias + eval-mode BN into the conv weights (scale) and a
    # per-channel bias.  Weight layout: (Cout, 27*Cin) with K index = tap*Cin+c,
    # matching the im2col staging layout in the kernel.
    def fold_w(wgt, conv_b, gamma, beta, mean, var):
        s = gamma / jnp.sqrt(var + eps)
        wf = wgt * s[:, None, None, None, None]
        bf = beta + s * (conv_b - mean)
        cout, ci = wgt.shape[0], wgt.shape[1]
        wk = jnp.transpose(wf.reshape(cout, ci, 27), (0, 2, 1)).reshape(cout, 27 * ci)
        return wk.astype(jnp.bfloat16), bf.reshape(cout, 1).astype(jnp.float32)

    w1k, b1f = fold_w(w1, b1c, g1, be1, m1, v1)
    w2k, b2f = fold_w(w2, b2c, g2, be2, m2, v2)

    # Tap offsets in flat padded coordinates (kd, kh, kw ordering).
    rels = tuple((kd - 1) * phw + (kh - 1) * pw_ + (kw - 1)
                 for kd in range(3) for kh in range(3) for kw in range(3))

    kernel = functools.partial(_conv_block_kernel, lead=lead, sp=sp, spad=spad,
                               phw=phw, pw=pw_, dsz=d, hsz=h, wsz=w, rels=rels)

    kmax = 27 * max(cin, c1)                # shared im2col staging rows

    out_flat = pl.pallas_call(
        kernel,
        out_shape=jax.ShapeDtypeStruct((n, c2, spad), jnp.float32),
        grid=(n,),
        in_specs=[
            pl.BlockSpec((1, cin, sp), lambda i: (i, 0, 0)),      # x (flat, padded)
            pl.BlockSpec((c1, 27 * cin), lambda i: (0, 0)),       # w1 (BN folded)
            pl.BlockSpec((c1, 1), lambda i: (0, 0)),              # bias1
            pl.BlockSpec((c2, 27 * c1), lambda i: (0, 0)),        # w2 (BN folded)
            pl.BlockSpec((c2, 1), lambda i: (0, 0)),              # bias2
        ],
        out_specs=pl.BlockSpec((1, c2, spad), lambda i: (i, 0, 0)),
        scratch_shapes=[
            pltpu.VMEM((cin, total), jnp.bfloat16),   # margined x buffer
            pltpu.VMEM((c1, total), jnp.bfloat16),    # margined h buffer
            pltpu.VMEM((kmax, spad), jnp.bfloat16),   # shared im2col staging
        ],
        compiler_params=pltpu.CompilerParams(
            dimension_semantics=("parallel",),
            # Generation-aware note: fine on v5e/v6e/v7x for these tiles; for
            # large volumes keep <= ~48-56 MiB on v7x, raise on v5e/v6e.
            vmem_limit_bytes=32 * 1024 * 1024,
        ),
    )(xflat, w1k, b1f, w2k, b2f)

    # Layout glue: drop lane padding and the zero-pad border.
    out = out_flat[:, :, :sp].reshape(n, c2, d + 2, h + 2, w + 2)
    return out[:, :, 1:-1, 1:-1, 1:-1]


# ---------------------------------------------------------------------------
# Pure-JAX reference (mirrors PyTorch forward: conv->bn(eval)->relu, twice)
# ---------------------------------------------------------------------------
def conv_block_3d_db4_ref(x, w1, b1c, g1, be1, m1, v1,
                          w2, b2c, g2, be2, m2, v2, eps=1e-5):
    def conv_bn_relu(inp, wgt, bc, g, be, m, v):
        y = jax.lax.conv_general_dilated(
            inp, wgt, window_strides=(1, 1, 1),
            padding=((1, 1), (1, 1), (1, 1)),
            dimension_numbers=("NCDHW", "OIDHW", "NCDHW"))
        y = y + bc.reshape(1, -1, 1, 1, 1)
        y = (g.reshape(1, -1, 1, 1, 1) * (y - m.reshape(1, -1, 1, 1, 1))
             / jnp.sqrt(v.reshape(1, -1, 1, 1, 1) + eps)
             + be.reshape(1, -1, 1, 1, 1))
        return jnp.maximum(y, 0.0)

    hmid = conv_bn_relu(x, w1, b1c, g1, be1, m1, v1)
    return conv_bn_relu(hmid, w2, b2c, g2, be2, m2, v2)


if __name__ == "__main__":
    # ConvBlock3D_db4(in_channels=8, out_channels=16): conv2 outputs 16//2 = 8.
    N, CIN, COUT = 2, 8, 16
    D, H, W = 8, 8, 8
    C2 = COUT // 2

    key = jax.random.PRNGKey(0)
    keys = jax.random.split(key, 12)

    x = jax.random.normal(keys[0], (N, CIN, D, H, W), dtype=jnp.float32)

    w1 = 0.1 * jax.random.normal(keys[1], (COUT, CIN, 3, 3, 3), dtype=jnp.float32)
    b1c = 0.1 * jax.random.normal(keys[2], (COUT,), dtype=jnp.float32)
    g1 = 1.0 + 0.1 * jax.random.normal(keys[3], (COUT,), dtype=jnp.float32)
    be1 = 0.1 * jax.random.normal(keys[4], (COUT,), dtype=jnp.float32)
    m1 = 0.1 * jax.random.normal(keys[5], (COUT,), dtype=jnp.float32)
    v1 = jax.random.uniform(keys[6], (COUT,), minval=0.5, maxval=1.5,
                            dtype=jnp.float32)

    w2 = 0.1 * jax.random.normal(keys[7], (C2, COUT, 3, 3, 3), dtype=jnp.float32)
    b2c = 0.1 * jax.random.normal(keys[8], (C2,), dtype=jnp.float32)
    g2 = 1.0 + 0.1 * jax.random.normal(keys[9], (C2,), dtype=jnp.float32)
    be2 = 0.1 * jax.random.normal(keys[10], (C2,), dtype=jnp.float32)
    m2 = 0.1 * jax.random.normal(keys[11], (C2,), dtype=jnp.float32)
    v2 = 0.9 * jnp.ones((C2,), dtype=jnp.float32)

    out = jax.block_until_ready(conv_block_3d_db4(
        x, w1, b1c, g1, be1, m1, v1, w2, b2c, g2, be2, m2, v2))
    ref = jax.block_until_ready(conv_block_3d_db4_ref(
        x, w1, b1c, g1, be1, m1, v1, w2, b2c, g2, be2, m2, v2))

    # bf16 MXU inputs with f32 accumulation -> small drift vs f32 reference;
    # tolerance loosened accordingly (per perf-review note).
    np.testing.assert_allclose(np.asarray(out), np.asarray(ref),
                               rtol=5e-2, atol=1e-1)
    print("KERNEL_OK")
</pallas_src>

<mosaic_0001>
module attributes {stable_mosaic.version = 11 : i64} {
  func.func @_conv_block_kernel(%arg0: i32, %arg1: memref<1x8x1000xbf16, #tpu.memory_space<vmem>>, %arg2: memref<16x216xbf16, #tpu.memory_space<vmem>>, %arg3: memref<16x1xf32, #tpu.memory_space<vmem>>, %arg4: memref<8x432xbf16, #tpu.memory_space<vmem>>, %arg5: memref<8x1xf32, #tpu.memory_space<vmem>>, %arg6: memref<1x8x1024xf32, #tpu.memory_space<vmem>>, %arg7: memref<8x1280xbf16, #tpu.memory_space<vmem>>, %arg8: memref<16x1280xbf16, #tpu.memory_space<vmem>>, %arg9: memref<432x1024xbf16, #tpu.memory_space<vmem>>) attributes {dimension_semantics = [#tpu.dimension_semantics<parallel>], iteration_bounds = array<i64: 2>, scalar_prefetch = 0 : i64, scratch_operands = 3 : i64, tpu.core_type = #tpu.core_type<tc>, window_params = [{transform_indices = @transform_0, window_bounds = array<i64: 1, 8, 1000>}, {pipeline_mode = #tpu.pipeline_mode<synchronous>, transform_indices = @transform_1, window_bounds = array<i64: 16, 216>}, {pipeline_mode = #tpu.pipeline_mode<synchronous>, transform_indices = @transform_2, window_bounds = array<i64: 16, 1>}, {pipeline_mode = #tpu.pipeline_mode<synchronous>, transform_indices = @transform_3, window_bounds = array<i64: 8, 432>}, {pipeline_mode = #tpu.pipeline_mode<synchronous>, transform_indices = @transform_4, window_bounds = array<i64: 8, 1>}, {transform_indices = @transform_5, window_bounds = array<i64: 1, 8, 1024>}]} {
    %c0_i32 = arith.constant 0 : i32
    %0 = arith.cmpi eq, %arg0, %c0_i32 : i32
    %1 = arith.extui %0 : i1 to i32
    %c0_i32_0 = arith.constant 0 : i32
    %2 = arith.cmpi ne, %1, %c0_i32_0 : i32
    scf.if %2 {
      %cst_187 = arith.constant 0.000000e+00 : bf16
      %173 = vector.broadcast %cst_187 : bf16 to vector<8x1280xbf16>
      %c0_188 = arith.constant 0 : index
      %c0_189 = arith.constant 0 : index
      %174 = vector.load %arg7[%c0_188, %c0_189] : memref<8x1280xbf16, #tpu.memory_space<vmem>>, vector<8x1280xbf16>
      tpu.vector_store %arg7[%c0_188, %c0_189], %173 {strides = array<i32>} : memref<8x1280xbf16, #tpu.memory_space<vmem>>, vector<8x1280xbf16>,
      %cst_190 = arith.constant 0.000000e+00 : bf16
      %175 = vector.broadcast %cst_190 : bf16 to vector<16x1280xbf16>
      %c0_191 = arith.constant 0 : index
      %c0_192 = arith.constant 0 : index
      %176 = vector.load %arg8[%c0_191, %c0_192] : memref<16x1280xbf16, #tpu.memory_space<vmem>>, vector<16x1280xbf16>
      tpu.vector_store %arg8[%c0_191, %c0_192], %175 {strides = array<i32>} : memref<16x1280xbf16, #tpu.memory_space<vmem>>, vector<16x1280xbf16>,
    } else {
    }
    %c0 = arith.constant 0 : index
    %c0_1 = arith.constant 0 : index
    %c0_2 = arith.constant 0 : index
    %3 = vector.load %arg1[%c0, %c0_1, %c0_2] : memref<1x8x1000xbf16, #tpu.memory_space<vmem>>, vector<1x8x1000xbf16>
    %4 = vector.shape_cast %3 : vector<1x8x1000xbf16> to vector<8x1000xbf16>
    %c0_3 = arith.constant 0 : index
    %c128 = arith.constant 128 : index
    %5 = vector.load %arg7[%c0_3, %c128] : memref<8x1280xbf16, #tpu.memory_space<vmem>>, vector<8x1000xbf16>
    tpu.vector_store %arg7[%c0_3, %c128], %4 {strides = array<i32>} : memref<8x1280xbf16, #tpu.memory_space<vmem>>, vector<8x1000xbf16>,
    %6 = tpu.iota {dimensions = array<i32: 1>} : vector<1x1024xi32>
    %7 = arith.sitofp %6 : vector<1x1024xi32> to vector<1x1024xf32>
    %cst = arith.constant 1.000000e+02 : f32
    %8 = vector.broadcast %cst : f32 to vector<1x1024xf32>
    %9 = arith.divf %7, %8 : vector<1x1024xf32>
    %10 = math.floor %9 : vector<1x1024xf32>
    %cst_4 = arith.constant 1.000000e+02 : f32
    %11 = vector.broadcast %cst_4 : f32 to vector<1x1024xf32>
    %12 = arith.mulf %10, %11 : vector<1x1024xf32>
    %13 = arith.subf %7, %12 : vector<1x1024xf32>
    %cst_5 = arith.constant 1.000000e+01 : f32
    %14 = vector.broadcast %cst_5 : f32 to vector<1x1024xf32>
    %15 = arith.divf %13, %14 : vector<1x1024xf32>
    %16 = math.floor %15 : vector<1x1024xf32>
    %cst_6 = arith.constant 1.000000e+01 : f32
    %17 = vector.broadcast %cst_6 : f32 to vector<1x1024xf32>
    %18 = arith.mulf %16, %17 : vector<1x1024xf32>
    %19 = arith.subf %13, %18 : vector<1x1024xf32>
    %c1000_i32 = arith.constant 1000 : i32
    %20 = vector.broadcast %c1000_i32 : i32 to vector<1x1024xi32>
    %21 = arith.cmpi slt, %6, %20 : vector<1x1024xi32>
    %cst_7 = arith.constant 1.000000e+00 : f32
    %22 = vector.broadcast %cst_7 : f32 to vector<1x1024xf32>
    %23 = arith.cmpf oge, %10, %22 : vector<1x1024xf32>
    %24 = arith.andi %21, %23 : vector<1x1024xi1>
    %cst_8 = arith.constant 8.000000e+00 : f32
    %25 = vector.broadcast %cst_8 : f32 to vector<1x1024xf32>
    %26 = arith.cmpf ole, %10, %25 : vector<1x1024xf32>
    %27 = arith.andi %24, %26 : vector<1x1024xi1>
    %cst_9 = arith.constant 1.000000e+00 : f32
    %28 = vector.broadcast %cst_9 : f32 to vector<1x1024xf32>
    %29 = arith.cmpf oge, %16, %28 : vector<1x1024xf32>
    %30 = arith.andi %27, %29 : vector<1x1024xi1>
    %cst_10 = arith.constant 8.000000e+00 : f32
    %31 = vector.broadcast %cst_10 : f32 to vector<1x1024xf32>
    %32 = arith.cmpf ole, %16, %31 : vector<1x1024xf32>
    %33 = arith.andi %30, %32 : vector<1x1024xi1>
    %cst_11 = arith.constant 1.000000e+00 : f32
    %34 = vector.broadcast %cst_11 : f32 to vector<1x1024xf32>
    %35 = arith.cmpf oge, %19, %34 : vector<1x1024xf32>
    %36 = arith.andi %33, %35 : vector<1x1024xi1>
    %cst_12 = arith.constant 8.000000e+00 : f32
    %37 = vector.broadcast %cst_12 : f32 to vector<1x1024xf32>
    %38 = arith.cmpf ole, %19, %37 : vector<1x1024xf32>
    %39 = arith.andi %36, %38 : vector<1x1024xi1>
    %c0_13 = arith.constant 0 : index
    %c17 = arith.constant 17 : index
    %40 = vector.load %arg7[%c0_13, %c17] : memref<8x1280xbf16, #tpu.memory_space<vmem>>, vector<8x1024xbf16>
    %c0_14 = arith.constant 0 : index
    %c0_15 = arith.constant 0 : index
    %41 = vector.load %arg9[%c0_14, %c0_15] : memref<432x1024xbf16, #tpu.memory_space<vmem>>, vector<8x1024xbf16>
    tpu.vector_store %arg9[%c0_14, %c0_15], %40 {strides = array<i32>} : memref<432x1024xbf16, #tpu.memory_space<vmem>>, vector<8x1024xbf16>,
    %c0_16 = arith.constant 0 : index
    %c18 = arith.constant 18 : index
    %42 = vector.load %arg7[%c0_16, %c18] : memref<8x1280xbf16, #tpu.memory_space<vmem>>, vector<8x1024xbf16>
    %c8 = arith.constant 8 : index
    %c0_17 = arith.constant 0 : index
    %43 = vector.load %arg9[%c8, %c0_17] : memref<432x1024xbf16, #tpu.memory_space<vmem>>, vector<8x1024xbf16>
    tpu.vector_store %arg9[%c8, %c0_17], %42 {strides = array<i32>} : memref<432x1024xbf16, #tpu.memory_space<vmem>>, vector<8x1024xbf16>,
    %c0_18 = arith.constant 0 : index
    %c19 = arith.constant 19 : index
    %44 = vector.load %arg7[%c0_18, %c19] : memref<8x1280xbf16, #tpu.memory_space<vmem>>, vector<8x1024xbf16>
    %c16 = arith.constant 16 : index
    %c0_19 = arith.constant 0 : index
    %45 = vector.load %arg9[%c16, %c0_19] : memref<432x1024xbf16, #tpu.memory_space<vmem>>, vector<8x1024xbf16>
    tpu.vector_store %arg9[%c16, %c0_19], %44 {strides = array<i32>} : memref<432x1024xbf16, #tpu.memory_space<vmem>>, vector<8x1024xbf16>,
    %c0_20 = arith.constant 0 : index
    %c27 = arith.constant 27 : index
    %46 = vector.load %arg7[%c0_20, %c27] : memref<8x1280xbf16, #tpu.memory_space<vmem>>, vector<8x1024xbf16>
    %c24 = arith.constant 24 : index
    %c0_21 = arith.constant 0 : index
    %47 = vector.load %arg9[%c24, %c0_21] : memref<432x1024xbf16, #tpu.memory_space<vmem>>, vector<8x1024xbf16>
    tpu.vector_store %arg9[%c24, %c0_21], %46 {strides = array<i32>} : memref<432x1024xbf16, #tpu.memory_space<vmem>>, vector<8x1024xbf16>,
    %c0_22 = arith.constant 0 : index
    %c28 = arith.constant 28 : index
    %48 = vector.load %arg7[%c0_22, %c28] : memref<8x1280xbf16, #tpu.memory_space<vmem>>, vector<8x1024xbf16>
    %c32 = arith.constant 32 : index
    %c0_23 = arith.constant 0 : index
    %49 = vector.load %arg9[%c32, %c0_23] : memref<432x1024xbf16, #tpu.memory_space<vmem>>, vector<8x1024xbf16>
    tpu.vector_store %arg9[%c32, %c0_23], %48 {strides = array<i32>} : memref<432x1024xbf16, #tpu.memory_space<vmem>>, vector<8x1024xbf16>,
    %c0_24 = arith.constant 0 : index
    %c29 = arith.constant 29 : index
    %50 = vector.load %arg7[%c0_24, %c29] : memref<8x1280xbf16, #tpu.memory_space<vmem>>, vector<8x1024xbf16>
    %c40 = arith.constant 40 : index
    %c0_25 = arith.constant 0 : index
    %51 = vector.load %arg9[%c40, %c0_25] : memref<432x1024xbf16, #tpu.memory_space<vmem>>, vector<8x1024xbf16>
    tpu.vector_store %arg9[%c40, %c0_25], %50 {strides = array<i32>} : memref<432x1024xbf16, #tpu.memory_space<vmem>>, vector<8x1024xbf16>,
    %c0_26 = arith.constant 0 : index
    %c37 = arith.constant 37 : index
    %52 = vector.load %arg7[%c0_26, %c37] : memref<8x1280xbf16, #tpu.memory_space<vmem>>, vector<8x1024xbf16>
    %c48 = arith.constant 48 : index
    %c0_27 = arith.constant 0 : index
    %53 = vector.load %arg9[%c48, %c0_27] : memref<432x1024xbf16, #tpu.memory_space<vmem>>, vector<8x1024xbf16>
    tpu.vector_store %arg9[%c48, %c0_27], %52 {strides = array<i32>} : memref<432x1024xbf16, #tpu.memory_space<vmem>>, vector<8x1024xbf16>,
    %c0_28 = arith.constant 0 : index
    %c38 = arith.constant 38 : index
    %54 = vector.load %arg7[%c0_28, %c38] : memref<8x1280xbf16, #tpu.memory_space<vmem>>, vector<8x1024xbf16>
    %c56 = arith.constant 56 : index
    %c0_29 = arith.constant 0 : index
    %55 = vector.load %arg9[%c56, %c0_29] : memref<432x1024xbf16, #tpu.memory_space<vmem>>, vector<8x1024xbf16>
    tpu.vector_store %arg9[%c56, %c0_29], %54 {strides = array<i32>} : memref<432x1024xbf16, #tpu.memory_space<vmem>>, vector<8x1024xbf16>,
    %c0_30 = arith.constant 0 : index
    %c39 = arith.constant 39 : index
    %56 = vector.load %arg7[%c0_30, %c39] : memref<8x1280xbf16, #tpu.memory_space<vmem>>, vector<8x1024xbf16>
    %c64 = arith.constant 64 : index
    %c0_31 = arith.constant 0 : index
    %57 = vector.load %arg9[%c64, %c0_31] : memref<432x1024xbf16, #tpu.memory_space<vmem>>, vector<8x1024xbf16>
    tpu.vector_store %arg9[%c64, %c0_31], %56 {strides = array<i32>} : memref<432x1024xbf16, #tpu.memory_space<vmem>>, vector<8x1024xbf16>,
    %c0_32 = arith.constant 0 : index
    %c117 = arith.constant 117 : index
    %58 = vector.load %arg7[%c0_32, %c117] : memref<8x1280xbf16, #tpu.memory_space<vmem>>, vector<8x1024xbf16>
    %c72 = arith.constant 72 : index
    %c0_33 = arith.constant 0 : index
    %59 = vector.load %arg9[%c72, %c0_33] : memref<432x1024xbf16, #tpu.memory_space<vmem>>, vector<8x1024xbf16>
    tpu.vector_store %arg9[%c72, %c0_33], %58 {strides = array<i32>} : memref<432x1024xbf16, #tpu.memory_space<vmem>>, vector<8x1024xbf16>,
    %c0_34 = arith.constant 0 : index
    %c118 = arith.constant 118 : index
    %60 = vector.load %arg7[%c0_34, %c118] : memref<8x1280xbf16, #tpu.memory_space<vmem>>, vector<8x1024xbf16>
    %c80 = arith.constant 80 : index
    %c0_35 = arith.constant 0 : index
    %61 = vector.load %arg9[%c80, %c0_35] : memref<432x1024xbf16, #tpu.memory_space<vmem>>, vector<8x1024xbf16>
    tpu.vector_store %arg9[%c80, %c0_35], %60 {strides = array<i32>} : memref<432x1024xbf16, #tpu.memory_space<vmem>>, vector<8x1024xbf16>,
    %c0_36 = arith.constant 0 : index
    %c119 = arith.constant 119 : index
    %62 = vector.load %arg7[%c0_36, %c119] : memref<8x1280xbf16, #tpu.memory_space<vmem>>, vector<8x1024xbf16>
    %c88 = arith.constant 88 : index
    %c0_37 = arith.constant 0 : index
    %63 = vector.load %arg9[%c88, %c0_37] : memref<432x1024xbf16, #tpu.memory_space<vmem>>, vector<8x1024xbf16>
    tpu.vector_store %arg9[%c88, %c0_37], %62 {strides = array<i32>} : memref<432x1024xbf16, #tpu.memory_space<vmem>>, vector<8x1024xbf16>,
    %c0_38 = arith.constant 0 : index
    %c127 = arith.constant 127 : index
    %64 = vector.load %arg7[%c0_38, %c127] : memref<8x1280xbf16, #tpu.memory_space<vmem>>, vector<8x1024xbf16>
    %c96 = arith.constant 96 : index
    %c0_39 = arith.constant 0 : index
    %65 = vector.load %arg9[%c96, %c0_39] : memref<432x1024xbf16, #tpu.memory_space<vmem>>, vector<8x1024xbf16>
    tpu.vector_store %arg9[%c96, %c0_39], %64 {strides = array<i32>} : memref<432x1024xbf16, #tpu.memory_space<vmem>>, vector<8x1024xbf16>,
    %c0_40 = arith.constant 0 : index
    %c128_41 = arith.constant 128 : index
    %66 = vector.load %arg7[%c0_40, %c128_41] : memref<8x1280xbf16, #tpu.memory_space<vmem>>, vector<8x1024xbf16>
    %c104 = arith.constant 104 : index
    %c0_42 = arith.constant 0 : index
    %67 = vector.load %arg9[%c104, %c0_42] : memref<432x1024xbf16, #tpu.memory_space<vmem>>, vector<8x1024xbf16>
    tpu.vector_store %arg9[%c104, %c0_42], %66 {strides = array<i32>} : memref<432x1024xbf16, #tpu.memory_space<vmem>>, vector<8x1024xbf16>,
    %c0_43 = arith.constant 0 : index
    %c129 = arith.constant 129 : index
    %68 = vector.load %arg7[%c0_43, %c129] : memref<8x1280xbf16, #tpu.memory_space<vmem>>, vector<8x1024xbf16>
    %c112 = arith.constant 112 : index
    %c0_44 = arith.constant 0 : index
    %69 = vector.load %arg9[%c112, %c0_44] : memref<432x1024xbf16, #tpu.memory_space<vmem>>, vector<8x1024xbf16>
    tpu.vector_store %arg9[%c112, %c0_44], %68 {strides = array<i32>} : memref<432x1024xbf16, #tpu.memory_space<vmem>>, vector<8x1024xbf16>,
    %c0_45 = arith.constant 0 : index
    %c137 = arith.constant 137 : index
    %70 = vector.load %arg7[%c0_45, %c137] : memref<8x1280xbf16, #tpu.memory_space<vmem>>, vector<8x1024xbf16>
    %c120 = arith.constant 120 : index
    %c0_46 = arith.constant 0 : index
    %71 = vector.load %arg9[%c120, %c0_46] : memref<432x1024xbf16, #tpu.memory_space<vmem>>, vector<8x1024xbf16>
    tpu.vector_store %arg9[%c120, %c0_46], %70 {strides = array<i32>} : memref<432x1024xbf16, #tpu.memory_space<vmem>>, vector<8x1024xbf16>,
    %c0_47 = arith.constant 0 : index
    %c138 = arith.constant 138 : index
    %72 = vector.load %arg7[%c0_47, %c138] : memref<8x1280xbf16, #tpu.memory_space<vmem>>, vector<8x1024xbf16>
    %c128_48 = arith.constant 128 : index
    %c0_49 = arith.constant 0 : index
    %73 = vector.load %arg9[%c128_48, %c0_49] : memref<432x1024xbf16, #tpu.memory_space<vmem>>, vector<8x1024xbf16>
    tpu.vector_store %arg9[%c128_48, %c0_49], %72 {strides = array<i32>} : memref<432x1024xbf16, #tpu.memory_space<vmem>>, vector<8x1024xbf16>,
    %c0_50 = arith.constant 0 : index
    %c139 = arith.constant 139 : index
    %74 = vector.load %arg7[%c0_50, %c139] : memref<8x1280xbf16, #tpu.memory_space<vmem>>, vector<8x1024xbf16>
    %c136 = arith.constant 136 : index
    %c0_51 = arith.constant 0 : index
    %75 = vector.load %arg9[%c136, %c0_51] : memref<432x1024xbf16, #tpu.memory_space<vmem>>, vector<8x1024xbf16>
    tpu.vector_store %arg9[%c136, %c0_51], %74 {strides = array<i32>} : memref<432x1024xbf16, #tpu.memory_space<vmem>>, vector<8x1024xbf16>,
    %c0_52 = arith.constant 0 : index
    %c217 = arith.constant 217 : index
    %76 = vector.load %arg7[%c0_52, %c217] : memref<8x1280xbf16, #tpu.memory_space<vmem>>, vector<8x1024xbf16>
    %c144 = arith.constant 144 : index
    %c0_53 = arith.constant 0 : index
    %77 = vector.load %arg9[%c144, %c0_53] : memref<432x1024xbf16, #tpu.memory_space<vmem>>, vector<8x1024xbf16>
    tpu.vector_store %arg9[%c144, %c0_53], %76 {strides = array<i32>} : memref<432x1024xbf16, #tpu.memory_space<vmem>>, vector<8x1024xbf16>,
    %c0_54 = arith.constant 0 : index
    %c218 = arith.constant 218 : index
    %78 = vector.load %arg7[%c0_54, %c218] : memref<8x1280xbf16, #tpu.memory_space<vmem>>, vector<8x1024xbf16>
    %c152 = arith.constant 152 : index
    %c0_55 = arith.constant 0 : index
    %79 = vector.load %arg9[%c152, %c0_55] : memref<432x1024xbf16, #tpu.memory_space<vmem>>, vector<8x1024xbf16>
    tpu.vector_store %arg9[%c152, %c0_55], %78 {strides = array<i32>} : memref<432x1024xbf16, #tpu.memory_space<vmem>>, vector<8x1024xbf16>,
    %c0_56 = arith.constant 0 : index
    %c219 = arith.constant 219 : index
    %80 = vector.load %arg7[%c0_56, %c219] : memref<8x1280xbf16, #tpu.memory_space<vmem>>, vector<8x1024xbf16>
    %c160 = arith.constant 160 : index
    %c0_57 = arith.constant 0 : index
    %81 = vector.load %arg9[%c160, %c0_57] : memref<432x1024xbf16, #tpu.memory_space<vmem>>, vector<8x1024xbf16>
    tpu.vector_store %arg9[%c160, %c0_57], %80 {strides = array<i32>} : memref<432x1024xbf16, #tpu.memory_space<vmem>>, vector<8x1024xbf16>,
    %c0_58 = arith.constant 0 : index
    %c227 = arith.constant 227 : index
    %82 = vector.load %arg7[%c0_58, %c227] : memref<8x1280xbf16, #tpu.memory_space<vmem>>, vector<8x1024xbf16>
    %c168 = arith.constant 168 : index
    %c0_59 = arith.constant 0 : index
    %83 = vector.load %arg9[%c168, %c0_59] : memref<432x1024xbf16, #tpu.memory_space<vmem>>, vector<8x1024xbf16>
    tpu.vector_store %arg9[%c168, %c0_59], %82 {strides = array<i32>} : memref<432x1024xbf16, #tpu.memory_space<vmem>>, vector<8x1024xbf16>,
    %c0_60 = arith.constant 0 : index
    %c228 = arith.constant 228 : index
    %84 = vector.load %arg7[%c0_60, %c228] : memref<8x1280xbf16, #tpu.memory_space<vmem>>, vector<8x1024xbf16>
    %c176 = arith.constant 176 : index
    %c0_61 = arith.constant 0 : index
    %85 = vector.load %arg9[%c176, %c0_61] : memref<432x1024xbf16, #tpu.memory_space<vmem>>, vector<8x1024xbf16>
    tpu.vector_store %arg9[%c176, %c0_61], %84 {strides = array<i32>} : memref<432x1024xbf16, #tpu.memory_space<vmem>>, vector<8x1024xbf16>,
    %c0_62 = arith.constant 0 : index
    %c229 = arith.constant 229 : index
    %86 = vector.load %arg7[%c0_62, %c229] : memref<8x1280xbf16, #tpu.memory_space<vmem>>, vector<8x1024xbf16>
    %c184 = arith.constant 184 : index
    %c0_63 = arith.constant 0 : index
    %87 = vector.load %arg9[%c184, %c0_63] : memref<432x1024xbf16, #tpu.memory_space<vmem>>, vector<8x1024xbf16>
    tpu.vector_store %arg9[%c184, %c0_63], %86 {strides = array<i32>} : memref<432x1024xbf16, #tpu.memory_space<vmem>>, vector<8x1024xbf16>,
    %c0_64 = arith.constant 0 : index
    %c237 = arith.constant 237 : index
    %88 = vector.load %arg7[%c0_64, %c237] : memref<8x1280xbf16, #tpu.memory_space<vmem>>, vector<8x1024xbf16>
    %c192 = arith.constant 192 : index
    %c0_65 = arith.constant 0 : index
    %89 = vector.load %arg9[%c192, %c0_65] : memref<432x1024xbf16, #tpu.memory_space<vmem>>, vector<8x1024xbf16>
    tpu.vector_store %arg9[%c192, %c0_65], %88 {strides = array<i32>} : memref<432x1024xbf16, #tpu.memory_space<vmem>>, vector<8x1024xbf16>,
    %c0_66 = arith.constant 0 : index
    %c238 = arith.constant 238 : index
    %90 = vector.load %arg7[%c0_66, %c238] : memref<8x1280xbf16, #tpu.memory_space<vmem>>, vector<8x1024xbf16>
    %c200 = arith.constant 200 : index
    %c0_67 = arith.constant 0 : index
    %91 = vector.load %arg9[%c200, %c0_67] : memref<432x1024xbf16, #tpu.memory_space<vmem>>, vector<8x1024xbf16>
    tpu.vector_store %arg9[%c200, %c0_67], %90 {strides = array<i32>} : memref<432x1024xbf16, #tpu.memory_space<vmem>>, vector<8x1024xbf16>,
    %c0_68 = arith.constant 0 : index
    %c239 = arith.constant 239 : index
    %92 = vector.load %arg7[%c0_68, %c239] : memref<8x1280xbf16, #tpu.memory_space<vmem>>, vector<8x1024xbf16>
    %c208 = arith.constant 208 : index
    %c0_69 = arith.constant 0 : index
    %93 = vector.load %arg9[%c208, %c0_69] : memref<432x1024xbf16, #tpu.memory_space<vmem>>, vector<8x1024xbf16>
    tpu.vector_store %arg9[%c208, %c0_69], %92 {strides = array<i32>} : memref<432x1024xbf16, #tpu.memory_space<vmem>>, vector<8x1024xbf16>,
    %c0_70 = arith.constant 0 : index
    %c0_71 = arith.constant 0 : index
    %94 = vector.load %arg2[%c0_70, %c0_71] : memref<16x216xbf16, #tpu.memory_space<vmem>>, vector<16x216xbf16>
    %c0_72 = arith.constant 0 : index
    %c0_73 = arith.constant 0 : index
    %95 = vector.load %arg9[%c0_72, %c0_73] : memref<432x1024xbf16, #tpu.memory_space<vmem>>, vector<216x1024xbf16>
    %cst_74 = arith.constant dense<0.000000e+00> : vector<16x1024xf32>
    %96 = tpu.matmul %94, %95, %cst_74 {dimension_numbers = #tpu.dot_dimension_numbers<[1], [0], [0], [1], [0, 0, 1, 1], [], []>} : vector<16x216xbf16>, vector<216x1024xbf16>, vector<16x1024xf32> -> vector<16x1024xf32>
    %c0_75 = arith.constant 0 : index
    %c0_76 = arith.constant 0 : index
    %97 = vector.load %arg3[%c0_75, %c0_76] : memref<16x1xf32, #tpu.memory_space<vmem>>, vector<16x1xf32>
    %98 = vector.broadcast %97 : vector<16x1xf32> to vector<16x1024xf32>
    %99 = arith.addf %96, %98 : vector<16x1024xf32>
    %cst_77 = arith.constant 0.000000e+00 : f32
    %100 = vector.broadcast %cst_77 : f32 to vector<16x1024xf32>
    %101 = arith.maximumf %99, %100 : vector<16x1024xf32>
    %cst_78 = arith.constant 0.000000e+00 : f32
    %102 = vector.shape_cast %39 : vector<1x1024xi1> to vector<1x1024xi1>
    %103 = vector.broadcast %102 : vector<1x1024xi1> to vector<16x1024xi1>
    %104 = vector.broadcast %cst_78 : f32 to vector<16x1024xf32>
    %105 = arith.select %103, %101, %104 : vector<16x1024xi1>, vector<16x1024xf32>
    %106 = arith.truncf %105 : vector<16x1024xf32> to vector<16x1024xbf16>
    %c0_79 = arith.constant 0 : index
    %c128_80 = arith.constant 128 : index
    %107 = vector.load %arg8[%c0_79, %c128_80] : memref<16x1280xbf16, #tpu.memory_space<vmem>>, vector<16x1024xbf16>
    tpu.vector_store %arg8[%c0_79, %c128_80], %106 {strides = array<i32>} : memref<16x1280xbf16, #tpu.memory_space<vmem>>, vector<16x1024xbf16>,
    %c0_81 = arith.constant 0 : index
    %c17_82 = arith.constant 17 : index
    %108 = vector.load %arg8[%c0_81, %c17_82] : memref<16x1280xbf16, #tpu.memory_space<vmem>>, vector<16x1024xbf16>
    %c0_83 = arith.constant 0 : index
    %c0_84 = arith.constant 0 : index
    %109 = vector.load %arg9[%c0_83, %c0_84] : memref<432x1024xbf16, #tpu.memory_space<vmem>>, vector<16x1024xbf16>
    tpu.vector_store %arg9[%c0_83, %c0_84], %108 {strides = array<i32>} : memref<432x1024xbf16, #tpu.memory_space<vmem>>, vector<16x1024xbf16>,
    %c0_85 = arith.constant 0 : index
    %c18_86 = arith.constant 18 : index
    %110 = vector.load %arg8[%c0_85, %c18_86] : memref<16x1280xbf16, #tpu.memory_space<vmem>>, vector<16x1024xbf16>
    %c16_87 = arith.constant 16 : index
    %c0_88 = arith.constant 0 : index
    %111 = vector.load %arg9[%c16_87, %c0_88] : memref<432x1024xbf16, #tpu.memory_space<vmem>>, vector<16x1024xbf16>
    tpu.vector_store %arg9[%c16_87, %c0_88], %110 {strides = array<i32>} : memref<432x1024xbf16, #tpu.memory_space<vmem>>, vector<16x1024xbf16>,
    %c0_89 = arith.constant 0 : index
    %c19_90 = arith.constant 19 : index
    %112 = vector.load %arg8[%c0_89, %c19_90] : memref<16x1280xbf16, #tpu.memory_space<vmem>>, vector<16x1024xbf16>
    %c32_91 = arith.constant 32 : index
    %c0_92 = arith.constant 0 : index
    %113 = vector.load %arg9[%c32_91, %c0_92] : memref<432x1024xbf16, #tpu.memory_space<vmem>>, vector<16x1024xbf16>
    tpu.vector_store %arg9[%c32_91, %c0_92], %112 {strides = array<i32>} : memref<432x1024xbf16, #tpu.memory_space<vmem>>, vector<16x1024xbf16>,
    %c0_93 = arith.constant 0 : index
    %c27_94 = arith.constant 27 : index
    %114 = vector.load %arg8[%c0_93, %c27_94] : memref<16x1280xbf16, #tpu.memory_space<vmem>>, vector<16x1024xbf16>
    %c48_95 = arith.constant 48 : index
    %c0_96 = arith.constant 0 : index
    %115 = vector.load %arg9[%c48_95, %c0_96] : memref<432x1024xbf16, #tpu.memory_space<vmem>>, vector<16x1024xbf16>
    tpu.vector_store %arg9[%c48_95, %c0_96], %114 {strides = array<i32>} : memref<432x1024xbf16, #tpu.memory_space<vmem>>, vector<16x1024xbf16>,
    %c0_97 = arith.constant 0 : index
    %c28_98 = arith.constant 28 : index
    %116 = vector.load %arg8[%c0_97, %c28_98] : memref<16x1280xbf16, #tpu.memory_space<vmem>>, vector<16x1024xbf16>
    %c64_99 = arith.constant 64 : index
    %c0_100 = arith.constant 0 : index
    %117 = vector.load %arg9[%c64_99, %c0_100] : memref<432x1024xbf16, #tpu.memory_space<vmem>>, vector<16x1024xbf16>
    tpu.vector_store %arg9[%c64_99, %c0_100], %116 {strides = array<i32>} : memref<432x1024xbf16, #tpu.memory_space<vmem>>, vector<16x1024xbf16>,
    %c0_101 = arith.constant 0 : index
    %c29_102 = arith.constant 29 : index
    %118 = vector.load %arg8[%c0_101, %c29_102] : memref<16x1280xbf16, #tpu.memory_space<vmem>>, vector<16x1024xbf16>
    %c80_103 = arith.constant 80 : index
    %c0_104 = arith.constant 0 : index
    %119 = vector.load %arg9[%c80_103, %c0_104] : memref<432x1024xbf16, #tpu.memory_space<vmem>>, vector<16x1024xbf16>
    tpu.vector_store %arg9[%c80_103, %c0_104], %118 {strides = array<i32>} : memref<432x1024xbf16, #tpu.memory_space<vmem>>, vector<16x1024xbf16>,
    %c0_105 = arith.constant 0 : index
    %c37_106 = arith.constant 37 : index
    %120 = vector.load %arg8[%c0_105, %c37_106] : memref<16x1280xbf16, #tpu.memory_space<vmem>>, vector<16x1024xbf16>
    %c96_107 = arith.constant 96 : index
    %c0_108 = arith.constant 0 : index
    %121 = vector.load %arg9[%c96_107, %c0_108] : memref<432x1024xbf16, #tpu.memory_space<vmem>>, vector<16x1024xbf16>
    tpu.vector_store %arg9[%c96_107, %c0_108], %120 {strides = array<i32>} : memref<432x1024xbf16, #tpu.memory_space<vmem>>, vector<16x1024xbf16>,
    %c0_109 = arith.constant 0 : index
    %c38_110 = arith.constant 38 : index
    %122 = vector.load %arg8[%c0_109, %c38_110] : memref<16x1280xbf16, #tpu.memory_space<vmem>>, vector<16x1024xbf16>
    %c112_111 = arith.constant 112 : index
    %c0_112 = arith.constant 0 : index
    %123 = vector.load %arg9[%c112_111, %c0_112] : memref<432x1024xbf16, #tpu.memory_space<vmem>>, vector<16x1024xbf16>
    tpu.vector_store %arg9[%c112_111, %c0_112], %122 {strides = array<i32>} : memref<432x1024xbf16, #tpu.memory_space<vmem>>, vector<16x1024xbf16>,
    %c0_113 = arith.constant 0 : index
    %c39_114 = arith.constant 39 : index
    %124 = vector.load %arg8[%c0_113, %c39_114] : memref<16x1280xbf16, #tpu.memory_space<vmem>>, vector<16x1024xbf16>
    %c128_115 = arith.constant 128 : index
    %c0_116 = arith.constant 0 : index
    %125 = vector.load %arg9[%c128_115, %c0_116] : memref<432x1024xbf16, #tpu.memory_space<vmem>>, vector<16x1024xbf16>
    tpu.vector_store %arg9[%c128_115, %c0_116], %124 {strides = array<i32>} : memref<432x1024xbf16, #tpu.memory_space<vmem>>, vector<16x1024xbf16>,
    %c0_117 = arith.constant 0 : index
    %c117_118 = arith.constant 117 : index
    %126 = vector.load %arg8[%c0_117, %c117_118] : memref<16x1280xbf16, #tpu.memory_space<vmem>>, vector<16x1024xbf16>
    %c144_119 = arith.constant 144 : index
    %c0_120 = arith.constant 0 : index
    %127 = vector.load %arg9[%c144_119, %c0_120] : memref<432x1024xbf16, #tpu.memory_space<vmem>>, vector<16x1024xbf16>
    tpu.vector_store %arg9[%c144_119, %c0_120], %126 {strides = array<i32>} : memref<432x1024xbf16, #tpu.memory_space<vmem>>, vector<16x1024xbf16>,
    %c0_121 = arith.constant 0 : index
    %c118_122 = arith.constant 118 : index
    %128 = vector.load %arg8[%c0_121, %c118_122] : memref<16x1280xbf16, #tpu.memory_space<vmem>>, vector<16x1024xbf16>
    %c160_123 = arith.constant 160 : index
    %c0_124 = arith.constant 0 : index
    %129 = vector.load %arg9[%c160_123, %c0_124] : memref<432x1024xbf16, #tpu.memory_space<vmem>>, vector<16x1024xbf16>
    tpu.vector_store %arg9[%c160_123, %c0_124], %128 {strides = array<i32>} : memref<432x1024xbf16, #tpu.memory_space<vmem>>, vector<16x1024xbf16>,
    %c0_125 = arith.constant 0 : index
    %c119_126 = arith.constant 119 : index
    %130 = vector.load %arg8[%c0_125, %c119_126] : memref<16x1280xbf16, #tpu.memory_space<vmem>>, vector<16x1024xbf16>
    %c176_127 = arith.constant 176 : index
    %c0_128 = arith.constant 0 : index
    %131 = vector.load %arg9[%c176_127, %c0_128] : memref<432x1024xbf16, #tpu.memory_space<vmem>>, vector<16x1024xbf16>
    tpu.vector_store %arg9[%c176_127, %c0_128], %130 {strides = array<i32>} : memref<432x1024xbf16, #tpu.memory_space<vmem>>, vector<16x1024xbf16>,
    %c0_129 = arith.constant 0 : index
    %c127_130 = arith.constant 127 : index
    %132 = vector.load %arg8[%c0_129, %c127_130] : memref<16x1280xbf16, #tpu.memory_space<vmem>>, vector<16x1024xbf16>
    %c192_131 = arith.constant 192 : index
    %c0_132 = arith.constant 0 : index
    %133 = vector.load %arg9[%c192_131, %c0_132] : memref<432x1024xbf16, #tpu.memory_space<vmem>>, vector<16x1024xbf16>
    tpu.vector_store %arg9[%c192_131, %c0_132], %132 {strides = array<i32>} : memref<432x1024xbf16, #tpu.memory_space<vmem>>, vector<16x1024xbf16>,
    %c0_133 = arith.constant 0 : index
    %c128_134 = arith.constant 128 : index
    %134 = vector.load %arg8[%c0_133, %c128_134] : memref<16x1280xbf16, #tpu.memory_space<vmem>>, vector<16x1024xbf16>
    %c208_135 = arith.constant 208 : index
    %c0_136 = arith.constant 0 : index
    %135 = vector.load %arg9[%c208_135, %c0_136] : memref<432x1024xbf16, #tpu.memory_space<vmem>>, vector<16x1024xbf16>
    tpu.vector_store %arg9[%c208_135, %c0_136], %134 {strides = array<i32>} : memref<432x1024xbf16, #tpu.memory_space<vmem>>, vector<16x1024xbf16>,
    %c0_137 = arith.constant 0 : index
    %c129_138 = arith.constant 129 : index
    %136 = vector.load %arg8[%c0_137, %c129_138] : memref<16x1280xbf16, #tpu.memory_space<vmem>>, vector<16x1024xbf16>
    %c224 = arith.constant 224 : index
    %c0_139 = arith.constant 0 : index
    %137 = vector.load %arg9[%c224, %c0_139] : memref<432x1024xbf16, #tpu.memory_space<vmem>>, vector<16x1024xbf16>
    tpu.vector_store %arg9[%c224, %c0_139], %136 {strides = array<i32>} : memref<432x1024xbf16, #tpu.memory_space<vmem>>, vector<16x1024xbf16>,
    %c0_140 = arith.constant 0 : index
    %c137_141 = arith.constant 137 : index
    %138 = vector.load %arg8[%c0_140, %c137_141] : memref<16x1280xbf16, #tpu.memory_space<vmem>>, vector<16x1024xbf16>
    %c240 = arith.constant 240 : index
    %c0_142 = arith.constant 0 : index
    %139 = vector.load %arg9[%c240, %c0_142] : memref<432x1024xbf16, #tpu.memory_space<vmem>>, vector<16x1024xbf16>
    tpu.vector_store %arg9[%c240, %c0_142], %138 {strides = array<i32>} : memref<432x1024xbf16, #tpu.memory_space<vmem>>, vector<16x1024xbf16>,
    %c0_143 = arith.constant 0 : index
    %c138_144 = arith.constant 138 : index
    %140 = vector.load %arg8[%c0_143, %c138_144] : memref<16x1280xbf16, #tpu.memory_space<vmem>>, vector<16x1024xbf16>
    %c256 = arith.constant 256 : index
    %c0_145 = arith.constant 0 : index
    %141 = vector.load %arg9[%c256, %c0_145] : memref<432x1024xbf16, #tpu.memory_space<vmem>>, vector<16x1024xbf16>
    tpu.vector_store %arg9[%c256, %c0_145], %140 {strides = array<i32>} : memref<432x1024xbf16, #tpu.memory_space<vmem>>, vector<16x1024xbf16>,
    %c0_146 = arith.constant 0 : index
    %c139_147 = arith.constant 139 : index
    %142 = vector.load %arg8[%c0_146, %c139_147] : memref<16x1280xbf16, #tpu.memory_space<vmem>>, vector<16x1024xbf16>
    %c272 = arith.constant 272 : index
    %c0_148 = arith.constant 0 : index
    %143 = vector.load %arg9[%c272, %c0_148] : memref<432x1024xbf16, #tpu.memory_space<vmem>>, vector<16x1024xbf16>
    tpu.vector_store %arg9[%c272, %c0_148], %142 {strides = array<i32>} : memref<432x1024xbf16, #tpu.memory_space<vmem>>, vector<16x1024xbf16>,
    %c0_149 = arith.constant 0 : index
    %c217_150 = arith.constant 217 : index
    %144 = vector.load %arg8[%c0_149, %c217_150] : memref<16x1280xbf16, #tpu.memory_space<vmem>>, vector<16x1024xbf16>
    %c288 = arith.constant 288 : index
    %c0_151 = arith.constant 0 : index
    %145 = vector.load %arg9[%c288, %c0_151] : memref<432x1024xbf16, #tpu.memory_space<vmem>>, vector<16x1024xbf16>
    tpu.vector_store %arg9[%c288, %c0_151], %144 {strides = array<i32>} : memref<432x1024xbf16, #tpu.memory_space<vmem>>, vector<16x1024xbf16>,
    %c0_152 = arith.constant 0 : index
    %c218_153 = arith.constant 218 : index
    %146 = vector.load %arg8[%c0_152, %c218_153] : memref<16x1280xbf16, #tpu.memory_space<vmem>>, vector<16x1024xbf16>
    %c304 = arith.constant 304 : index
    %c0_154 = arith.constant 0 : index
    %147 = vector.load %arg9[%c304, %c0_154] : memref<432x1024xbf16, #tpu.memory_space<vmem>>, vector<16x1024xbf16>
    tpu.vector_store %arg9[%c304, %c0_154], %146 {strides = array<i32>} : memref<432x1024xbf16, #tpu.memory_space<vmem>>, vector<16x1024xbf16>,
    %c0_155 = arith.constant 0 : index
    %c219_156 = arith.constant 219 : index
    %148 = vector.load %arg8[%c0_155, %c219_156] : memref<16x1280xbf16, #tpu.memory_space<vmem>>, vector<16x1024xbf16>
    %c320 = arith.constant 320 : index
    %c0_157 = arith.constant 0 : index
    %149 = vector.load %arg9[%c320, %c0_157] : memref<432x1024xbf16, #tpu.memory_space<vmem>>, vector<16x1024xbf16>
    tpu.vector_store %arg9[%c320, %c0_157], %148 {strides = array<i32>} : memref<432x1024xbf16, #tpu.memory_space<vmem>>, vector<16x1024xbf16>,
    %c0_158 = arith.constant 0 : index
    %c227_159 = arith.constant 227 : index
    %150 = vector.load %arg8[%c0_158, %c227_159] : memref<16x1280xbf16, #tpu.memory_space<vmem>>, vector<16x1024xbf16>
    %c336 = arith.constant 336 : index
    %c0_160 = arith.constant 0 : index
    %151 = vector.load %arg9[%c336, %c0_160] : memref<432x1024xbf16, #tpu.memory_space<vmem>>, vector<16x1024xbf16>
    tpu.vector_store %arg9[%c336, %c0_160], %150 {strides = array<i32>} : memref<432x1024xbf16, #tpu.memory_space<vmem>>, vector<16x1024xbf16>,
    %c0_161 = arith.constant 0 : index
    %c228_162 = arith.constant 228 : index
    %152 = vector.load %arg8[%c0_161, %c228_162] : memref<16x1280xbf16, #tpu.memory_space<vmem>>, vector<16x1024xbf16>
    %c352 = arith.constant 352 : index
    %c0_163 = arith.constant 0 : index
    %153 = vector.load %arg9[%c352, %c0_163] : memref<432x1024xbf16, #tpu.memory_space<vmem>>, vector<16x1024xbf16>
    tpu.vector_store %arg9[%c352, %c0_163], %152 {strides = array<i32>} : memref<432x1024xbf16, #tpu.memory_space<vmem>>, vector<16x1024xbf16>,
    %c0_164 = arith.constant 0 : index
    %c229_165 = arith.constant 229 : index
    %154 = vector.load %arg8[%c0_164, %c229_165] : memref<16x1280xbf16, #tpu.memory_space<vmem>>, vector<16x1024xbf16>
    %c368 = arith.constant 368 : index
    %c0_166 = arith.constant 0 : index
    %155 = vector.load %arg9[%c368, %c0_166] : memref<432x1024xbf16, #tpu.memory_space<vmem>>, vector<16x1024xbf16>
    tpu.vector_store %arg9[%c368, %c0_166], %154 {strides = array<i32>} : memref<432x1024xbf16, #tpu.memory_space<vmem>>, vector<16x1024xbf16>,
    %c0_167 = arith.constant 0 : index
    %c237_168 = arith.constant 237 : index
    %156 = vector.load %arg8[%c0_167, %c237_168] : memref<16x1280xbf16, #tpu.memory_space<vmem>>, vector<16x1024xbf16>
    %c384 = arith.constant 384 : index
    %c0_169 = arith.constant 0 : index
    %157 = vector.load %arg9[%c384, %c0_169] : memref<432x1024xbf16, #tpu.memory_space<vmem>>, vector<16x1024xbf16>
    tpu.vector_store %arg9[%c384, %c0_169], %156 {strides = array<i32>} : memref<432x1024xbf16, #tpu.memory_space<vmem>>, vector<16x1024xbf16>,
    %c0_170 = arith.constant 0 : index
    %c238_171 = arith.constant 238 : index
    %158 = vector.load %arg8[%c0_170, %c238_171] : memref<16x1280xbf16, #tpu.memory_space<vmem>>, vector<16x1024xbf16>
    %c400 = arith.constant 400 : index
    %c0_172 = arith.constant 0 : index
    %159 = vector.load %arg9[%c400, %c0_172] : memref<432x1024xbf16, #tpu.memory_space<vmem>>, vector<16x1024xbf16>
    tpu.vector_store %arg9[%c400, %c0_172], %158 {strides = array<i32>} : memref<432x1024xbf16, #tpu.memory_space<vmem>>, vector<16x1024xbf16>,
    %c0_173 = arith.constant 0 : index
    %c239_174 = arith.constant 239 : index
    %160 = vector.load %arg8[%c0_173, %c239_174] : memref<16x1280xbf16, #tpu.memory_space<vmem>>, vector<16x1024xbf16>
    %c416 = arith.constant 416 : index
    %c0_175 = arith.constant 0 : index
    %161 = vector.load %arg9[%c416, %c0_175] : memref<432x1024xbf16, #tpu.memory_space<vmem>>, vector<16x1024xbf16>
    tpu.vector_store %arg9[%c416, %c0_175], %160 {strides = array<i32>} : memref<432x1024xbf16, #tpu.memory_space<vmem>>, vector<16x1024xbf16>,
    %c0_176 = arith.constant 0 : index
    %c0_177 = arith.constant 0 : index
    %162 = vector.load %arg4[%c0_176, %c0_177] : memref<8x432xbf16, #tpu.memory_space<vmem>>, vector<8x432xbf16>
    %c0_178 = arith.constant 0 : index
    %c0_179 = arith.constant 0 : index
    %163 = vector.load %arg9[%c0_178, %c0_179] : memref<432x1024xbf16, #tpu.memory_space<vmem>>, vector<432x1024xbf16>
    %cst_180 = arith.constant dense<0.000000e+00> : vector<8x1024xf32>
    %164 = tpu.matmul %162, %163, %cst_180 {dimension_numbers = #tpu.dot_dimension_numbers<[1], [0], [0], [1], [0, 0, 1, 1], [], []>} : vector<8x432xbf16>, vector<432x1024xbf16>, vector<8x1024xf32> -> vector<8x1024xf32>
    %c0_181 = arith.constant 0 : index
    %c0_182 = arith.constant 0 : index
    %165 = vector.load %arg5[%c0_181, %c0_182] : memref<8x1xf32, #tpu.memory_space<vmem>>, vector<8x1xf32>
    %166 = vector.broadcast %165 : vector<8x1xf32> to vector<8x1024xf32>
    %167 = arith.addf %164, %166 : vector<8x1024xf32>
    %cst_183 = arith.constant 0.000000e+00 : f32
    %168 = vector.broadcast %cst_183 : f32 to vector<8x1024xf32>
    %169 = arith.maximumf %167, %168 : vector<8x1024xf32>
    %c0_184 = arith.constant 0 : index
    %c0_185 = arith.constant 0 : index
    %c0_186 = arith.constant 0 : index
    %170 = vector.load %arg6[%c0_184, %c0_185, %c0_186] : memref<1x8x1024xf32, #tpu.memory_space<vmem>>, vector<1x8x1024xf32>
    %171 = vector.shape_cast %170 : vector<1x8x1024xf32> to vector<8x1024xf32>
    %172 = vector.shape_cast %169 : vector<8x1024xf32> to vector<1x8x1024xf32>
    tpu.vector_store %arg6[%c0_184, %c0_185, %c0_186], %172 {strides = array<i32>} : memref<1x8x1024xf32, #tpu.memory_space<vmem>>, vector<1x8x1024xf32>,
    return
  }
  func.func @transform_0(%arg0: i32) -> (i32, i32, i32) {
    %c0_i32 = arith.constant 0 : i32
    %c0_i32_0 = arith.constant 0 : i32
    %c0_i32_1 = arith.constant 0 : i32
    return %arg0, %c0_i32, %c0_i32_0 : i32, i32, i32
  }
  func.func @transform_1(%arg0: i32) -> (i32, i32) {
    %c0_i32 = arith.constant 0 : i32
    %c0_i32_0 = arith.constant 0 : i32
    %c0_i32_1 = arith.constant 0 : i32
    return %c0_i32, %c0_i32_0 : i32, i32
  }
  func.func @transform_2(%arg0: i32) -> (i32, i32) {
    %c0_i32 = arith.constant 0 : i32
    %c0_i32_0 = arith.constant 0 : i32
    %c0_i32_1 = arith.constant 0 : i32
    return %c0_i32, %c0_i32_0 : i32, i32
  }
  func.func @transform_3(%arg0: i32) -> (i32, i32) {
    %c0_i32 = arith.constant 0 : i32
    %c0_i32_0 = arith.constant 0 : i32
    %c0_i32_1 = arith.constant 0 : i32
    return %c0_i32, %c0_i32_0 : i32, i32
  }
  func.func @transform_4(%arg0: i32) -> (i32, i32) {
    %c0_i32 = arith.constant 0 : i32
    %c0_i32_0 = arith.constant 0 : i32
    %c0_i32_1 = arith.constant 0 : i32
    return %c0_i32, %c0_i32_0 : i32, i32
  }
  func.func @transform_5(%arg0: i32) -> (i32, i32, i32) {
    %c0_i32 = arith.constant 0 : i32
    %c0_i32_0 = arith.constant 0 : i32
    %c0_i32_1 = arith.constant 0 : i32
    return %arg0, %c0_i32, %c0_i32_0 : i32, i32, i32
  }
}

</mosaic_0001>

<bundles_post_ra>
// kernel: tpu_custom_call.1
= control target key start
LH: loop header
LB: loop body
LE: loop exit
PB: predicated region body
PF: predicated region fallthrough
CT: control target
= control target key end

     0   :  { %s10858_s0 = inlined_call_operand.hbm [shape: bf16[2,8,1000], index: 0, kind: input, shape index: {}]   ;;  %s10859_s1 = inlined_call_operand.vmem [shape: bf16[16,216], index: 1, kind: input, shape index: {}]   ;;  %s10860_s2 = inlined_call_operand.vmem [shape: f32[16,1], index: 2, kind: input, shape index: {}]   ;;  %s10861_s3 = inlined_call_operand.hbm [shape: bf16[8,432], index: 3, kind: input, shape index: {}]   ;;  %s10862_s4 = inlined_call_operand.vmem [shape: f32[8,1], index: 4, kind: input, shape index: {}]   ;;  %s10863_s5 = inlined_call_operand.hbm [shape: f32[2,8,1024], index: 5, kind: output, shape index: {}]  }
   0x1   :  { %11189 = sst [smem:[#allocation53_spill]] %s10858_s0 }
   0x2   :  { %11190 = sst [smem:[#allocation54_spill]] %s10861_s3 }
   0x3   :  { %11191 = sst [smem:[#allocation55_spill]] %s10862_s4 }
   0x4   :  { %11192 = sst [smem:[#allocation56_spill]] %s10863_s5 }
   0x5   :  { %10 = vsyncpa [#allocation6], 0 }
   0x6   :  { %12 = vsyncpa [#allocation6 + $0x1], 0 }
   0x7   :  { %13 = vsyncpa [#allocation9], 0 }
   0x8   :  { %14 = vsyncpa [#allocation7], 0 }
   0x9   :  { %16 = vsyncpa [#allocation7 + $0x1], 0  ;;  %s7130_s18 = smov 0   ;;  %s7132_s19 = smov 0  }
   0xa   :  { %s7134_s20 = smov 0   ;;  %s7136_s21 = smov 0  }
   0xb LB: > { %11193 = sst [smem:[#allocation14_spill]] %s7055_s18  ;;  %s7151_s22 = sadd.s32 4294967295, %s7067_s21   ;;  %s7067_s21 = sphi %s7136_s21, %s11948_s21   ;;  %s7063_s20 = sphi %s7134_s20, %s11951_s20   ;;  %s7059_s19 = sphi %s7132_s19, %s11950_s19   ;;  %s7055_s18 = sphi %s7130_s18, %s11949_s18  }
   0xc   : > { %11194 = sst [smem:[#allocation15_spill]] %s7059_s19  ;;  %s6456_s23 = sadd.s32 4294967294, %s7067_s21  }
   0xd   : > { %11195 = sst [smem:[#allocation16_spill]] %s7063_s20  ;;  %p42_p0 = scmp.ne.s32.totalorder %s7059_s19, %s7055_s18 }
   0xe   : > { %11196 = sst [smem:[#allocation17_spill]] %s7067_s21  ;;  %p10864_p1 = scmp.eq.s32.totalorder %s7151_s22, 0 }
   0xf   : > { %11197 = sst [smem:[#allocation18_spill]] %s7151_s22  ;;  %p156_p3 = scmp.eq.s32.totalorder %s6456_s23, 1 }
  0x10   : > { %p7160_p4 = por %p10864_p1, %p42_p0  ;;  %p6457_p5 = scmp.ge.s32.totalorder %s7067_s21, 1 }
  0x11   : > { %p7165_p6 = por %p156_p3, %p42_p0  ;;  %p163_p7 = scmp.lt.s32.totalorder %s7067_s21, 3 }
  0x12   : > { %s11198_s24 = scalar_select %p7160_p4, 1, 0 }
  0x13   : > { %s11199_s25 = scalar_select %p7165_p6, 1, 0 }
  0x14   : > { %p7171_p9 = pnand %p6457_p5, %p163_p7  ;;  %s7069_s27 = smov [#allocation8]  }
  0x15   : > { %11200 = sst [smem:[#allocation19_spill]] %s11199_s25  ;;  %s182_s28 = sshll.u32 %s7069_s27, 4  ;;  %s183_s28 = int_to_ptr.vmem [resolvable:$true] %s182_s28 }
  0x16   : > { %s11201_s26 = scalar_select %p7171_p9, 1, 0 }
  0x17   : > { %p6845_p11 = pneg %p7171_p9  ;;  %s7179_s29 = sadd.s32 1, %s7067_s21  }
  0x18   : > { %11202 = sst [smem:[#allocation20_spill]] %s7179_s29  ;;  %s26_s6 = ssub.s32 %s7067_s21, %s7179_s29 }
  0x19   : > { %p7183_p12 = pnand %p6845_p11, %p10864_p1  ;;  %p7189_p13 = scmp.eq.s32.totalorder %s26_s6, 0 }
  0x1a   : > { %s29_s8 = sadd.s32 1, %s7063_s20  ;;  %p36_p0 = scmp.ne.s32.totalorder %s7063_s20, %s7059_s19 }
  0x1b   : > { %p6947_p3 = pneg %p7183_p12  ;;  %s6956_s9 = scalar_lea.vmem %s183_s28, 256 }
  0x1c   : > { %p6957_p5 = scmp.ne.s32.totalorder %s183_s28, %s6956_s9  ;;  %p6964_p8 = scmp.lt.s32.totalorder %s183_s28, %s183_s28 }
  0x1d   : > { %p6965_p2 = scmp.lt.s32.totalorder %s6956_s9, %s6956_s9 }
  0x1e   : > { %p6959_p7 = pnand %p6957_p5, %p6947_p3 }
  0x1f   : > { %p6966_p11 = por %p6965_p2, %p6964_p8 }
  0x20   : > { %p6960_p10 = pneg %p6959_p7 }
  0x22   : > { %p6967_p1 = pnand %p6966_p11, %p6960_p10 }
  0x24   : > { %6970 = shalt.err (!%p6967_p1)
}
  0x25   : > { %s11205_s3 = sld [smem:[#allocation54_spill]]  ;;  %p37_p1 = scmp.eq.s32.totalorder %s7067_s21, 0 }
  0x26   : > { %s7206_s12 = scalar_select %p7189_p13, %s7063_s20, %s29_s8  }
  0x27   : > { %p11207_p2 = scmp.eq.s32.totalorder %s7151_s22, 1  ;;  %p6858_p10 = scmp.lt.s32.totalorder %s7067_s21, 2 }
  0x28   : > { %11206 = sst [smem:[#allocation21_spill]] %s7206_s12  ;;  %s196_s14 = sand.u32 1, %s7063_s20  }
  0x29   : > { %p7214_p8 = por %p11207_p2, %p36_p0  ;;  %p38_p3 = por %p37_p1, %p36_p0 }
  0x2a   : > { %s6460_s15 = sshll.u32 %s196_s14, 5  ;;  %s6827_s16 = sshll.u32 %s7067_s21, 9 }
  0x2b   : > { %6848 = dma.hbm_to_vmem [thread:$0]  (!%p7183_p12), %s11205_s3, 256, %s183_s28, [#allocation9]  }
  0x2c   : > { %s11208_s13 = scalar_select %p7214_p8, 1, 0 }
  0x2d   : > { %s11210_s0 = sld [smem:[#allocation53_spill]]  ;;  %s200_s28 = scalar_lea.vmem [#allocation5], %s6460_s15 }
  0x2e   : > { %11209 = sst [smem:[#allocation22_spill]] %s11208_s13  ;;  %s208_s30 = sshll.u32 %s200_s28, 4  ;;  %s209_s30 = int_to_ptr.vmem [resolvable:$true] %s208_s30 }
  0x2f   : > { %p7229_p12 = pnand %p6858_p10, %p38_p3  ;;  %s197_s7 = scalar_lea.sflag [#allocation6], %s196_s14 }
  0x31   : > { %p6973_p0 = pneg %p7229_p12 }
  0x33   : > { %s7227_s27 = scalar_lea.hbm %s11210_s0, %s6827_s16  ;;  %s6976_s11 = scalar_lea.hbm %s11210_s0, 1024 }
  0x34   : > { %s6971_s8 = scalar_lea.hbm %s7227_s27, 512  ;;  %p6977_p11 = scmp.lt.s32.totalorder %s7227_s27, %s11210_s0 }
  0x35   : > { %p6972_p13 = scmp.ne.s32.totalorder %s7227_s27, %s6971_s8  ;;  %p6978_p1 = scmp.lt.s32.totalorder %s6976_s11, %s6971_s8 }
  0x37   : > { %p6974_p5 = pnand %p6973_p0, %p6972_p13  ;;  %p6979_p2 = por %p6978_p1, %p6977_p11 }
  0x39   : > { %p6975_p7 = pneg %p6974_p5 }
  0x3b   : > { %p6980_p10 = pnand %p6979_p2, %p6975_p7 }
  0x3d   : > { %6983 = shalt.err (!%p6980_p10)
}
  0x3e   : > { %s6984_s17 = scalar_lea.vmem %s209_s30, 512  ;;  %s7070_s14 = smov [#allocation5]  }
  0x3f   : > { %p6985_p3 = scmp.ne.s32.totalorder %s209_s30, %s6984_s17  ;;  %s6989_s23 = sshll.u32 %s7070_s14, 4  ;;  %s6990_s23 = int_to_ptr.vmem [resolvable:$false] %s6989_s23 }
  0x40   : > { %s6991_s28 = scalar_lea.vmem %s6990_s23, 1024  ;;  %p6992_p13 = scmp.lt.s32.totalorder %s209_s30, %s6990_s23 }
  0x41   : > { %p6987_p6 = pnand %p6985_p3, %p6973_p0  ;;  %p6993_p5 = scmp.lt.s32.totalorder %s6991_s28, %s6984_s17 }
  0x43   : > { %p6988_p8 = pneg %p6987_p6  ;;  %p6994_p4 = por %p6993_p5, %p6992_p13 }
  0x45   : > { %p6995_p9 = pnand %p6994_p4, %p6988_p8 }
  0x47   : > { %6998 = shalt.err (!%p6995_p9)
}
  0x48   : > { %6852 = dma.hbm_to_vmem [thread:$0]  (!%p7229_p12), %s7227_s27, 512, %s209_s30, %s197_s7  }
  0x49   : > { %p11212_p7 = scmp.ne.s32.totalorder %s11201_s26, 0 }
  0x4b   : > { %217 = sbr.rel (%p11212_p7) target bundleno = 1456 (0x5b0), region = 40 }
  0x50   : > { %s7250_s8 = sand.u32 1, %s7059_s19   ;;  %p11214_p6 = scmp.ne.s32.totalorder %s11198_s24, 0 }
  0x51   : > { %11213 = sst [smem:[#allocation23_spill]] %s7250_s8  ;;  %s6464_s9 = sshll.u32 %s7250_s8, 5 }
  0x52   : > { %s220_s10 = scalar_lea.sflag [#allocation6], %s7250_s8  ;;  %s7254_s11 = scalar_lea.vmem [#allocation5], %s6464_s9 }
  0x53   : > { %7042 = dma.done.wait (%p11214_p6), %s220_s10, 512  }
  0x54   : > { %7044 = vsyncadd (%p11214_p6), %s220_s10, 4294966784  ;;  %p11215_p4 = scmp.eq.s32.totalorder %s7151_s22, 0 }
  0x56   : > { %7046 = dma.done.wait (%p11215_p4), [#allocation9], 256   ;;  %p11216_p9 = pmov %p11215_p4 }
  0x57   : > { %s6466_s26 = sshll.u32 %s7250_s8, 6  ;;  %p11218_p8 = scmp.ne.s32.totalorder %s7151_s22, 0 }
  0x58   : > { %7048 = vsyncadd (%p11216_p9), [#allocation9], 4294967040  ;;  %s7265_s27 = scalar_lea.vmem [#allocation10], %s6466_s26 }
  0x59   : > { %11217 = sst [smem:[#allocation24_spill]] %s7265_s27  ;;  %258 = sbr.rel (%p11218_p8) target bundleno = 103 (0x67), region = 52 }
  0x5e   : > { %v7071_v0 = vmov 0  }
  0x5f   : > { %259 = vst [vmem:[#allocation2] sm:$0xff] %v7071_v0  ;;  %260 = vst [vmem:[#allocation2 + $0x8] sm:$0xff] %v7071_v0 }
  0x60   : > { %261 = vst [vmem:[#allocation2 + $0x10] sm:$0xff] %v7071_v0  ;;  %262 = vst [vmem:[#allocation2 + $0x18] sm:$0xff] %v7071_v0 }
  0x61   : > { %263 = vst [vmem:[#allocation2 + $0x20] sm:$0xff] %v7071_v0  ;;  %264 = vst [vmem:[#allocation3] sm:$0xff] %v7071_v0 }
  0x62   : > { %265 = vst [vmem:[#allocation3 + $0x8] sm:$0xff] %v7071_v0  ;;  %266 = vst [vmem:[#allocation3 + $0x10] sm:$0xff] %v7071_v0 }
  0x63   : > { %267 = vst [vmem:[#allocation3 + $0x18] sm:$0xff] %v7071_v0  ;;  %268 = vst [vmem:[#allocation3 + $0x20] sm:$0xff] %v7071_v0 }
  0x64   : > { %269 = vst [vmem:[#allocation3 + $0x28] sm:$0xff] %v7071_v0  ;;  %270 = vst [vmem:[#allocation3 + $0x30] sm:$0xff] %v7071_v0 }
  0x65   : > { %271 = vst [vmem:[#allocation3 + $0x38] sm:$0xff] %v7071_v0  ;;  %272 = vst [vmem:[#allocation3 + $0x40] sm:$0xff] %v7071_v0 }
  0x66   : > { %273 = vst [vmem:[#allocation3 + $0x48] sm:$0xff] %v7071_v0 }
  0x67 PF: > { %v7270_v1 = vld [vmem:[%s7254_s11] sm:$0xff]  ;;  %v7273_v2 = vld [vmem:[%s7254_s11 + $0x8] sm:$0xff]  ;;  %v7276_v3 = vld [vmem:[%s7254_s11 + $0x10] sm:$0xff]  ;;  %s10900_s24 = smov 119   ;;  %s10902_s30 = smov 127   ;;  %vm282_vm0 = vcmask 850948  }
  0x68   : > { %278 = vst [vmem:[#allocation2 + $0x4] sm:$0xff] %v7270_v1  ;;  %1079 = vrot.lane.b32.xlu1 %v7270_v1, %s10900_s24  ;;  %1037 = vrot.lane.b32.xlu0 %v7270_v1, %s10902_s30  ;;  %279 = vst [vmem:[#allocation2 + $0xc] sm:$0xff] %v7273_v2  ;;  %vm10976_vm1 = vcmask 1043456   ;;  %s10898_s6 = smov 1   ;;  %v277_v6 = vld [vmem:[%s7254_s11 + $0x18] sm:$0xff]  ;;  %s10896_s7 = smov 10  }
  0x69   : > { %280 = vst [vmem:[#allocation2 + $0x14] sm:$0xff] %v7276_v3  ;;  %vm283_vm2 = vmor %vm282_vm0, %vm10976_vm1  ;;  %s10868_s16 = smov 9   ;;  %s10870_s15 = smov 89   ;;  %vm10966_vm3 = vcmask 1039360   ;;  %vm10967_vm4 = vcmask 973824   ;;  %vm10965_vm5 = vcmask 7168  }
  0x6a   : > { %284 = vst.msk [vmem:[#allocation2 + $0x1c] sm:$0xff] %vm283_vm2, %v277_v6  ;;  %s10872_s17 = smov 11   ;;  %s10894_s14 = smov 91   ;;  %vm10964_vm6 = vcmask 80896   ;;  %vm10954_vm7 = vcmask 72704   ;;  %vm2244_vm8 = vcmask 719872  }
  0x6b   : > { %s10888_s23 = smov 90   ;;  %s10874_s28 = smov 100   ;;  %v7423_v48 = vld [vmem:[%s10859_s1 + $0x4] ss:$8 sps:$4 sm:$0xff]   ;;  %vm10955_vm9 = vcmask 728064   ;;  %vm10916_vm10 = vcmask 89088  }
  0x6c   : > { %1081 = vrot.lane.b32.xlu1 %v7273_v2, %s10900_s24  ;;  %1039 = vrot.lane.b32.xlu0 %v7273_v2, %s10902_s30  ;;  %s10880_s9 = smov 99   ;;  %s10876_s10 = smov 109   ;;  %vm10942_vm11 = vcmask 744448   ;;  %vm10922_vm12 = vcmask 736256   ;;  %vm10938_vm13 = vcmask 818176   ;;  %vm10937_vm14 = vcmask 809984  }
  0x6d   : > { %s10878_s11 = smov 101   ;;  %s10884_s26 = smov 111   ;;  %6583 = vmatprep.mubr.msk.bf16.mxu0 %vm2244_vm8, %v7423_v48  ;;  %6585 = vmatprep.mubr.msk.bf16.mxu1 %vm2244_vm8, %v7423_v48  ;;  %vm10930_vm15 = vcmask 891904   ;;  %vm10931_vm0 = vcmask 826368   ;;  %vm10936_vm2 = vcmask 908288  }
  0x6e   : > { %s11233_s0 = smov 28   ;;  %s11234_s3 = smov 27  }
  0x6f   : > { %v978_v4 = vld [vmem:[#allocation2 + $0x8] sm:$0xff]  ;;  %v977_v5 = vld [vmem:[#allocation2] sm:$0xff]  ;;  %s11235_s12 = smov 37   ;;  %s11236_s20 = smov 29  }
  0x70   : > { %989 = vrot.lane.b32.xlu1 %v978_v4, %s10898_s6  ;;  %987 = vrot.lane.b32.xlu0 %v977_v5, %s10898_s6  ;;  %v979_v7 = vld [vmem:[#allocation2 + $0x10] sm:$0xff]  ;;  %s11237_s19 = smov 39   ;;  %s11238_s29 = smov 38  }
  0x71   : > { %v7446_v55 = vld [vmem:[#allocation2 + $0x1c] sm:$0xff]  ;;  %s11239_s21 = smov 118   ;;  %s11240_s25 = smov 117  }
  0x72   : > { %s11241_s18 = smov 127   ;;  %s11242_s5 = smov 119  }
  0x73   : > { %s11243_s13 = smov 1   ;;  %s11244_s8 = smov 10  }
  0x74   : > { %905 = vrot.lane.b32.xlu1 %v978_v4, %s10896_s7  ;;  %903 = vrot.lane.b32.xlu0 %v977_v5, %s10896_s7  ;;  %s11316_s27 = smov 11  }
  0x78   : > { %947 = vrot.lane.b32.xlu1 %v978_v4, %s10868_s16  ;;  %945 = vrot.lane.b32.xlu0 %v977_v5, %s10868_s16 }
  0x7c   : > { %821 = vrot.lane.b32.xlu1 %v978_v4, %s10870_s15  ;;  %819 = vrot.lane.b32.xlu0 %v977_v5, %s10870_s15 }
  0x80   : > { %863 = vrot.lane.b32.xlu1 %v978_v4, %s10872_s17  ;;  %861 = vrot.lane.b32.xlu0 %v977_v5, %s10872_s17 }
  0x84   : > { %1083 = vrot.lane.b32.xlu1 %v7276_v3, %s10900_s24  ;;  %1041 = vrot.lane.b32.xlu0 %v7276_v3, %s10902_s30 }
  0x88   : > { %737 = vrot.lane.b32.xlu1 %v978_v4, %s10894_s14  ;;  %735 = vrot.lane.b32.xlu0 %v977_v5, %s10894_s14 }
  0x8c   : > { %779 = vrot.lane.b32.xlu1 %v978_v4, %s10888_s23  ;;  %777 = vrot.lane.b32.xlu0 %v977_v5, %s10888_s23 }
  0x90   : > { %991 = vrot.lane.b32.xlu0 %v979_v7, %s10898_s6  ;;  %651 = vrot.lane.b32.xlu1 %v977_v5, %s10874_s28 }
  0x94   : > { %653 = vrot.lane.b32.xlu0 %v978_v4, %s10874_s28  ;;  %693 = vrot.lane.b32.xlu1 %v977_v5, %s10880_s9 }
  0x98   : > { %695 = vrot.lane.b32.xlu0 %v978_v4, %s10880_s9  ;;  %907 = vrot.lane.b32.xlu1 %v979_v7, %s10896_s7 }
  0x9c   : > { %949 = vrot.lane.b32.xlu0 %v979_v7, %s10868_s16  ;;  %567 = vrot.lane.b32.xlu1 %v977_v5, %s10876_s10  ;;  %s10882_s16 = smov 110  }
  0xa0   : > { %569 = vrot.lane.b32.xlu0 %v978_v4, %s10876_s10  ;;  %609 = vrot.lane.b32.xlu1 %v977_v5, %s10878_s11 }
  0xa4   : > { %611 = vrot.lane.b32.xlu0 %v978_v4, %s10878_s11  ;;  %823 = vrot.lane.b32.xlu1 %v979_v7, %s10870_s15  ;;  %s10886_s15 = smov 17  }
  0xa8   : > { %865 = vrot.lane.b32.xlu0 %v979_v7, %s10872_s17  ;;  %482 = vrot.lane.b32.xlu1 %v977_v5, %s10884_s26  ;;  %s10892_s17 = smov 19  }
  0xac   : > { %484 = vrot.lane.b32.xlu0 %v978_v4, %s10884_s26  ;;  %525 = vrot.lane.b32.xlu1 %v977_v5, %s10882_s16 }
  0xb0   : > { %527 = vrot.lane.b32.xlu0 %v978_v4, %s10882_s16  ;;  %739 = vrot.lane.b32.xlu1 %v979_v7, %s10894_s14  ;;  %s10904_s14 = smov 117  }
  0xb4   : > { %781 = vrot.lane.b32.xlu0 %v979_v7, %s10888_s23  ;;  %655 = vrot.lane.b32.xlu1 %v979_v7, %s10874_s28  ;;  %s10890_s28 = smov 18   ;;  %s10906_s23 = smov 118  }
  0xb8   : > { %697 = vrot.lane.b32.xlu0 %v979_v7, %s10880_s9  ;;  %1541 = vrot.lane.b32.xlu1 %v7270_v1, %s10886_s15  ;;  %s10914_s9 = smov 37  }
  0xbc   : > { %1543 = vrot.lane.b32.xlu0 %v7273_v2, %s10886_s15  ;;  %571 = vrot.lane.b32.xlu1 %v979_v7, %s10876_s10  ;;  %s10919_s10 = smov 28  }
  0xc0   : > { %613 = vrot.lane.b32.xlu0 %v979_v7, %s10878_s11  ;;  %1457 = vrot.lane.b32.xlu1 %v7270_v1, %s10892_s17  ;;  %s10917_s11 = smov 27  }
  0xc4   : > { %1459 = vrot.lane.b32.xlu0 %v7273_v2, %s10892_s17  ;;  %1499 = vrot.lane.b32.xlu1 %v7270_v1, %s10890_s28 }
  0xc8   : > { %1501 = vrot.lane.b32.xlu0 %v7273_v2, %s10890_s28  ;;  %486 = vrot.lane.b32.xlu1 %v979_v7, %s10884_s26  ;;  %s10910_s26 = smov 39  }
  0xcc   : > { %529 = vrot.lane.b32.xlu0 %v979_v7, %s10882_s16  ;;  %1373 = vrot.lane.b32.xlu1 %v7270_v1, %s10919_s10  ;;  %s10912_s16 = smov 29  }
  0xd0   : > { %1375 = vrot.lane.b32.xlu0 %v7273_v2, %s10919_s10  ;;  %1415 = vrot.lane.b32.xlu1 %v7270_v1, %s10917_s11 }
  0xd4   : > { %1417 = vrot.lane.b32.xlu0 %v7273_v2, %s10917_s11  ;;  %1289 = vrot.lane.b32.xlu1 %v7270_v1, %s10914_s9 }
  0xd8   : > { %1291 = vrot.lane.b32.xlu0 %v7273_v2, %s10914_s9  ;;  %1331 = vrot.lane.b32.xlu1 %v7270_v1, %s10912_s16 }
  0xda   : > { %v1080_v8 = vpop.permute.xlu1 %1079  ;;  %v1038_v9 = vpop.permute.xlu0 %1037 }
  0xdb   : > { %v1089_v10 = vrot.slane %v1080_v8, 4  ;;  %v1047_v13 = vrot.slane %v1038_v9, 4 }
  0xdc   : > { %1333 = vrot.lane.b32.xlu0 %v7273_v2, %s10912_s16  ;;  %1545 = vrot.lane.b32.xlu1 %v7276_v3, %s10886_s15  ;;  %s10908_s15 = smov 38  }
  0xde   : > { %v7364_v11 = vpop.permute.xlu1 %1081  ;;  %v7366_v12 = vpop.permute.xlu0 %1039 }
  0xdf   : > { %v1090_v14 = vrot.slane %v7364_v11, 4  ;;  %v1048_v15 = vrot.slane %v7366_v12, 4 }
  0xe0   : > { %1205 = vrot.lane.b32.xlu0 %v7270_v1, %s10910_s26  ;;  %1207 = vrot.lane.b32.xlu1 %v7273_v2, %s10910_s26 }
  0xe1   : > { %v1052_v16 = vsel %vm10976_vm1, %v1047_v13, %v1048_v15  ;;  %v1094_v17 = vsel %vm10976_vm1, %v1089_v10, %v1090_v14 }
  0xe2   : > { %v7380_v18 = vpop.permute.xlu1 %989  ;;  %v988_v19 = vpop.permute.xlu0 %987  ;;  %v1054_v20 = vsel %vm10966_vm3, %v1038_v9, %v1052_v16  ;;  %v1096_v21 = vsel %vm10967_vm4, %v1080_v8, %v1094_v17 }
  0xe3   : > { %v998_v22 = vrot.slane %v7380_v18, 4  ;;  %v997_v23 = vrot.slane %v988_v19, 4  ;;  %v6527_v24 = vcombine.high %v1054_v20, %v1096_v21  ;;  %v6526_v25 = vcombine.low %v1054_v20, %v1096_v21 }
  0xe4   : > { %1247 = vrot.lane.b32.xlu0 %v7270_v1, %s10908_s15  ;;  %1249 = vrot.lane.b32.xlu1 %v7273_v2, %s10908_s15 }
  0xe5   : > { %v1002_v26 = vsel %vm10976_vm1, %v997_v23, %v998_v22  ;;  %2272 = vmatprep.subr.bf16.mxu0 %v6527_v24 }
  0xe6   : > { %v1004_v27 = vsel %vm10965_vm5, %v988_v19, %v1002_v26  ;;  %2273 = vmatpush1.bf16.msra.mxu0 %v6526_v25  ;;  %v7393_v28 = vpop.permute.xlu1 %905  ;;  %v904_v29 = vpop.permute.xlu0 %903 }
  0xe7   : > { %v914_v30 = vrot.slane %v7393_v28, 4  ;;  %v913_v31 = vrot.slane %v904_v29, 4  ;;  %v6519_v32 = vcombine.high %v1004_v27, %v7270_v1  ;;  %v6518_v33 = vcombine.low %v1004_v27, %v7270_v1 }
  0xe8   : > { %1461 = vrot.lane.b32.xlu0 %v7276_v3, %s10892_s17  ;;  %1503 = vrot.lane.b32.xlu1 %v7276_v3, %s10890_s28  ;;  %s11219_s17 = smov 9   ;;  %s11220_s28 = smov 89  }
  0xe9   : > { %2274 = vmatprep.subr.bf16.mxu0 %v6519_v32  ;;  %v918_v36 = vsel %vm10976_vm1, %v913_v31, %v914_v30 }
  0xea   : > { %2275 = vmatpush1.bf16.msra.mxu0 %v6518_v33  ;;  %v7402_v34 = vpop.permute.xlu1 %947  ;;  %v946_v35 = vpop.permute.xlu0 %945  ;;  %v920_v40 = vsel %vm10964_vm6, %v904_v29, %v918_v36 }
  0xeb   : > { %v956_v37 = vrot.slane %v7402_v34, 4  ;;  %v955_v38 = vrot.slane %v946_v35, 4 }
  0xec   : > { %1121 = vrot.lane.b32.xlu0 %v7270_v1, %s10906_s23  ;;  %1123 = vrot.lane.b32.xlu1 %v7273_v2, %s10906_s23 }
  0xed   : > { %v960_v39 = vsel %vm10976_vm1, %v955_v38, %v956_v37 }
  0xee   : > { %v962_v41 = vsel %vm10954_vm7, %v946_v35, %v960_v39  ;;  %v7417_v42 = vpop.permute.xlu1 %821  ;;  %v820_v43 = vpop.permute.xlu0 %819 }
  0xef   : > { %v830_v44 = vrot.slane %v7417_v42, 4  ;;  %v829_v45 = vrot.slane %v820_v43, 4  ;;  %v6511_v46 = vcombine.high %v920_v40, %v962_v41  ;;  %v6510_v47 = vcombine.low %v920_v40, %v962_v41 }
  0xf0   : > { %1163 = vrot.lane.b32.xlu0 %v7270_v1, %s10904_s14  ;;  %1165 = vrot.lane.b32.xlu1 %v7273_v2, %s10904_s14 }
  0xf1   : > { %2276 = vmatprep.subr.bf16.mxu0 %v6511_v46  ;;  %v834_v51 = vsel %vm10976_vm1, %v829_v45, %v830_v44 }
  0xf2   : > { %2277 = vmatpush1.bf16.msra.mxu0 %v6510_v47  ;;  %v7431_v49 = vpop.permute.xlu1 %863  ;;  %v862_v50 = vpop.permute.xlu0 %861  ;;  %v836_v56 = vsel %vm10955_vm9, %v820_v43, %v834_v51 }
  0xf3   : > { %v872_v52 = vrot.slane %v7431_v49, 4  ;;  %v871_v53 = vrot.slane %v862_v50, 4 }
  0xf4   : > { %1377 = vrot.lane.b32.xlu0 %v7276_v3, %s10919_s10  ;;  %1419 = vrot.lane.b32.xlu1 %v7276_v3, %s10917_s11  ;;  %s11231_s11 = smov 19   ;;  %s11232_s10 = smov 18  }
  0xf5   : > { %v876_v54 = vsel %vm10976_vm1, %v871_v53, %v872_v52 }
  0xf6   : > { %v878_v57 = vsel %vm10916_vm10, %v862_v50, %v876_v54  ;;  %v7450_v58 = vpop.permute.xlu1 %1083  ;;  %v7452_v59 = vpop.permute.xlu0 %1041 }
  0xf7   : > { %v1091_v60 = vrot.slane %v7450_v58, 4  ;;  %v1049_v61 = vrot.slane %v7452_v59, 4  ;;  %v6503_v62 = vcombine.high %v836_v56, %v878_v57  ;;  %v6502_v63 = vcombine.low %v836_v56, %v878_v57 }
  0xf8   : > { %1043 = vrot.lane.b32.xlu0 %v7446_v55, %s10902_s30  ;;  %1085 = vrot.lane.b32.xlu1 %v7446_v55, %s10900_s24  ;;  %s11223_s24 = smov 90   ;;  %s11224_s30 = smov 100  }
  0xf9   : > { %2278 = vmatprep.subr.bf16.mxu0 %v6503_v62  ;;  %v1055_v0 = vsel %vm10976_vm1, %v1048_v15, %v1049_v61  ;;  %v1097_v1 = vsel %vm10976_vm1, %v1090_v14, %v1091_v60  ;;  %v7481_v14 = vld [vmem:[#allocation2 + $0x18] sm:$0xff] }
  0xfa   : > { %2279 = vmatpush1.bf16.msra.mxu0 %v6502_v63  ;;  %v7470_v4 = vpop.permute.xlu1 %737  ;;  %v736_v5 = vpop.permute.xlu0 %735  ;;  %v1056_v6 = vsel %vm10966_vm3, %v7366_v12, %v1055_v0  ;;  %v1098_v7 = vsel %vm10967_vm4, %v7364_v11, %v1097_v1 }
  0xfb   : > { %v746_v8 = vrot.slane %v7470_v4, 4  ;;  %v745_v9 = vrot.slane %v736_v5, 4  ;;  %v6529_v10 = vcombine.high %v1056_v6, %v1098_v7  ;;  %v6528_v13 = vcombine.low %v1056_v6, %v1098_v7 }
  0xfc   : > { %1293 = vrot.lane.b32.xlu0 %v7276_v3, %s10914_s9  ;;  %1335 = vrot.lane.b32.xlu1 %v7276_v3, %s10912_s16  ;;  %s11229_s16 = smov 110   ;;  %s11230_s9 = smov 17  }
  0xfd   : > { %2315 = vmatprep.subr.bf16.mxu1 %v6529_v10  ;;  %v750_v11 = vsel %vm10976_vm1, %v745_v9, %v746_v8 }
  0xfe   : > { %2316 = vmatpush1.bf16.msra.mxu1 %v6528_v13  ;;  %v7483_v12 = vpop.permute.xlu1 %779  ;;  %v778_v15 = vpop.permute.xlu0 %777  ;;  %v752_v20 = vsel %vm10942_vm11, %v736_v5, %v750_v11 }
  0xff   : > { %v788_v16 = vrot.slane %v7483_v12, 4  ;;  %v787_v17 = vrot.slane %v778_v15, 4 }
 0x100   : > { %993 = vrot.lane.b32.xlu0 %v7481_v14, %s10898_s6  ;;  %1209 = vrot.lane.b32.xlu1 %v7276_v3, %s10910_s26  ;;  %s11222_s6 = smov 91   ;;  %s11228_s26 = smov 111  }
 0x101   : > { %v792_v19 = vsel %vm10976_vm1, %v787_v17, %v788_v16 }
 0x102   : > { %v794_v21 = vsel %vm10922_vm12, %v778_v15, %v792_v19  ;;  %v7498_v23 = vpop.permute.xlu0 %991  ;;  %v652_v24 = vpop.permute.xlu1 %651 }
 0x103   : > { %v999_v25 = vrot.slane %v7498_v23, 4  ;;  %v6495_v26 = vcombine.high %v752_v20, %v794_v21  ;;  %v6494_v27 = vcombine.low %v752_v20, %v794_v21  ;;  %v661_v35 = vrot.slane %v652_v24, 4 }
 0x104   : > { %1251 = vrot.lane.b32.xlu0 %v7276_v3, %s10908_s15  ;;  %909 = vrot.lane.b32.xlu1 %v7481_v14, %s10896_s7  ;;  %s11221_s7 = smov 11   ;;  %s11227_s15 = smov 101  }
 0x105   : > { %2280 = vmatprep.subr.bf16.mxu0 %v6495_v26  ;;  %v1005_v29 = vsel %vm10976_vm1, %v998_v22, %v999_v25 }
 0x106   : > { %2281 = vmatpush1.bf16.msra.mxu0 %v6494_v27  ;;  %v7510_v31 = vpop.permute.xlu0 %653  ;;  %v694_v32 = vpop.permute.xlu1 %693  ;;  %v1006_v33 = vsel %vm10965_vm5, %v7380_v18, %v1005_v29 }
 0x107   : > { %v662_v36 = vrot.slane %v7510_v31, 4  ;;  %v6521_v38 = vcombine.high %v1006_v33, %v7273_v2  ;;  %v6520_v39 = vcombine.low %v1006_v33, %v7273_v2  ;;  %v703_v22 = vrot.slane %v694_v32, 4 }
 0x108   : > { %951 = vrot.lane.b32.xlu0 %v7481_v14, %s11219_s17  ;;  %1125 = vrot.lane.b32.xlu1 %v7276_v3, %s10906_s23  ;;  %s11226_s23 = smov 109  }
 0x109   : > { %2317 = vmatprep.subr.bf16.mxu1 %v6521_v38  ;;  %v666_v2 = vsel %vm10976_vm1, %v661_v35, %v662_v36 }
 0x10a   : > { %2318 = vmatpush1.bf16.msra.mxu1 %v6520_v39  ;;  %v7521_v40 = vpop.permute.xlu0 %695  ;;  %v7523_v41 = vpop.permute.xlu1 %907  ;;  %v668_v50 = vsel %vm10938_vm13, %v652_v24, %v666_v2 }
 0x10b   : > { %v704_v18 = vrot.slane %v7521_v40, 4  ;;  %v915_v43 = vrot.slane %v7523_v41, 4 }
 0x10c   : > { %1167 = vrot.lane.b32.xlu0 %v7276_v3, %s10904_s14  ;;  %825 = vrot.lane.b32.xlu1 %v7481_v14, %s11220_s28  ;;  %s11225_s14 = smov 99  }
 0x10d   : > { %v708_v45 = vsel %vm10976_vm1, %v703_v22, %v704_v18  ;;  %v921_v3 = vsel %vm10976_vm1, %v914_v30, %v915_v43 }
 0x10e   : > { %v7537_v46 = vpop.permute.xlu0 %949  ;;  %v568_v47 = vpop.permute.xlu1 %567  ;;  %v710_v51 = vsel %vm10937_vm14, %v694_v32, %v708_v45  ;;  %v922_v30 = vsel %vm10964_vm6, %v7393_v28, %v921_v3 }
 0x10f   : > { %v957_v53 = vrot.slane %v7537_v46, 4  ;;  %v6487_v54 = vcombine.high %v668_v50, %v710_v51  ;;  %v6486_v56 = vcombine.low %v668_v50, %v710_v51  ;;  %v577_v1 = vrot.slane %v568_v47, 4 }
 0x110   : > { %867 = vrot.lane.b32.xlu0 %v7481_v14, %s11221_s7  ;;  %741 = vrot.lane.b32.xlu1 %v7481_v14, %s11222_s6 }
 0x111   : > { %2282 = vmatprep.subr.bf16.mxu0 %v6487_v54  ;;  %v963_v57 = vsel %vm10976_vm1, %v956_v37, %v957_v53 }
 0x112   : > { %2283 = vmatpush1.bf16.msra.mxu0 %v6486_v56  ;;  %v7556_v62 = vpop.permute.xlu0 %569  ;;  %v610_v63 = vpop.permute.xlu1 %609  ;;  %v964_v0 = vsel %vm10954_vm7, %v7402_v34, %v963_v57 }
 0x113   : > { %v578_v5 = vrot.slane %v7556_v62, 4  ;;  %v6513_v6 = vcombine.high %v922_v30, %v964_v0  ;;  %v6512_v7 = vcombine.low %v922_v30, %v964_v0  ;;  %v619_v37 = vrot.slane %v610_v63, 4 }
 0x114   : > { %783 = vrot.lane.b32.xlu0 %v7481_v14, %s11223_s24  ;;  %657 = vrot.lane.b32.xlu1 %v7481_v14, %s11224_s30 }
 0x115   : > { %2319 = vmatprep.subr.bf16.mxu1 %v6513_v6  ;;  %v582_v13 = vsel %vm10976_vm1, %v577_v1, %v578_v5 }
 0x116   : > { %2320 = vmatpush1.bf16.msra.mxu1 %v6512_v7  ;;  %v7567_v9 = vpop.permute.xlu0 %611  ;;  %v7569_v28 = vpop.permute.xlu1 %823  ;;  %v584_v19 = vsel %vm10930_vm15, %v568_v47, %v582_v13 }
 0x117   : > { %v620_v34 = vrot.slane %v7567_v9, 4  ;;  %v831_v10 = vrot.slane %v7569_v28, 4 }
 0x118   : > { %699 = vrot.lane.b32.xlu0 %v7481_v14, %s11225_s14  ;;  %573 = vrot.lane.b32.xlu1 %v7481_v14, %s11226_s23 }
 0x119   : > { %v624_v15 = vsel %vm10976_vm1, %v619_v37, %v620_v34  ;;  %v837_v27 = vsel %vm10976_vm1, %v830_v44, %v831_v10 }
 0x11a   : > { %v7583_v11 = vpop.permute.xlu0 %865  ;;  %v483_v17 = vpop.permute.xlu1 %482  ;;  %v626_v20 = vsel %vm10931_vm0, %v610_v63, %v624_v15  ;;  %v838_v44 = vsel %vm10955_vm9, %v7417_v42, %v837_v27 }
 0x11b   : > { %v873_v21 = vrot.slane %v7583_v11, 4  ;;  %v6479_v24 = vcombine.high %v584_v19, %v626_v20  ;;  %v6478_v26 = vcombine.low %v584_v19, %v626_v20  ;;  %v492_v38 = vrot.slane %v483_v17, 4 }
 0x11c   : > { %615 = vrot.lane.b32.xlu0 %v7481_v14, %s11227_s15  ;;  %488 = vrot.lane.b32.xlu1 %v7481_v14, %s11228_s26 }
 0x11d   : > { %2284 = vmatprep.subr.bf16.mxu0 %v6479_v24  ;;  %v879_v29 = vsel %vm10976_vm1, %v872_v52, %v873_v21 }
 0x11e   : > { %2285 = vmatpush1.bf16.msra.mxu0 %v6478_v26  ;;  %v7602_v32 = vpop.permute.xlu0 %484  ;;  %v526_v33 = vpop.permute.xlu1 %525  ;;  %v880_v35 = vsel %vm10916_vm10, %v7431_v49, %v879_v29  ;;  %vm10935_vm10 = vcmask 900096  }
 0x11f   : > { %v493_v39 = vrot.slane %v7602_v32, 4  ;;  %v6505_v22 = vcombine.high %v838_v44, %v880_v35  ;;  %v6504_v2 = vcombine.low %v838_v44, %v880_v35  ;;  %v535_v52 = vrot.slane %v526_v33, 4 }
 0x120   : > { %531 = vrot.lane.b32.xlu0 %v7481_v14, %s11229_s16  ;;  %1547 = vrot.lane.b32.xlu1 %v7446_v55, %s11230_s9 }
 0x121   : > { %2321 = vmatprep.subr.bf16.mxu1 %v6505_v22  ;;  %v498_v50 = vsel %vm10976_vm1, %v492_v38, %v493_v39 }
 0x122   : > { %2322 = vmatpush1.bf16.msra.mxu1 %v6504_v2  ;;  %v7613_v45 = vpop.permute.xlu0 %527  ;;  %v7615_v42 = vpop.permute.xlu1 %739  ;;  %v500_v56 = vsel %vm10936_vm2, %v483_v17, %v498_v50 }
 0x123   : > { %v536_v49 = vrot.slane %v7613_v45, 4  ;;  %v747_v47 = vrot.slane %v7615_v42, 4 }
 0x124   : > { %1463 = vrot.lane.b32.xlu0 %v7446_v55, %s11231_s11  ;;  %1505 = vrot.lane.b32.xlu1 %v7446_v55, %s11232_s10 }
 0x125   : > { %v540_v14 = vsel %vm10976_vm1, %v535_v52, %v536_v49  ;;  %v753_v57 = vsel %vm10976_vm1, %v746_v8, %v747_v47 }
 0x126   : > { %v7629_v51 = vpop.permute.xlu0 %781  ;;  %v7631_v54 = vpop.permute.xlu1 %655  ;;  %v542_v3 = vsel %vm10935_vm10, %v526_v33, %v540_v14  ;;  %v754_v37 = vsel %vm10942_vm11, %v7470_v4, %v753_v57  ;;  %v1031_v14 = vld [vmem:[#allocation2 + $0x24] sm:$0xf]  ;;  %vm10971_vm11 = vcmask 310272  }
 0x127   : > { %v789_v63 = vrot.slane %v7629_v51, 4  ;;  %v663_v30 = vrot.slane %v7631_v54, 4  ;;  %v6471_v0 = vcombine.high %v500_v56, %v542_v3  ;;  %v6470_v1 = vcombine.low %v500_v56, %v542_v3  ;;  %v1073_v56 = vld [vmem:[#allocation2 + $0x24] sm:$0xf] }
 0x128   : > { %1379 = vrot.lane.b32.xlu0 %v7446_v55, %s11233_s0  ;;  %1421 = vrot.lane.b32.xlu1 %v7446_v55, %s11234_s3 }
 0x129   : > { %2286 = vmatprep.subr.bf16.mxu0 %v6471_v0  ;;  %v795_v6 = vsel %vm10976_vm1, %v788_v16, %v789_v63  ;;  %v669_v16 = vsel %vm10976_vm1, %v662_v36, %v663_v30 }
 0x12a   : > { %v7651_v8 = vpop.permute.xlu0 %697  ;;  %2287 = vmatpush1.bf16.msra.mxu0 %v6470_v1  ;;  %v1542_v7 = vpop.permute.xlu1 %1541  ;;  %v796_v13 = vsel %vm10922_vm12, %v7483_v12, %v795_v6  ;;  %v670_v36 = vsel %vm10938_vm13, %v7510_v31, %v669_v16  ;;  %vm10941_vm12 = vcmask 138240   ;;  %vm10973_vm13 = vcmask 236544  }
 0x12b   : > { %v705_v15 = vrot.slane %v7651_v8, 4  ;;  %v6497_v17 = vcombine.high %v754_v37, %v796_v13  ;;  %v6496_v19 = vcombine.low %v754_v37, %v796_v13  ;;  %v1551_v4 = vrot.slane %v1542_v7, 4  ;;  %v981_v13 = vld [vmem:[#allocation2 + $0x20] sm:$0xf] }
 0x12c   : > { %1295 = vrot.lane.b32.xlu0 %v7446_v55, %s11235_s12  ;;  %1337 = vrot.lane.b32.xlu1 %v7446_v55, %s11236_s20 }
 0x12d   : > { %2323 = vmatprep.subr.bf16.mxu1 %v6497_v17  ;;  %v711_v12 = vsel %vm10976_vm1, %v704_v18, %v705_v15  ;;  %v897_v17 = vld [vmem:[#allocation2 + $0x20] sm:$0xf] }
 0x12e   : > { %v7672_v20 = vpop.permute.xlu0 %1543  ;;  %2324 = vmatpush1.bf16.msra.mxu1 %v6496_v19  ;;  %v7674_v24 = vpop.permute.xlu1 %571  ;;  %v712_v26 = vsel %vm10937_vm14, %v7521_v40, %v711_v12  ;;  %v939_v12 = vld [vmem:[#allocation2 + $0x20] sm:$0xf]  ;;  %vm10972_vm14 = vcmask 302080  }
 0x12f   : > { %v1552_v27 = vrot.slane %v7672_v20, 4  ;;  %v579_v29 = vrot.slane %v7674_v24, 4  ;;  %v6489_v33 = vcombine.high %v670_v36, %v712_v26  ;;  %v6488_v44 = vcombine.low %v670_v36, %v712_v26  ;;  %v813_v26 = vld [vmem:[#allocation2 + $0x20] sm:$0xf] }
 0x130   : > { %1211 = vrot.lane.b32.xlu0 %v7446_v55, %s11237_s19  ;;  %1253 = vrot.lane.b32.xlu1 %v7446_v55, %s11238_s29 }
 0x131   : > { %v1556_v31 = vsel %vm10976_vm1, %v1551_v4, %v1552_v27  ;;  %2325 = vmatprep.subr.bf16.mxu1 %v6489_v33  ;;  %v585_v52 = vsel %vm10976_vm1, %v578_v5, %v579_v29  ;;  %v10939_v33 = vmov 0  }
 0x132   : > { %v7689_v18 = vpop.permute.xlu0 %613  ;;  %2326 = vmatpush1.bf16.msra.mxu1 %v6488_v44  ;;  %v1458_v40 = vpop.permute.xlu1 %1457  ;;  %v1558_v35 = vsel %vm10941_vm12, %v1542_v7, %v1556_v31  ;;  %v586_v0 = vsel %vm10930_vm15, %v7556_v62, %v585_v52  ;;  %vm10946_vm15 = vcmask 154624   ;;  %6922 = vset.pattern.permute.xlu0 %v10939_v33 }
 0x133   : > { %v621_v38 = vrot.slane %v7689_v18, 4  ;;  %v6575_v22 = vcombine.high %v1558_v35, %v1558_v35  ;;  %v6574_v2 = vcombine.low %v1558_v35, %v1558_v35  ;;  %v1467_v1 = vrot.slane %v1458_v40, 4  ;;  %6923 = vset.pattern.permute.xlu1 %v10939_v33 }
 0x134   : > { %1127 = vrot.lane.b32.xlu0 %v7446_v55, %s11239_s21  ;;  %1169 = vrot.lane.b32.xlu1 %v7446_v55, %s11240_s25 }
 0x135   : > { %6582 = vmatprep.subr.msk.bf16.mxu0 %vm10976_vm1, %v6575_v22  ;;  %v2249_v50 = vsel %vm10976_vm1, %v6574_v2, 0  ;;  %v627_v3 = vsel %vm10976_vm1, %v620_v34, %v621_v38 }
 0x136   : > { %v7709_v57 = vpop.permute.xlu0 %1459  ;;  %2293 = vmatpush2.bf16.msra.mxu0 %v2249_v50  ;;  %v1500_v5 = vpop.permute.xlu1 %1499  ;;  %v628_v55 = vsel %vm10931_vm0, %v7567_v9, %v627_v3  ;;  %vm10947_vm0 = vcmask 146432   ;;  %v729_v3 = vld [vmem:[#allocation2 + $0x20] sm:$0xf] }
 0x137   : > { %v1468_v6 = vrot.slane %v7709_v57, 4  ;;  %v6481_v7 = vcombine.high %v586_v0, %v628_v55  ;;  %v6480_v37 = vcombine.low %v586_v0, %v628_v55  ;;  %v1509_v34 = vrot.slane %v1500_v5, 4 }
 0x138   : > { %1045 = vrot.lane.b32.xlu0 %v1031_v14, %s11241_s18  ;;  %1087 = vrot.lane.b32.xlu1 %v1073_v56, %s11242_s5  ;;  %v855_v56 = vld [vmem:[#allocation2 + $0x20] sm:$0xf] }
 0x139   : > { %2327 = vmatprep.subr.bf16.mxu1 %v6481_v7  ;;  %v1472_v4 = vsel %vm10976_vm1, %v1467_v1, %v1468_v6 }
 0x13a   : > { %v7718_v19 = vpop.permute.xlu0 %1501  ;;  %2328 = vmatpush1.bf16.msra.mxu1 %v6480_v37  ;;  %v7720_v62 = vpop.permute.xlu1 %486  ;;  %v1474_v35 = vsel %vm10946_vm15, %v1458_v40, %v1472_v4 }
 0x13b   : > { %v1510_v9 = vrot.slane %v7718_v19, 4  ;;  %v494_v16 = vrot.slane %v7720_v62, 4 }
 0x13c   : > { %995 = vrot.lane.b32.xlu0 %v981_v13, %s11243_s13  ;;  %911 = vrot.lane.b32.xlu1 %v897_v17, %s11244_s8  ;;  %v771_v13 = vld [vmem:[#allocation2 + $0x20] sm:$0xf]  ;;  %s11303_s8 = smov 10  }
 0x13d   : > { %v1514_v36 = vsel %vm10976_vm1, %v1509_v34, %v1510_v9  ;;  %v501_v14 = vsel %vm10976_vm1, %v493_v39, %v494_v16  ;;  %v645_v17 = vld [vmem:[#allocation2 + $0x20] sm:$0xf] }
 0x13e   : > { %v7734_v44 = vpop.permute.xlu0 %529  ;;  %v1374_v31 = vpop.permute.xlu1 %1373  ;;  %v1516_v22 = vsel %vm10947_vm0, %v1500_v5, %v1514_v36  ;;  %v502_v39 = vsel %vm10936_vm2, %v7602_v32, %v501_v14  ;;  %vm10975_vm2 = vcmask 220160   ;;  %v687_v36 = vld [vmem:[#allocation2 + $0x20] sm:$0xf] }
 0x13f   : > { %v10945_v2 = vrot.slane %v7734_v44, 4  ;;  %v6567_v52 = vcombine.high %v1474_v35, %v1516_v22  ;;  %v6566_v50 = vcombine.low %v1474_v35, %v1516_v22  ;;  %v1383_v1 = vrot.slane %v1374_v31, 4  ;;  %v561_v35 = vld [vmem:[#allocation2 + $0x20] sm:$0xf] }
 0x140   : > { %953 = vrot.lane.b32.xlu0 %v939_v12, %s11219_s17  ;;  %827 = vrot.lane.b32.xlu1 %v813_v26, %s11220_s28 }
 0x141   : > { %2294 = vmatprep.subr.bf16.mxu0 %v6567_v52  ;;  %v543_v40 = vsel %vm10976_vm1, %v536_v49, %v10945_v2 }
 0x142   : > { %v7751_v5 = vpop.permute.xlu0 %1375  ;;  %2295 = vmatpush2.bf16.msra.mxu0 %v6566_v50  ;;  %v1416_v0 = vpop.permute.xlu1 %1415  ;;  %v544_v55 = vsel %vm10935_vm10, %v7613_v45, %v543_v40  ;;  %vm10974_vm10 = vcmask 228352  }
 0x143   : > { %v1384_v7 = vrot.slane %v7751_v5, 4  ;;  %v6473_v37 = vcombine.high %v502_v39, %v544_v55  ;;  %v6472_v34 = vcombine.low %v502_v39, %v544_v55  ;;  %v1425_v49 = vrot.slane %v1416_v0, 4 }
 0x144   : > { %869 = vrot.lane.b32.xlu0 %v855_v56, %s11221_s7  ;;  %743 = vrot.lane.b32.xlu1 %v729_v3, %s11222_s6  ;;  %s11330_s7 = smov 89  }
 0x145   : > { %2329 = vmatprep.subr.bf16.mxu1 %v6473_v37  ;;  %v1388_v45 = vsel %vm10976_vm1, %v1383_v1, %v1384_v7  ;;  %v603_v1 = vld [vmem:[#allocation2 + $0x20] sm:$0xf] }
 0x146   : > { %v7760_v4 = vpop.permute.xlu0 %1417  ;;  %2330 = vmatpush1.bf16.msra.mxu1 %v6472_v34  ;;  %v1290_v32 = vpop.permute.xlu1 %1289  ;;  %v1390_v50 = vsel %vm10974_vm10, %v1374_v31, %v1388_v45  ;;  %v476_v37 = vld [vmem:[#allocation2 + $0x20] sm:$0xf] }
 0x147   : > { %v1426_v12 = vrot.slane %v7760_v4, 4  ;;  %v1299_v56 = vrot.slane %v1290_v32, 4  ;;  %v519_v45 = vld [vmem:[#allocation2 + $0x20] sm:$0xf] }
 0x148   : > { %785 = vrot.lane.b32.xlu0 %v771_v13, %s11223_s24  ;;  %659 = vrot.lane.b32.xlu1 %v645_v17, %s11224_s30 }
 0x149   : > { %v1430_v26 = vsel %vm10976_vm1, %v1425_v49, %v1426_v12 }
 0x14a   : > { %v7771_v22 = vpop.permute.xlu0 %1291  ;;  %v1332_v52 = vpop.permute.xlu1 %1331  ;;  %v1432_v14 = vsel %vm10975_vm2, %v1416_v0, %v1430_v26  ;;  %v1535_v26 = vld [vmem:[#allocation2 + $0x24] sm:$0xf] }
 0x14b   : > { %v1300_v40 = vrot.slane %v7771_v22, 4  ;;  %v6559_v3 = vcombine.high %v1390_v50, %v1432_v14  ;;  %v6558_v39 = vcombine.low %v1390_v50, %v1432_v14  ;;  %v1341_v55 = vrot.slane %v1332_v52, 4 }
 0x14c   : > { %701 = vrot.lane.b32.xlu0 %v687_v36, %s11225_s14  ;;  %575 = vrot.lane.b32.xlu1 %v561_v35, %s11226_s23 }
 0x14d   : > { %2296 = vmatprep.subr.bf16.mxu0 %v6559_v3  ;;  %v1304_v13 = vsel %vm10976_vm1, %v1299_v56, %v1300_v40 }
 0x14e   : > { %v7778_v34 = vpop.permute.xlu0 %1333  ;;  %2297 = vmatpush2.bf16.msra.mxu0 %v6558_v39  ;;  %v7780_v49 = vpop.permute.xlu1 %1545  ;;  %v1306_v14 = vsel %vm10972_vm14, %v1290_v32, %v1304_v13  ;;  %v1451_v32 = vld [vmem:[#allocation2 + $0x24] sm:$0xf] }
 0x14f   : > { %v1342_v31 = vrot.slane %v7778_v34, 4  ;;  %v10948_v0 = vrot.slane %v7780_v49, 4  ;;  %v1493_v13 = vld [vmem:[#allocation2 + $0x24] sm:$0xf] }
 0x150   : > { %617 = vrot.lane.b32.xlu0 %v603_v1, %s11227_s15  ;;  %490 = vrot.lane.b32.xlu1 %v476_v37, %s11228_s26 }
 0x151   : > { %v1559_v17 = vsel %vm10976_vm1, %v1552_v27, %v10948_v0  ;;  %v1346_v36 = vsel %vm10976_vm1, %v1341_v55, %v1342_v31 }
 0x152   : > { %v1206_v35 = vpop.permute.xlu0 %1205  ;;  %v7797_v50 = vpop.permute.xlu1 %1207  ;;  %v1348_v56 = vsel %vm10973_vm13, %v1332_v52, %v1346_v36  ;;  %v1560_v3 = vsel %vm10941_vm12, %v7672_v20, %v1559_v17  ;;  %vm10970_vm12 = vcmask 318464  }
 0x153   : > { %v1215_v39 = vrot.slane %v1206_v35, 4  ;;  %v1216_v1 = vrot.slane %v7797_v50, 4  ;;  %v6551_v27 = vcombine.high %v1306_v14, %v1348_v56  ;;  %v6577_v37 = vcombine.high %v1560_v3, %v1560_v3 }
 0x154   : > { %533 = vrot.lane.b32.xlu0 %v519_v45, %s11229_s16  ;;  %v6550_v33 = vcombine.low %v1306_v14, %v1348_v56  ;;  %v6576_v55 = vcombine.low %v1560_v3, %v1560_v3  ;;  %1549 = vrot.lane.b32.xlu1 %v1535_v26, %s11230_s9  ;;  %v1367_v14 = vld [vmem:[#allocation2 + $0x24] sm:$0xf] }
 0x155   : > { %2298 = vmatprep.subr.bf16.mxu0 %v6551_v27  ;;  %6584 = vmatprep.subr.msk.bf16.mxu1 %vm10976_vm1, %v6577_v37  ;;  %v1220_v26 = vsel %vm10976_vm1, %v1215_v39, %v1216_v1  ;;  %v1409_v56 = vld [vmem:[#allocation2 + $0x24] sm:$0xf] }
 0x156   : > { %v1248_v52 = vpop.permute.xlu0 %1247  ;;  %2299 = vmatpush2.bf16.msra.mxu0 %v6550_v33  ;;  %v2255_v20 = vsel %vm10976_vm1, %v6576_v55, 0  ;;  %v7808_v17 = vpop.permute.xlu1 %1249  ;;  %v1222_v37 = vsel %vm10970_vm12, %v1206_v35, %v1220_v26  ;;  %v1325_v26 = vld [vmem:[#allocation2 + $0x24] sm:$0xf] }
 0x157   : > { %v1257_v36 = vrot.slane %v1248_v52, 4  ;;  %2336 = vmatpush2.bf16.msra.mxu1 %v2255_v20  ;;  %v1258_v45 = vrot.slane %v7808_v17, 4 }
 0x158   : > { %1465 = vrot.lane.b32.xlu0 %v1451_v32, %s11231_s11  ;;  %1507 = vrot.lane.b32.xlu1 %v1493_v13, %s11232_s10 }
 0x159   : > { %v1262_v33 = vsel %vm10976_vm1, %v1257_v36, %v1258_v45 }
 0x15a   : > { %v7819_v3 = vpop.permute.xlu0 %1461  ;;  %v7821_v27 = vpop.permute.xlu1 %1503  ;;  %v1264_v55 = vsel %vm10971_vm11, %v1248_v52, %v1262_v33  ;;  %v1283_v52 = vld [vmem:[#allocation2 + $0x24] sm:$0xf] }
 0x15b   : > { %v10943_v39 = vrot.slane %v7819_v3, 4  ;;  %v10944_v32 = vrot.slane %v7821_v27, 4  ;;  %v6543_v20 = vcombine.high %v1222_v37, %v1264_v55  ;;  %v6542_v13 = vcombine.low %v1222_v37, %v1264_v55 }
 0x15c   : > { %1381 = vrot.lane.b32.xlu0 %v1367_v14, %s11233_s0  ;;  %1423 = vrot.lane.b32.xlu1 %v1409_v56, %s11234_s3 }
 0x15d   : > { %2300 = vmatprep.subr.bf16.mxu0 %v6543_v20  ;;  %v1475_v36 = vsel %vm10976_vm1, %v1468_v6, %v10943_v39  ;;  %v1517_v35 = vsel %vm10976_vm1, %v1510_v9, %v10944_v32  ;;  %v1199_v9 = vld [vmem:[#allocation2 + $0x24] sm:$0xf] }
 0x15e   : > { %v1122_v33 = vpop.permute.xlu0 %1121  ;;  %2301 = vmatpush2.bf16.msra.mxu0 %v6542_v13  ;;  %v7839_v14 = vpop.permute.xlu1 %1123  ;;  %v1476_v56 = vsel %vm10946_vm15, %v7709_v57, %v1475_v36  ;;  %v1518_v37 = vsel %vm10947_vm0, %v7718_v19, %v1517_v35  ;;  %v1241_v13 = vld [vmem:[#allocation2 + $0x24] sm:$0xf]  ;;  %vm10968_vm15 = vcmask 965632   ;;  %vm10969_vm0 = vcmask 957440  }
 0x15f   : > { %v1131_v55 = vrot.slane %v1122_v33, 4  ;;  %v1132_v6 = vrot.slane %v7839_v14, 4  ;;  %v6569_v20 = vcombine.high %v1476_v56, %v1518_v37  ;;  %v6568_v39 = vcombine.low %v1476_v56, %v1518_v37 }
 0x160   : > { %1297 = vrot.lane.b32.xlu0 %v1283_v52, %s11235_s12  ;;  %1339 = vrot.lane.b32.xlu1 %v1325_v26, %s11236_s20  ;;  %v1157_v52 = vld [vmem:[#allocation2 + $0x24] sm:$0xf] }
 0x161   : > { %2337 = vmatprep.subr.bf16.mxu1 %v6569_v20  ;;  %v1136_v36 = vsel %vm10976_vm1, %v1131_v55, %v1132_v6 }
 0x162   : > { %v1164_v32 = vpop.permute.xlu0 %1163  ;;  %2338 = vmatpush2.bf16.msra.mxu1 %v6568_v39  ;;  %v7848_v2 = vpop.permute.xlu1 %1165  ;;  %v1115_v39 = vld [vmem:[#allocation2 + $0x24] sm:$0xf]  ;;  %v1138_v37 = vsel %vm10968_vm15, %v1122_v33, %v1136_v36  ;;  %v7882_v33 = vld [vmem:[%s10859_s1] ss:$8 sps:$4 sm:$0xff]  }
 0x163   : > { %v1173_v57 = vrot.slane %v1164_v32, 4  ;;  %v1174_v19 = vrot.slane %v7848_v2, 4  ;;  %v1684_v36 = vld [vmem:[%s10860_s2 + $0x8] sm:$0xff] }
 0x164   : > { %1213 = vrot.lane.b32.xlu0 %v1199_v9, %s11237_s19  ;;  %1255 = vrot.lane.b32.xlu1 %v1241_v13, %s11238_s29 }
 0x165   : > { %v1178_v35 = vsel %vm10976_vm1, %v1173_v57, %v1174_v19 }
 0x166   : > { %v7859_v26 = vpop.permute.xlu0 %1377  ;;  %v7861_v56 = vpop.permute.xlu1 %1419  ;;  %v1180_v20 = vsel %vm10969_vm0, %v1164_v32, %v1178_v35 }
 0x167   : > { %v1385_v55 = vrot.slane %v7859_v26, 4  ;;  %v10953_v9 = vrot.slane %v7861_v56, 4  ;;  %v6535_v0 = vcombine.high %v1138_v37, %v1180_v20  ;;  %v6534_v13 = vcombine.low %v1138_v37, %v1180_v20 }
 0x168   : > { %1129 = vrot.lane.b32.xlu0 %v1115_v39, %s11239_s21  ;;  %1171 = vrot.lane.b32.xlu1 %v1157_v52, %s11240_s25 }
 0x169   : > { %2302 = vmatprep.subr.bf16.mxu0 %v6535_v0  ;;  %v1391_v57 = vsel %vm10976_vm1, %v1384_v7, %v1385_v55  ;;  %v1433_v32 = vsel %vm10976_vm1, %v1426_v12, %v10953_v9  ;;  %v1683_v0 = vld [vmem:[%s10860_s2] sm:$0xff] }
 0x16a   : > { %v7890_v7 = vpop.permute.xlu0 %1043  ;;  %2303 = vmatpush2.bf16.msra.mxu0 %v6534_v13  ;;  %v7892_v35 = vpop.permute.xlu1 %1085  ;;  %v1392_v12 = vsel %vm10974_vm10, %v7751_v5, %v1391_v57  ;;  %v1434_v39 = vsel %vm10975_vm2, %v7760_v4, %v1433_v32 }
 0x16b   : > { %v1050_v52 = vrot.slane %v7890_v7, 4  ;;  %v1092_v37 = vrot.slane %v7892_v35, 4  ;;  %v6561_v20 = vcombine.high %v1392_v12, %v1434_v39  ;;  %v6560_v9 = vcombine.low %v1392_v12, %v1434_v39 }
 0x16c   : > { %1687 = vperm.xlu0 %6922, %v1683_v0   ;;  %1692 = vperm.xlu1 %6923, %v1684_v36  }
 0x16d   : > { %2339 = vmatprep.subr.bf16.mxu1 %v6561_v20  ;;  %v1057_v13 = vsel %vm10976_vm1, %v1049_v61, %v1050_v52  ;;  %v1099_v5 = vsel %vm10976_vm1, %v1091_v60, %v1092_v37  ;;  %2305 = vmatmul.mubr.bf16.vlgmr.msra.gmra.mxu0 %v7882_v33 }
 0x16e   : > { %v7911_v4 = vpop.permute.xlu0 %1293  ;;  %2340 = vmatpush2.bf16.msra.mxu1 %v6560_v9  ;;  %v7913_v57 = vpop.permute.xlu1 %1335  ;;  %v1058_v32 = vsel %vm10966_vm3, %v7452_v59, %v1057_v13  ;;  %v1100_v0 = vsel %vm10967_vm4, %v7450_v58, %v1099_v5  ;;  %6587 = vmatprep.mubr.msk.bf16.mxu0 %vm2244_vm8, %v7423_v48 }
 0x16f   : > { %v1301_v61 = vrot.slane %v7911_v4, 4  ;;  %v1343_v60 = vrot.slane %v7913_v57, 4  ;;  %v6530_v36 = vcombine.low %v1058_v32, %v1100_v0  ;;  %v6531_v12 = vcombine.high %v1058_v32, %v1100_v0  ;;  %v1021_v0 = vld [vmem:[#allocation2 + $0x14] sm:$0xff] }
 0x171   : > { %2358 = vmatprep.subr.bf16.mxu0 %v6531_v12  ;;  %v1307_v9 = vsel %vm10976_vm1, %v1300_v40, %v1301_v61  ;;  %v1349_v58 = vsel %vm10976_vm1, %v1342_v31, %v1343_v60 }
 0x172   : > { %v7933_v48 = vpop.permute.xlu0 %993  ;;  %2359 = vmatpush1.bf16.msra.mxu0 %v6530_v36  ;;  %v7935_v59 = vpop.permute.xlu1 %1209  ;;  %v1308_v39 = vsel %vm10972_vm14, %v7771_v22, %v1307_v9  ;;  %v1350_v20 = vsel %vm10973_vm13, %v7778_v34, %v1349_v58 }
 0x173   : > { %v1000_v13 = vrot.slane %v7933_v48, 4  ;;  %v1217_v40 = vrot.slane %v7935_v59, 4  ;;  %v6553_v5 = vcombine.high %v1308_v39, %v1350_v20  ;;  %v6552_v32 = vcombine.low %v1308_v39, %v1350_v20 }
 0x175   : > { %2341 = vmatprep.subr.bf16.mxu1 %v6553_v5  ;;  %v1007_v31 = vsel %vm10976_vm1, %v999_v25, %v1000_v13  ;;  %v1223_v12 = vsel %vm10976_vm1, %v1216_v1, %v1217_v40 }
 0x176   : > { %v7948_v36 = vpop.permute.xlu0 %1251  ;;  %2342 = vmatpush2.bf16.msra.mxu1 %v6552_v32  ;;  %v7950_v22 = vpop.permute.xlu1 %909  ;;  %v1008_v34 = vsel %vm10965_vm5, %v7498_v23, %v1007_v31  ;;  %v1224_v1 = vsel %vm10970_vm12, %v7797_v50, %v1223_v12 }
 0x177   : > { %v1259_v9 = vrot.slane %v7948_v36, 4  ;;  %v916_v58 = vrot.slane %v7950_v22, 4  ;;  %v6522_v39 = vcombine.low %v1008_v34, %v1021_v0  ;;  %v6523_v25 = vcombine.high %v1008_v34, %v1021_v0 }
 0x179   : > { %2360 = vmatprep.subr.bf16.mxu0 %v6523_v25  ;;  %v1265_v20 = vsel %vm10976_vm1, %v1258_v45, %v1259_v9  ;;  %v923_v0 = vsel %vm10976_vm1, %v915_v43, %v916_v58 }
 0x17a   : > { %v7966_v23 = vpop.permute.xlu0 %951  ;;  %2361 = vmatpush1.bf16.msra.mxu0 %v6522_v39  ;;  %v7968_v5 = vpop.permute.xlu1 %1125  ;;  %v1266_v32 = vsel %vm10971_vm11, %v7808_v17, %v1265_v20  ;;  %v924_v43 = vsel %vm10964_vm6, %v7523_v41, %v923_v0 }
 0x17b   : > { %v958_v31 = vrot.slane %v7966_v23, 4  ;;  %v1133_v45 = vrot.slane %v7968_v5, 4  ;;  %v6545_v34 = vcombine.high %v1224_v1, %v1266_v32  ;;  %v6544_v39 = vcombine.low %v1224_v1, %v1266_v32 }
 0x17d   : > { %2343 = vmatprep.subr.bf16.mxu1 %v6545_v34  ;;  %v965_v50 = vsel %vm10976_vm1, %v957_v53, %v958_v31  ;;  %v1139_v20 = vsel %vm10976_vm1, %v1132_v6, %v1133_v45 }
 0x17e   : > { %v7986_v17 = vpop.permute.xlu0 %1167  ;;  %2344 = vmatpush2.bf16.msra.mxu1 %v6544_v39  ;;  %v7988_v12 = vpop.permute.xlu1 %825  ;;  %v966_v25 = vsel %vm10954_vm7, %v7537_v46, %v965_v50  ;;  %v1140_v6 = vsel %vm10968_vm15, %v7839_v14, %v1139_v20  ;;  %vm11245_vm7 = vcmask 89088  }
 0x17f   : > { %v1175_v1 = vrot.slane %v7986_v17, 4  ;;  %v832_v53 = vrot.slane %v7988_v12, 4  ;;  %v6514_v32 = vcombine.low %v924_v43, %v966_v25  ;;  %v6515_v34 = vcombine.high %v924_v43, %v966_v25 }
 0x181   : > { %2362 = vmatprep.subr.bf16.mxu0 %v6515_v34  ;;  %v1181_v41 = vsel %vm10976_vm1, %v1174_v19, %v1175_v1  ;;  %v839_v50 = vsel %vm10976_vm1, %v831_v10, %v832_v53 }
 0x182   : > { %v8006_v46 = vpop.permute.xlu0 %867  ;;  %2363 = vmatpush1.bf16.msra.mxu0 %v6514_v32  ;;  %v8008_v0 = vpop.permute.xlu1 %741  ;;  %v1182_v39 = vsel %vm10969_vm0, %v7848_v2, %v1181_v41  ;;  %v840_v10 = vsel %vm10955_vm9, %v7569_v28, %v839_v50  ;;  %vm11247_vm9 = vcmask 736256  }
 0x183   : > { %v874_v43 = vrot.slane %v8006_v46, 4  ;;  %v748_v19 = vrot.slane %v8008_v0, 4  ;;  %v6537_v25 = vcombine.high %v1140_v6, %v1182_v39  ;;  %v6536_v32 = vcombine.low %v1140_v6, %v1182_v39 }
 0x185   : > { %2345 = vmatprep.subr.bf16.mxu1 %v6537_v25  ;;  %v881_v14 = vsel %vm10976_vm1, %v873_v21, %v874_v43  ;;  %v755_v41 = vsel %vm10976_vm1, %v747_v47, %v748_v19 }
 0x186   : > { %v8026_v2 = vpop.permute.xlu0 %783  ;;  %2346 = vmatpush2.bf16.msra.mxu1 %v6536_v32  ;;  %v8028_v20 = vpop.permute.xlu1 %657  ;;  %v882_v34 = vsel %vm11245_vm7, %v7583_v11, %v881_v14  ;;  %vm11246_vm7 = vcmask 744448  }
 0x187   : > { %v790_v6 = vrot.slane %v8026_v2, 4  ;;  %v664_v21 = vrot.slane %v8028_v20, 4  ;;  %v6506_v39 = vcombine.low %v840_v10, %v882_v34  ;;  %v6507_v25 = vcombine.high %v840_v10, %v882_v34 }
 0x188   : > { %v756_v47 = vsel %vm11246_vm7, %v7615_v42, %v755_v41  ;;  %vm11250_vm7 = vcmask 891904  }
 0x189   : > { %2348 = vmatmul.mubr.bf16.vlgmr.msra.gmra.mxu1 %v7882_v33  ;;  %2364 = vmatprep.subr.bf16.mxu0 %v6507_v25  ;;  %v797_v28 = vsel %vm10976_vm1, %v789_v63, %v790_v6  ;;  %v671_v14 = vsel %vm10976_vm1, %v663_v30, %v664_v21  ;;  %v6943_v63 = vld [vmem:[%s10859_s1 + $0x4] ss:$8 sps:$4 sm:$0xff]  }
 0x18a   : > { %v8047_v11 = vpop.permute.xlu0 %699  ;;  %2365 = vmatpush1.bf16.msra.mxu0 %v6506_v39  ;;  %v8049_v50 = vpop.permute.xlu1 %573  ;;  %v798_v32 = vsel %vm11247_vm9, %v7629_v51, %v797_v28  ;;  %6589 = vmatprep.mubr.msk.bf16.mxu1 %vm2244_vm8, %v6943_v63  ;;  %vm11248_vm8 = vcmask 818176   ;;  %vm11249_vm9 = vcmask 809984  }
 0x18b   : > { %v706_v10 = vrot.slane %v8047_v11, 4  ;;  %v580_v34 = vrot.slane %v8049_v50, 4  ;;  %v6498_v42 = vcombine.low %v756_v47, %v798_v32  ;;  %v6499_v41 = vcombine.high %v756_v47, %v798_v32 }
 0x18c   : > { %v672_v25 = vsel %vm11248_vm8, %v7631_v54, %v671_v14  ;;  %vm11251_vm8 = vcmask 826368  }
 0x18d   : > { %2366 = vmatprep.subr.bf16.mxu0 %v6499_v41  ;;  %v713_v51 = vsel %vm10976_vm1, %v705_v15, %v706_v10  ;;  %v587_v47 = vsel %vm10976_vm1, %v579_v29, %v580_v34 }
 0x18e   : > { %v8071_v30 = vpop.permute.xlu0 %615  ;;  %2367 = vmatpush1.bf16.msra.mxu0 %v6498_v42  ;;  %v8073_v39 = vpop.permute.xlu1 %488  ;;  %v714_v28 = vsel %vm11249_vm9, %v7651_v8, %v713_v51  ;;  %v588_v29 = vsel %vm11250_vm7, %v7674_v24, %v587_v47  ;;  %vm11254_vm9 = vcmask 908288   ;;  %vm11255_vm7 = vcmask 900096  }
 0x18f   : > { %v10959_v32 = vrot.slane %v8071_v30, 4  ;;  %v10957_v15 = vrot.slane %v8073_v39, 4  ;;  %v6490_v63 = vcombine.low %v672_v25, %v714_v28  ;;  %v6491_v42 = vcombine.high %v672_v25, %v714_v28 }
 0x191   : > { %2368 = vmatprep.subr.bf16.mxu0 %v6491_v42  ;;  %v629_v54 = vsel %vm10976_vm1, %v621_v38, %v10959_v32  ;;  %v503_v51 = vsel %vm10976_vm1, %v494_v16, %v10957_v15  ;;  %v11252_v42 = vrot.slane %v7780_v49, 4  ;;  %v11257_v32 = vrot.slane %v7819_v3, 4 }
 0x192   : > { %v8091_v8 = vpop.permute.xlu0 %531  ;;  %2369 = vmatpush1.bf16.msra.mxu0 %v6490_v63  ;;  %v8093_v14 = vpop.permute.xlu1 %1547  ;;  %v630_v41 = vsel %vm11251_vm8, %v7689_v18, %v629_v54  ;;  %v11253_v18 = vrot.slane %v7734_v44, 4  ;;  %vm11256_vm8 = vcmask 138240  }
 0x193   : > { %v10958_v25 = vrot.slane %v8091_v8, 4  ;;  %v10956_v38 = vrot.slane %v8093_v14, 4  ;;  %v6482_v28 = vcombine.low %v588_v29, %v630_v41  ;;  %v6483_v63 = vcombine.high %v588_v29, %v630_v41 }
 0x194   : > { %v504_v29 = vsel %vm11254_vm9, %v7720_v62, %v503_v51  ;;  %vm11259_vm9 = vcmask 154624  }
 0x195   : > { %v1561_v24 = vsel %vm10976_vm1, %v11252_v42, %v10956_v38  ;;  %2370 = vmatprep.subr.bf16.mxu0 %v6483_v63  ;;  %v545_v47 = vsel %vm10976_vm1, %v11253_v18, %v10958_v25 }
 0x196   : > { %v8116_v16 = vpop.permute.xlu0 %1463  ;;  %2371 = vmatpush1.bf16.msra.mxu0 %v6482_v28  ;;  %v8118_v54 = vpop.permute.xlu1 %1505  ;;  %v546_v41 = vsel %vm11255_vm7, %v7734_v44, %v545_v47  ;;  %v1562_v63 = vsel %vm11256_vm8, %v7780_v49, %v1561_v24  ;;  %v11258_v44 = vrot.slane %v7821_v27, 4  ;;  %vm11260_vm7 = vcmask 146432  }
 0x197   : > { %v1470_v42 = vrot.slane %v8116_v16, 4  ;;  %v10961_v38 = vrot.slane %v8118_v54, 4  ;;  %v6474_v15 = vcombine.low %v504_v29, %v546_v41  ;;  %v6475_v18 = vcombine.high %v504_v29, %v546_v41 }
 0x198   : > { %v6579_v25 = vcombine.high %v1562_v63, %v1562_v63  ;;  %v6578_v28 = vcombine.low %v1562_v63, %v1562_v63  ;;  %vm11262_vm8 = vcmask 72704  }
 0x199   : > { %2372 = vmatprep.subr.bf16.mxu0 %v6475_v18  ;;  %v1477_v62 = vsel %vm10976_vm1, %v11257_v32, %v1470_v42  ;;  %v1519_v49 = vsel %vm10976_vm1, %v11258_v44, %v10961_v38 }
 0x19a   : > { %v8138_v51 = vpop.permute.xlu0 %1379  ;;  %2373 = vmatpush1.bf16.msra.mxu0 %v6474_v15  ;;  %v8140_v24 = vpop.permute.xlu1 %1421  ;;  %v1478_v47 = vsel %vm11259_vm9, %v7819_v3, %v1477_v62  ;;  %v1520_v29 = vsel %vm11260_vm7, %v7821_v27, %v1519_v49  ;;  %v2261_v63 = vsel %vm10976_vm1, %v6578_v28, 0  ;;  %v11261_v3 = vrot.slane %v7861_v56, 4 }
 0x19b   : > { %v10960_v41 = vrot.slane %v8138_v51, 4  ;;  %v1428_v32 = vrot.slane %v8140_v24, 4  ;;  %6586 = vmatprep.subr.msk.bf16.mxu0 %vm10976_vm1, %v6579_v25  ;;  %v6571_v18 = vcombine.high %v1478_v47, %v1520_v29  ;;  %vm11263_vm9 = vcmask 728064  }
 0x19c   : > { %vm11264_vm7 = vcmask 89088  }
 0x19d   : > { %v1393_v15 = vsel %vm10976_vm1, %v1385_v55, %v10960_v41  ;;  %v1435_v27 = vsel %vm10976_vm1, %v11261_v3, %v1428_v32  ;;  %v6570_v41 = vcombine.low %v1478_v47, %v1520_v29 }
 0x19e   : > { %v8160_v62 = vpop.permute.xlu0 %1295  ;;  %2379 = vmatpush2.bf16.msra.mxu0 %v2261_v63  ;;  %v8162_v44 = vpop.permute.xlu1 %1337  ;;  %v1394_v25 = vsel %vm10974_vm10, %v7859_v26, %v1393_v15  ;;  %v1436_v28 = vsel %vm10975_vm2, %v7861_v56, %v1435_v27 }
 0x19f   : > { %v1302_v49 = vrot.slane %v8160_v62, 4  ;;  %v1344_v55 = vrot.slane %v8162_v44, 4  ;;  %2380 = vmatprep.subr.bf16.mxu0 %v6571_v18  ;;  %v6563_v38 = vcombine.high %v1394_v25, %v1436_v28  ;;  %v6562_v3 = vcombine.low %v1394_v25, %v1436_v28 }
 0x1a1   : > { %v1309_v63 = vsel %vm10976_vm1, %v1301_v61, %v1302_v49  ;;  %v1351_v26 = vsel %vm10976_vm1, %v1343_v60, %v1344_v55 }
 0x1a2   : > { %v8180_v56 = vpop.permute.xlu0 %1211  ;;  %2381 = vmatpush2.bf16.msra.mxu0 %v6570_v41  ;;  %v8182_v15 = vpop.permute.xlu1 %1253  ;;  %v1310_v47 = vsel %vm10972_vm14, %v7911_v4, %v1309_v63  ;;  %v1352_v29 = vsel %vm10973_vm13, %v7913_v57, %v1351_v26 }
 0x1a3   : > { %v1218_v18 = vrot.slane %v8180_v56, 4  ;;  %v1260_v61 = vrot.slane %v8182_v15, 4  ;;  %2382 = vmatprep.subr.bf16.mxu0 %v6563_v38  ;;  %v6555_v27 = vcombine.high %v1310_v47, %v1352_v29  ;;  %v6554_v63 = vcombine.low %v1310_v47, %v1352_v29 }
 0x1a5   : > { %v1225_v60 = vsel %vm10976_vm1, %v1217_v40, %v1218_v18  ;;  %v1267_v4 = vsel %vm10976_vm1, %v1259_v9, %v1260_v61 }
 0x1a6   : > { %v8200_v57 = vpop.permute.xlu0 %1127  ;;  %2383 = vmatpush2.bf16.msra.mxu0 %v6562_v3  ;;  %v8202_v41 = vpop.permute.xlu1 %1169  ;;  %v1226_v38 = vsel %vm10970_vm12, %v7935_v59, %v1225_v60  ;;  %v1268_v25 = vsel %vm10971_vm11, %v7948_v36, %v1267_v4 }
 0x1a7   : > { %v10963_v28 = vrot.slane %v8200_v57, 4  ;;  %v10962_v40 = vrot.slane %v8202_v41, 4  ;;  %2384 = vmatprep.subr.bf16.mxu0 %v6555_v27  ;;  %v6547_v26 = vcombine.high %v1226_v38, %v1268_v25  ;;  %v6546_v4 = vcombine.low %v1226_v38, %v1268_v25 }
 0x1a9   : > { %v1141_v9 = vsel %vm10976_vm1, %v1133_v45, %v10963_v28  ;;  %v1183_v59 = vsel %vm10976_vm1, %v1175_v1, %v10962_v40 }
 0x1aa   : > { %v1046_v36 = vpop.permute.xlu0 %1045  ;;  %2385 = vmatpush2.bf16.msra.mxu0 %v6554_v63  ;;  %v1088_v3 = vpop.permute.xlu1 %1087  ;;  %v1142_v27 = vsel %vm10968_vm15, %v7968_v5, %v1141_v9  ;;  %v1184_v47 = vsel %vm10969_vm0, %v7986_v17, %v1183_v59  ;;  %v1022_v59 = vld [vmem:[#allocation2 + $0x1c] sm:$0xff] }
 0x1ab   : > { %v1051_v29 = vrot.slane %v1046_v36, 4  ;;  %v1093_v60 = vrot.slane %v1088_v3, 4  ;;  %2386 = vmatprep.subr.bf16.mxu0 %v6547_v26  ;;  %v6539_v63 = vcombine.high %v1142_v27, %v1184_v47 }
 0x1ad   : > { %v1059_v45 = vsel %vm10976_vm1, %v1050_v52, %v1051_v29  ;;  %v1101_v1 = vsel %vm10976_vm1, %v1092_v37, %v1093_v60  ;;  %v6538_v52 = vcombine.low %v1142_v27, %v1184_v47 }
 0x1ae   : > { %v996_v40 = vpop.permute.xlu0 %995  ;;  %2387 = vmatpush2.bf16.msra.mxu0 %v6546_v4  ;;  %v912_v28 = vpop.permute.xlu1 %911  ;;  %v1060_v5 = vsel %vm10966_vm3, %v7890_v7, %v1059_v45  ;;  %v1102_v17 = vsel %vm10967_vm4, %v7892_v35, %v1101_v1 }
 0x1af   : > { %v1001_v26 = vrot.slane %v996_v40, 4  ;;  %v917_v38 = vrot.slane %v912_v28, 4  ;;  %2388 = vmatprep.subr.bf16.mxu0 %v6539_v63  ;;  %v6532_v25 = vcombine.low %v1060_v5, %v1102_v17  ;;  %v6533_v9 = vcombine.high %v1060_v5, %v1102_v17 }
 0x1b1   : > { %v1009_v37 = vsel %vm10976_vm1, %v1000_v13, %v1001_v26  ;;  %2401 = vmatprep.subr.bf16.mxu1 %v6533_v9  ;;  %v925_v36 = vsel %vm10976_vm1, %v916_v58, %v917_v38 }
 0x1b2   : > { %v954_v7 = vpop.permute.xlu0 %953  ;;  %2389 = vmatpush2.bf16.msra.mxu0 %v6538_v52  ;;  %2402 = vmatpush1.bf16.msra.mxu1 %v6532_v25  ;;  %v1010_v35 = vsel %vm10965_vm5, %v7933_v48, %v1009_v37  ;;  %v828_v28 = vpop.permute.xlu1 %827  ;;  %v926_v48 = vsel %vm10964_vm6, %v7950_v22, %v925_v36 }
 0x1b3   : > { %v959_v40 = vrot.slane %v954_v7, 4  ;;  %v6524_v3 = vcombine.low %v1010_v35, %v1022_v59  ;;  %v6525_v27 = vcombine.high %v1010_v35, %v1022_v59  ;;  %v833_v47 = vrot.slane %v828_v28, 4 }
 0x1b5   : > { %v967_v13 = vsel %vm10976_vm1, %v958_v31, %v959_v40  ;;  %2391 = vmatmul.mubr.bf16.vlgmr.msra.gmra.mxu0 %v7882_v33  ;;  %2403 = vmatprep.subr.bf16.mxu1 %v6525_v27  ;;  %v841_v58 = vsel %vm10976_vm1, %v832_v53, %v833_v47 }
 0x1b6   : > { %v870_v29 = vpop.permute.xlu0 %869  ;;  %2404 = vmatpush1.bf16.msra.mxu1 %v6524_v3  ;;  %v968_v60 = vsel %vm11262_vm8, %v7966_v23, %v967_v13  ;;  %v744_v4 = vpop.permute.xlu1 %743  ;;  %v842_v5 = vsel %vm11263_vm9, %v7988_v12, %v841_v58  ;;  %vm11265_vm8 = vcmask 744448   ;;  %vm11266_vm9 = vcmask 736256  }
 0x1b7   : > { %v875_v45 = vrot.slane %v870_v29, 4  ;;  %v6516_v1 = vcombine.low %v926_v48, %v968_v60  ;;  %v6517_v63 = vcombine.high %v926_v48, %v968_v60  ;;  %v749_v31 = vrot.slane %v744_v4, 4 }
 0x1b9   : > { %v883_v53 = vsel %vm10976_vm1, %v874_v43, %v875_v45  ;;  %2405 = vmatprep.subr.bf16.mxu1 %v6517_v63  ;;  %v757_v22 = vsel %vm10976_vm1, %v748_v19, %v749_v31 }
 0x1ba   : > { %v786_v17 = vpop.permute.xlu0 %785  ;;  %2406 = vmatpush1.bf16.msra.mxu1 %v6516_v1  ;;  %v884_v23 = vsel %vm11264_vm7, %v8006_v46, %v883_v53  ;;  %v660_v26 = vpop.permute.xlu1 %659  ;;  %v758_v12 = vsel %vm11265_vm8, %v8008_v0, %v757_v22  ;;  %vm11267_vm7 = vcmask 818176   ;;  %vm11268_vm8 = vcmask 809984  }
 0x1bb   : > { %v791_v38 = vrot.slane %v786_v17, 4  ;;  %v6508_v25 = vcombine.low %v842_v5, %v884_v23  ;;  %v6509_v9 = vcombine.high %v842_v5, %v884_v23  ;;  %v665_v52 = vrot.slane %v660_v26, 4 }
 0x1bc   : > { %v11274_v5 = vrot.slane %v8091_v8, 4  ;;  %v11275_v22 = vrot.slane %v8093_v14, 4 }
 0x1bd   : > { %v799_v43 = vsel %vm10976_vm1, %v790_v6, %v791_v38  ;;  %2407 = vmatprep.subr.bf16.mxu1 %v6509_v9  ;;  %v673_v19 = vsel %vm10976_vm1, %v664_v21, %v665_v52 }
 0x1be   : > { %v702_v59 = vpop.permute.xlu0 %701  ;;  %2408 = vmatpush1.bf16.msra.mxu1 %v6508_v25  ;;  %v800_v46 = vsel %vm11266_vm9, %v8026_v2, %v799_v43  ;;  %v576_v37 = vpop.permute.xlu1 %575  ;;  %v674_v0 = vsel %vm11267_vm7, %v8028_v20, %v673_v19  ;;  %vm11269_vm9 = vcmask 891904   ;;  %vm11272_vm7 = vcmask 826368  }
 0x1bf   : > { %v707_v36 = vrot.slane %v702_v59, 4  ;;  %v6500_v7 = vcombine.low %v758_v12, %v800_v46  ;;  %v6501_v35 = vcombine.high %v758_v12, %v800_v46  ;;  %v581_v28 = vrot.slane %v576_v37, 4 }
 0x1c0   : > { %v11278_v59 = vrot.slane %v8118_v54, 4 }
 0x1c1   : > { %v715_v6 = vsel %vm10976_vm1, %v706_v10, %v707_v36  ;;  %2409 = vmatprep.subr.bf16.mxu1 %v6501_v35  ;;  %v589_v21 = vsel %vm10976_vm1, %v580_v34, %v581_v28  ;;  %v11270_v10 = vrot.slane %v8071_v30, 4  ;;  %v11271_v34 = vrot.slane %v8073_v39, 4 }
 0x1c2   : > { %v618_v40 = vpop.permute.xlu0 %617  ;;  %2410 = vmatpush1.bf16.msra.mxu1 %v6500_v7  ;;  %v716_v2 = vsel %vm11268_vm8, %v8047_v11, %v715_v6  ;;  %v491_v3 = vpop.permute.xlu1 %490  ;;  %v590_v20 = vsel %vm11269_vm9, %v8049_v50, %v589_v21  ;;  %vm11273_vm8 = vcmask 908288   ;;  %vm11276_vm9 = vcmask 900096  }
 0x1c3   : > { %v623_v27 = vrot.slane %v618_v40, 4  ;;  %v6492_v47 = vcombine.low %v674_v0, %v716_v2  ;;  %v6493_v13 = vcombine.high %v674_v0, %v716_v2  ;;  %v496_v58 = vrot.slane %v491_v3, 4 }
 0x1c4   : > { %v11281_v0 = vrot.slane %v8138_v51, 4 }
 0x1c5   : > { %v631_v29 = vsel %vm10976_vm1, %v11270_v10, %v623_v27  ;;  %2411 = vmatprep.subr.bf16.mxu1 %v6493_v13  ;;  %v505_v48 = vsel %vm10976_vm1, %v11271_v34, %v496_v58 }
 0x1c6   : > { %v534_v60 = vpop.permute.xlu0 %533  ;;  %2412 = vmatpush1.bf16.msra.mxu1 %v6492_v47  ;;  %v632_v11 = vsel %vm11272_vm7, %v8071_v30, %v631_v29  ;;  %v1550_v4 = vpop.permute.xlu1 %1549  ;;  %v506_v50 = vsel %vm11273_vm8, %v8073_v39, %v505_v48  ;;  %vm11277_vm7 = vcmask 138240   ;;  %vm11279_vm8 = vcmask 154624  }
 0x1c7   : > { %v539_v45 = vrot.slane %v534_v60, 4  ;;  %v6484_v1 = vcombine.low %v590_v20, %v632_v11  ;;  %v6485_v63 = vcombine.high %v590_v20, %v632_v11  ;;  %v1555_v31 = vrot.slane %v1550_v4, 4 }
 0x1c9   : > { %v547_v53 = vsel %vm10976_vm1, %v11274_v5, %v539_v45  ;;  %2413 = vmatprep.subr.bf16.mxu1 %v6485_v63  ;;  %v1563_v17 = vsel %vm10976_vm1, %v11275_v22, %v1555_v31 }
 0x1ca   : > { %2414 = vmatpush1.bf16.msra.mxu1 %v6484_v1  ;;  %v548_v30 = vsel %vm11276_vm9, %v8091_v8, %v547_v53  ;;  %v1466_v23 = vpop.permute.xlu0 %1465  ;;  %v1508_v26 = vpop.permute.xlu1 %1507  ;;  %v1564_v38 = vsel %vm11277_vm7, %v8093_v14, %v1563_v17  ;;  %vm11280_vm9 = vcmask 146432  }
 0x1cb   : > { %v6476_v25 = vcombine.low %v506_v50, %v548_v30  ;;  %v6477_v39 = vcombine.high %v506_v50, %v548_v30  ;;  %v1471_v9 = vrot.slane %v1466_v23, 4  ;;  %v1513_v52 = vrot.slane %v1508_v26, 4 }
 0x1cc   : > { %v6581_v12 = vcombine.high %v1564_v38, %v1564_v38  ;;  %v6580_v43 = vcombine.low %v1564_v38, %v1564_v38  ;;  %v285_v30 = vlaneseq }
 0x1cd   : > { %2415 = vmatprep.subr.bf16.mxu1 %v6477_v39  ;;  %v1479_v19 = vsel %vm10976_vm1, %v1470_v42, %v1471_v9  ;;  %v1521_v8 = vsel %vm10976_vm1, %v11278_v59, %v1513_v52 }
 0x1ce   : > { %2416 = vmatpush1.bf16.msra.mxu1 %v6476_v25  ;;  %v1382_v46 = vpop.permute.xlu0 %1381  ;;  %v1424_v37 = vpop.permute.xlu1 %1423  ;;  %v1480_v14 = vsel %vm11279_vm8, %v8116_v16, %v1479_v19  ;;  %v1522_v36 = vsel %vm11280_vm9, %v8118_v54, %v1521_v8  ;;  %v2267_v35 = vsel %vm10976_vm1, %v6580_v43, 0  ;;  %v8358_v23 = vand.u32 127, %v285_v30 }
 0x1cf   : > { %6588 = vmatprep.subr.msk.bf16.mxu1 %vm10976_vm1, %v6581_v12  ;;  %v1387_v7 = vrot.slane %v1382_v46, 4  ;;  %v1429_v28 = vrot.slane %v1424_v37, 4  ;;  %v6573_v42 = vcombine.high %v1480_v14, %v1522_v36  ;;  %v6572_v16 = vcombine.low %v1480_v14, %v1522_v36 }
 0x1d0   : > { %v287_v26 = vadd.s32 128, %v8358_v23  ;;  %v294_v38 = vcvt.s32.f32 %v8358_v23  ;;  %v289_v14 = vadd.s32 384, %v8358_v23 }
 0x1d1   : > { %v1395_v6 = vsel %vm10976_vm1, %v11281_v0, %v1387_v7  ;;  %v1437_v21 = vsel %vm10976_vm1, %v1428_v32, %v1429_v28 }
 0x1d2   : > { %2422 = vmatpush2.bf16.msra.mxu1 %v2267_v35  ;;  %v1298_v40 = vpop.permute.xlu0 %1297  ;;  %v1340_v2 = vpop.permute.xlu1 %1339  ;;  %v1396_v54 = vsel %vm10974_vm10, %v8138_v51, %v1395_v6  ;;  %v1438_v3 = vsel %vm10975_vm2, %v8140_v24, %v1437_v21  ;;  %v295_v25 = vcvt.s32.f32 %v287_v26  ;;  %v297_v28 = vcvt.s32.f32 %v289_v14 }
 0x1d3   : > { %2423 = vmatprep.subr.bf16.mxu1 %v6573_v42  ;;  %v1303_v27 = vrot.slane %v1298_v40, 4  ;;  %v1345_v47 = vrot.slane %v1340_v2, 4  ;;  %v6565_v13 = vcombine.high %v1396_v54, %v1438_v3  ;;  %v6564_v20 = vcombine.low %v1396_v54, %v1438_v3 }
 0x1d4   : > { %v304_v39 = vmul.f32 0.01, %v295_v25  ;;  %v306_v21 = vmul.f32 0.01, %v297_v28  ;;  %v290_v26 = vadd.s32 512, %v8358_v23 }
 0x1d5   : > { %v1311_v58 = vsel %vm10976_vm1, %v1302_v49, %v1303_v27  ;;  %v1353_v32 = vsel %vm10976_vm1, %v1344_v55, %v1345_v47  ;;  %v11284_v27 = vmov 0  }
 0x1d6   : > { %2424 = vmatpush2.bf16.msra.mxu1 %v6572_v16  ;;  %v1214_v10 = vpop.permute.xlu0 %1213  ;;  %v1256_v29 = vpop.permute.xlu1 %1255  ;;  %v1312_v51 = vsel %vm10972_vm14, %v8160_v62, %v1311_v58  ;;  %v1354_v24 = vsel %vm10973_vm13, %v8162_v44, %v1353_v32  ;;  %v314_v40 = vfloor.f32 %v306_v21 }
 0x1d7   : > { %2425 = vmatprep.subr.bf16.mxu1 %v6565_v13  ;;  %v1219_v34 = vrot.slane %v1214_v10, 4  ;;  %v1261_v48 = vrot.slane %v1256_v29, 4  ;;  %v6557_v60 = vcombine.high %v1312_v51, %v1354_v24  ;;  %v6556_v11 = vcombine.low %v1312_v51, %v1354_v24 }
 0x1d8   : > { %v322_v54 = vmul.f32 100.0, %v314_v40 }
 0x1d9   : > { %v1227_v49 = vsel %vm10976_vm1, %v1218_v18, %v1219_v34  ;;  %v1269_v55 = vsel %vm10976_vm1, %v1260_v61, %v1261_v48  ;;  %v11282_v18 = vrot.slane %v8200_v57, 4  ;;  %v11283_v61 = vrot.slane %v8202_v41, 4 }
 0x1da   : > { %2426 = vmatpush2.bf16.msra.mxu1 %v6564_v20  ;;  %v1130_v4 = vpop.permute.xlu0 %1129  ;;  %v1172_v45 = vpop.permute.xlu1 %1171  ;;  %v1228_v62 = vsel %vm10970_vm12, %v8180_v56, %v1227_v49  ;;  %v1270_v44 = vsel %vm10971_vm11, %v8182_v15, %v1269_v55  ;;  %v330_v32 = vsub.f32 %v297_v28, %v322_v54 }
 0x1db   : > { %2427 = vmatprep.subr.bf16.mxu1 %v6557_v60  ;;  %v1135_v1 = vrot.slane %v1130_v4, 4  ;;  %v1177_v63 = vrot.slane %v1172_v45, 4  ;;  %v6549_v31 = vcombine.high %v1228_v62, %v1270_v44  ;;  %v6548_v53 = vcombine.low %v1228_v62, %v1270_v44 }
 0x1dc   : > { %v339_v49 = vmul.f32 0.1, %v330_v32 }
 0x1dd   : > { %v1143_v50 = vsel %vm10976_vm1, %v11282_v18, %v1135_v1  ;;  %v1185_v5 = vsel %vm10976_vm1, %v11283_v61, %v1177_v63 }
 0x1de   : > { %2428 = vmatpush2.bf16.msra.mxu1 %v6556_v11  ;;  %v1144_v56 = vsel %vm10968_vm15, %v8200_v57, %v1143_v50  ;;  %v1186_v15 = vsel %vm10969_vm0, %v8202_v41, %v1185_v5  ;;  %v303_v57 = vmul.f32 0.01, %v294_v38  ;;  %v312_v41 = vfloor.f32 %v304_v39 }
 0x1df   : > { %2429 = vmatprep.subr.bf16.mxu1 %v6549_v31  ;;  %v6541_v22 = vcombine.high %v1144_v56, %v1186_v15  ;;  %v6540_v17 = vcombine.low %v1144_v56, %v1186_v15  ;;  %v347_v18 = vfloor.f32 %v339_v49 }
 0x1e0   : > { %v311_v9 = vfloor.f32 %v303_v57  ;;  %v320_v12 = vmul.f32 100.0, %v312_v41  ;;  %vm377_vm9 = vcmp.ge.f32.partialorder %v312_v41, 1.0  ;;  %vm393_vm6 = vcmp.le.f32.partialorder %v312_v41, 8.0 }
 0x1e1   : > { %vm401_vm4 = vmand %vm377_vm9, %vm393_vm6  ;;  %v355_v15 = vmul.f32 10.0, %v347_v18 }
 0x1e2   : > { %2430 = vmatpush2.bf16.msra.mxu1 %v6548_v53  ;;  %v319_v52 = vmul.f32 100.0, %v311_v9  ;;  %v328_v19 = vsub.f32 %v295_v25, %v320_v12  ;;  %vm376_vm7 = vcmp.ge.f32.partialorder %v311_v9, 1.0  ;;  %vm392_vm8 = vcmp.le.f32.partialorder %v311_v9, 8.0 }
 0x1e3   : > { %2431 = vmatprep.subr.bf16.mxu1 %v6541_v22  ;;  %vm400_vm5 = vmand %vm376_vm7, %vm392_vm8  ;;  %v298_v25 = vcvt.s32.f32 %v290_v26 }
 0x1e4   : > { %v327_v43 = vsub.f32 %v294_v38, %v319_v52  ;;  %v337_v8 = vmul.f32 0.1, %v328_v19  ;;  %v291_v38 = vadd.s32 640, %v8358_v23 }
 0x1e6   : > { %2432 = vmatpush2.bf16.msra.mxu1 %v6540_v17  ;;  %v336_v59 = vmul.f32 0.1, %v327_v43  ;;  %v345_v37 = vfloor.f32 %v337_v8  ;;  %v363_v17 = vsub.f32 %v330_v32, %v355_v15  ;;  %v299_v39 = vcvt.s32.f32 %v291_v38 }
 0x1e7   : > { %v8364_v3 = vpop.permute.xlu0 %1687  ;;  %v8369_v51 = vpop.permute.xlu1 %1692 }
 0x1e8   : > { %v344_v46 = vfloor.f32 %v336_v59  ;;  %v353_v35 = vmul.f32 10.0, %v345_v37  ;;  %vm409_vm15 = vcmp.ge.f32.partialorder %v345_v37, 1.0  ;;  %vm425_vm14 = vcmp.le.f32.partialorder %v345_v37, 8.0 }
 0x1e9   : > { %2434 = vmatmul.mubr.bf16.vlgmr.msra.gmra.mxu1 %v7882_v33  ;;  %v288_v33 = vadd.s32 256, %v8358_v23  ;;  %vm417_vm11 = vmand %vm401_vm4, %vm409_vm15 }
 0x1ea   : > { %v352_v36 = vmul.f32 10.0, %v344_v46  ;;  %vm408_vm3 = vcmp.ge.f32.partialorder %v344_v46, 1.0  ;;  %vm424_vm12 = vcmp.le.f32.partialorder %v344_v46, 8.0  ;;  %v361_v6 = vsub.f32 %v328_v19, %v353_v35  ;;  %vm433_vm2 = vmand %vm417_vm11, %vm425_vm14 }
 0x1eb   : > { %v296_v7 = vcvt.s32.f32 %v288_v33  ;;  %vm416_vm0 = vmand %vm400_vm5, %vm408_vm3  ;;  %v308_v46 = vmul.f32 0.01, %v299_v39 }
 0x1ec   : > { %v360_v42 = vsub.f32 %v327_v43, %v352_v36  ;;  %vm432_vm13 = vmand %vm416_vm0, %vm424_vm12  ;;  %vm441_vm1 = vcmp.ge.f32.partialorder %v361_v6, 1.0  ;;  %vm457_vm9 = vcmp.le.f32.partialorder %v361_v6, 8.0  ;;  %vm379_vm12 = vcmp.ge.f32.partialorder %v314_v40, 1.0 }
 0x1ed   : > { %v305_v0 = vmul.f32 0.01, %v296_v7  ;;  %vm449_vm6 = vmand %vm433_vm2, %vm441_vm1  ;;  %vm411_vm2 = vcmp.ge.f32.partialorder %v347_v18, 1.0  ;;  %v307_v43 = vmul.f32 0.01, %v298_v25  ;;  %v316_v6 = vfloor.f32 %v308_v46 }
 0x1ee   : > { %vm440_vm10 = vcmp.ge.f32.partialorder %v360_v42, 1.0  ;;  %vm456_vm8 = vcmp.le.f32.partialorder %v360_v42, 8.0  ;;  %vm465_vm5 = vmand %vm449_vm6, %vm457_vm9  ;;  %vm427_vm9 = vcmp.le.f32.partialorder %v347_v18, 8.0 }
 0x1ef   : > { %v313_v16 = vfloor.f32 %v305_v0  ;;  %vm448_vm7 = vmand %vm432_vm13, %vm440_vm10  ;;  %v2461_v10 = vsel %vm465_vm5, 1, %v11284_v27  ;;  %vm395_vm13 = vcmp.le.f32.partialorder %v314_v40, 8.0  ;;  %v315_v36 = vfloor.f32 %v307_v43 }
 0x1f0   : > { %vm464_vm3 = vmand %vm448_vm7, %vm456_vm8  ;;  %vm2469_vm1 = vcmp.eq.s32.totalorder %v2461_v10, 1 }
 0x1f1   : > { %v321_v2 = vmul.f32 100.0, %v313_v16  ;;  %v2460_v47 = vsel %vm464_vm3, 1, %v11284_v27  ;;  %vm378_vm10 = vcmp.ge.f32.partialorder %v313_v16, 1.0  ;;  %vm394_vm11 = vcmp.le.f32.partialorder %v313_v16, 8.0  ;;  %vm403_vm0 = vmand %vm379_vm12, %vm395_vm13 }
 0x1f2   : > { %vm2468_vm4 = vcmp.eq.s32.totalorder %v2460_v47, 1  ;;  %vm402_vm14 = vmand %vm378_vm10, %vm394_vm11  ;;  %vm459_vm13 = vcmp.le.f32.partialorder %v363_v17, 8.0  ;;  %v324_v47 = vmul.f32 100.0, %v316_v6 }
 0x1f3   : > { %v329_v13 = vsub.f32 %v296_v7, %v321_v2  ;;  %vm419_vm6 = vmand %vm403_vm0, %vm411_vm2  ;;  %v323_v2 = vmul.f32 100.0, %v315_v36 }
 0x1f5   : > { %v338_v48 = vmul.f32 0.1, %v329_v13 }
 0x1f7   : > { %v346_v44 = vfloor.f32 %v338_v48 }
 0x1f9   : > { %v354_v5 = vmul.f32 10.0, %v346_v44  ;;  %vm410_vm15 = vcmp.ge.f32.partialorder %v346_v44, 1.0  ;;  %vm426_vm8 = vcmp.le.f32.partialorder %v346_v44, 8.0  ;;  %v292_v44 = vadd.s32 768, %v8358_v23 }
 0x1fa   : > { %vm418_vm7 = vmand %vm402_vm14, %vm410_vm15 }
 0x1fb   : > { %v362_v22 = vsub.f32 %v329_v13, %v354_v5  ;;  %vm434_vm3 = vmand %vm418_vm7, %vm426_vm8  ;;  %v331_v13 = vsub.f32 %v298_v25, %v323_v2  ;;  %vm380_vm7 = vcmp.ge.f32.partialorder %v315_v36, 1.0  ;;  %vm396_vm8 = vcmp.le.f32.partialorder %v315_v36, 8.0 }
 0x1fc   : > { %v300_v15 = vcvt.s32.f32 %v292_v44 }
 0x1fd   : > { %vm442_vm5 = vcmp.ge.f32.partialorder %v362_v22, 1.0  ;;  %vm458_vm11 = vcmp.le.f32.partialorder %v362_v22, 8.0 }
 0x1fe   : > { %vm450_vm10 = vmand %vm434_vm3, %vm442_vm5 }
 0x1ff   : > { %vm466_vm14 = vmand %vm450_vm10, %vm458_vm11 }
 0x200   : > { %v2462_v41 = vsel %vm466_vm14, 1, %v11284_v27  ;;  %vm404_vm3 = vmand %vm380_vm7, %vm396_vm8 }
 0x201   : > { %vm2470_vm0 = vcmp.eq.s32.totalorder %v2462_v41, 1  ;;  %v309_v41 = vmul.f32 0.01, %v300_v15 }
 0x203   : > { %v317_v43 = vfloor.f32 %v309_v41 }
 0x22d   : > { %v2306_v58 = vpop.f32.mrf.mxu0 }
 0x22e   : > { %v2307_v20 = vadd.f32 %v2306_v58, %v8364_v3  ;;  %v332_v58 = vsub.f32 %v299_v39, %v324_v47 }
 0x22f   : > { %v2308_v29 = vpop.f32.mrf.mxu0 }
 0x230   : > { %v2309_v24 = vadd.f32 %v2308_v29, %v8364_v3  ;;  %v2444_v34 = vmax.f32 %v2307_v20, 0.0  ;;  %v340_v20 = vmul.f32 0.1, %v331_v13  ;;  %v341_v10 = vmul.f32 0.1, %v332_v58 }
 0x231   : > { %v2310_v60 = vpop.f32.mrf.mxu0 }
 0x232   : > { %v2445_v55 = vmax.f32 %v2309_v24, 0.0  ;;  %v2476_v11 = vsel %vm2468_vm4, %v2444_v34, 0.0  ;;  %v2311_v4 = vadd.f32 %v2310_v60, %v8369_v51  ;;  %v348_v29 = vfloor.f32 %v340_v20 }
 0x233   : > { %v2312_v45 = vpop.f32.mrf.mxu0  ;;  %v349_v24 = vfloor.f32 %v341_v10 }
 0x234   : > { %v2477_v62 = vsel %vm2469_vm1, %v2445_v55, 0.0  ;;  %v2313_v1 = vadd.f32 %v2312_v45, %v8369_v51  ;;  %v2452_v63 = vmax.f32 %v2311_v4, 0.0  ;;  %v356_v34 = vmul.f32 10.0, %v348_v29 }
 0x235   : > { %v8376_v31 = vpack.c.bf16 %v2477_v62, %v2476_v11  ;;  %v357_v48 = vmul.f32 10.0, %v349_v24  ;;  %vm412_vm5 = vcmp.ge.f32.partialorder %v348_v29, 1.0  ;;  %vm428_vm11 = vcmp.le.f32.partialorder %v348_v29, 8.0 }
 0x236   : > { %v2453_v50 = vmax.f32 %v2313_v1, 0.0  ;;  %v2484_v61 = vsel %vm2468_vm4, %v2452_v63, 0.0  ;;  %vm435_vm4 = vmand %vm419_vm6, %vm427_vm9  ;;  %vm381_vm6 = vcmp.ge.f32.partialorder %v316_v6, 1.0  ;;  %vm397_vm9 = vcmp.le.f32.partialorder %v316_v6, 8.0 }
 0x237   : > { %2540 = vst [vmem:[#allocation3 + $0x4] sm:$0xff] %v8376_v31  ;;  %v364_v60 = vsub.f32 %v331_v13, %v356_v34  ;;  %vm420_vm10 = vmand %vm404_vm3, %vm412_vm5  ;;  %v365_v49 = vsub.f32 %v332_v58, %v357_v48 }
 0x238   : > { %v2485_v53 = vsel %vm2469_vm1, %v2453_v50, 0.0  ;;  %vm443_vm1 = vcmp.ge.f32.partialorder %v363_v17, 1.0  ;;  %vm436_vm14 = vmand %vm420_vm10, %vm428_vm11  ;;  %v293_v50 = vadd.s32 896, %v8358_v23 }
 0x239   : > { %v8381_v56 = vpack.c.bf16 %v2485_v53, %v2484_v61  ;;  %vm451_vm12 = vmand %vm435_vm4, %vm443_vm1  ;;  %vm413_vm1 = vcmp.ge.f32.partialorder %v349_v24, 1.0  ;;  %vm460_vm8 = vcmp.le.f32.partialorder %v364_v60, 8.0 }
 0x23a   : > { %vm467_vm15 = vmand %vm451_vm12, %vm459_vm13  ;;  %vm429_vm13 = vcmp.le.f32.partialorder %v349_v24, 8.0  ;;  %v301_v23 = vcvt.s32.f32 %v293_v50  ;;  %vm375_vm10 = vcmp.lt.s32.totalorder %v293_v50, 1000 }
 0x23b   : > { %2544 = vst [vmem:[#allocation3 + $0x2c] sm:$0xff] %v8381_v56  ;;  %v2463_v52 = vsel %vm467_vm15, 1, %v11284_v27  ;;  %vm405_vm4 = vmand %vm381_vm6, %vm397_vm9  ;;  %vm444_vm15 = vcmp.ge.f32.partialorder %v364_v60, 1.0  ;;  %vm461_vm9 = vcmp.le.f32.partialorder %v365_v49, 8.0 }
 0x23c   : > { %vm2471_vm2 = vcmp.eq.s32.totalorder %v2463_v52, 1  ;;  %vm421_vm12 = vmand %vm405_vm4, %vm413_vm1 }
 0x23d   : > { %vm452_vm7 = vmand %vm436_vm14, %vm444_vm15 }
 0x23e   : > { %v8384_v30 = vld [vmem:[#allocation3] sm:$0xff]  ;;  %vm468_vm3 = vmand %vm452_vm7, %vm460_vm8 }
 0x23f   : > { %2568 = vrot.lane.b32.xlu1 %v8384_v30, %s11228_s26  ;;  %v2464_v4 = vsel %vm468_vm3, 1, %v11284_v27 }
 0x240   : > { %vm2472_vm4 = vcmp.eq.s32.totalorder %v2464_v4, 1 }
 0x243   : > { %2650 = vrot.lane.b32.xlu1 %v8384_v30, %s11229_s16 }
 0x247   : > { %2732 = vrot.lane.b32.xlu1 %v8384_v30, %s11226_s23 }
 0x249   : > { %v2349_v57 = vpop.f32.mrf.mxu1 }
 0x24a   : > { %v2350_v9 = vadd.f32 %v2349_v57, %v8364_v3 }
 0x24b   : > { %v2351_v12 = vpop.f32.mrf.mxu1 }
 0x24c   : > { %v2446_v19 = vmax.f32 %v2350_v9, 0.0  ;;  %v2352_v59 = vadd.f32 %v2351_v12, %v8364_v3  ;;  %v310_v12 = vmul.f32 0.01, %v301_v23 }
 0x24d   : > { %v2353_v8 = vpop.f32.mrf.mxu1 }
 0x24e   : > { %v2447_v33 = vmax.f32 %v2352_v59, 0.0  ;;  %v2354_v37 = vadd.f32 %v2353_v8, %v8369_v51  ;;  %v2478_v7 = vsel %vm2470_vm0, %v2446_v19, 0.0  ;;  %v318_v19 = vfloor.f32 %v310_v12 }
 0x24f   : > { %v2355_v14 = vpop.f32.mrf.mxu1  ;;  %v325_v59 = vmul.f32 100.0, %v317_v43 }
 0x250   : > { %v2479_v35 = vsel %vm2471_vm2, %v2447_v33, 0.0  ;;  %v2454_v28 = vmax.f32 %v2354_v37, 0.0  ;;  %v2356_v42 = vadd.f32 %v2355_v14, %v8369_v51  ;;  %v326_v8 = vmul.f32 100.0, %v318_v19 }
 0x251   : > { %v8402_v0 = vpack.c.bf16 %v2479_v35, %v2478_v7  ;;  %v333_v46 = vsub.f32 %v300_v15, %v325_v59  ;;  %vm383_vm11 = vcmp.ge.f32.partialorder %v318_v19, 1.0  ;;  %vm399_vm15 = vcmp.le.f32.partialorder %v318_v19, 8.0 }
 0x252   : > { %v2455_v21 = vmax.f32 %v2356_v42, 0.0  ;;  %v2486_v16 = vsel %vm2470_vm0, %v2454_v28, 0.0  ;;  %vm437_vm0 = vmand %vm421_vm12, %vm429_vm13  ;;  %v334_v33 = vsub.f32 %v301_v23, %v326_v8  ;;  %vm382_vm12 = vcmp.ge.f32.partialorder %v317_v43, 1.0 }
 0x253   : > { %2541 = vst [vmem:[#allocation3 + $0xc] sm:$0xff] %v8402_v0  ;;  %4390 = vrot.lane.b32.xlu1 %v8402_v0, %s11234_s3  ;;  %v342_v37 = vmul.f32 0.1, %v333_v46  ;;  %vm398_vm13 = vcmp.le.f32.partialorder %v317_v43, 8.0  ;;  %vm391_vm14 = vmand %vm375_vm10, %vm383_vm11 }
 0x254   : > { %v2487_v40 = vsel %vm2471_vm2, %v2455_v21, 0.0  ;;  %vm445_vm2 = vcmp.ge.f32.partialorder %v365_v49, 1.0  ;;  %v343_v14 = vmul.f32 0.1, %v334_v33  ;;  %vm407_vm7 = vmand %vm391_vm14, %vm399_vm15 }
 0x255   : > { %v8409_v54 = vpack.c.bf16 %v2487_v40, %v2486_v16  ;;  %vm453_vm6 = vmand %vm437_vm0, %vm445_vm2  ;;  %v350_v7 = vfloor.f32 %v342_v37  ;;  %v8496_v16 = vld [vmem:[#allocation3 + $0x28] sm:$0xff] }
 0x256   : > { %vm469_vm5 = vmand %vm453_vm6, %vm461_vm9  ;;  %v351_v35 = vfloor.f32 %v343_v14 }
 0x257   : > { %2545 = vst [vmem:[#allocation3 + $0x34] sm:$0xff] %v8409_v54  ;;  %v2465_v45 = vsel %vm469_vm5, 1, %v11284_v27  ;;  %v358_v28 = vmul.f32 10.0, %v350_v7  ;;  %vm406_vm0 = vmand %vm382_vm12, %vm398_vm13  ;;  %vm414_vm2 = vcmp.ge.f32.partialorder %v350_v7, 1.0  ;;  %vm430_vm9 = vcmp.le.f32.partialorder %v350_v7, 8.0 }
 0x258   : > { %vm2473_vm1 = vcmp.eq.s32.totalorder %v2465_v45, 1  ;;  %v359_v42 = vmul.f32 10.0, %v351_v35  ;;  %vm415_vm8 = vcmp.ge.f32.partialorder %v351_v35, 1.0  ;;  %vm422_vm6 = vmand %vm406_vm0, %vm414_vm2  ;;  %vm431_vm5 = vcmp.le.f32.partialorder %v351_v35, 8.0 }
 0x259   : > { %v366_v6 = vsub.f32 %v333_v46, %v358_v28  ;;  %vm423_vm3 = vmand %vm407_vm7, %vm415_vm8 }
 0x25a   : > { %v8412_v32 = vld [vmem:[#allocation3 + $0x8] sm:$0xff]  ;;  %v367_v21 = vsub.f32 %v334_v33, %v359_v42  ;;  %vm439_vm10 = vmand %vm423_vm3, %vm431_vm5  ;;  %vm11292_vm5 = vcmask 220160  }
 0x25b   : > { %2570 = vrot.lane.b32.xlu0 %v8412_v32, %s11228_s26  ;;  %3144 = vrot.lane.b32.xlu1 %v8412_v32, %s11223_s24  ;;  %vm462_vm13 = vcmp.le.f32.partialorder %v366_v6, 8.0 }
 0x25c   : > { %vm447_vm11 = vcmp.ge.f32.partialorder %v367_v21, 1.0  ;;  %vm463_vm15 = vcmp.le.f32.partialorder %v367_v21, 8.0 }
 0x25d   : > { %vm455_vm14 = vmand %vm439_vm10, %vm447_vm11  ;;  %vm11296_vm11 = vcmask 736256  }
 0x25e   : > { %v8482_v36 = vld [vmem:[#allocation3 + $0x30] sm:$0xff]  ;;  %vm471_vm2 = vmand %vm455_vm14, %vm463_vm15  ;;  %vm11300_vm15 = vcmask 228352  }
 0x25f   : > { %2652 = vrot.lane.b32.xlu0 %v8412_v32, %s11229_s16  ;;  %4308 = vrot.lane.b32.xlu1 %v8402_v0, %s11233_s0  ;;  %v2467_v13 = vsel %vm471_vm2, 1, %v11284_v27  ;;  %vm11302_vm2 = vmmov %vm11300_vm15 }
 0x260   : > { %vm2475_vm8 = vcmp.eq.s32.totalorder %v2467_v13, 1 }
 0x263   : > { %4388 = vrot.lane.b32.xlu0 %v8376_v31, %s11234_s3  ;;  %3062 = vrot.lane.b32.xlu1 %v8412_v32, %s11222_s6 }
 0x267   : > { %3142 = vrot.lane.b32.xlu0 %v8384_v30, %s11223_s24  ;;  %4226 = vrot.lane.b32.xlu1 %v8402_v0, %s11236_s20 }
 0x26b   : > { %4306 = vrot.lane.b32.xlu0 %v8376_v31, %s11233_s0  ;;  %2980 = vrot.lane.b32.xlu1 %v8412_v32, %s11225_s14 }
 0x26f   : > { %3060 = vrot.lane.b32.xlu0 %v8384_v30, %s11222_s6  ;;  %4144 = vrot.lane.b32.xlu1 %v8402_v0, %s11235_s12 }
 0x273   : > { %4224 = vrot.lane.b32.xlu0 %v8376_v31, %s11236_s20  ;;  %2898 = vrot.lane.b32.xlu1 %v8412_v32, %s11224_s30 }
 0x275   : > { %v2392_v55 = vpop.f32.mrf.mxu0 }
 0x276   : > { %v2393_v11 = vadd.f32 %v2392_v55, %v8364_v3 }
 0x277   : > { %2978 = vrot.lane.b32.xlu0 %v8384_v30, %s11225_s14  ;;  %v2394_v62 = vpop.f32.mrf.mxu0  ;;  %4062 = vrot.lane.b32.xlu1 %v8402_v0, %s11238_s29 }
 0x278   : > { %v2448_v1 = vmax.f32 %v2393_v11, 0.0  ;;  %v2395_v63 = vadd.f32 %v2394_v62, %v8364_v3 }
 0x279   : > { %v2396_v18 = vpop.f32.mrf.mxu0 }
 0x27a   : > { %v2449_v61 = vmax.f32 %v2395_v63, 0.0  ;;  %v2397_v5 = vadd.f32 %v2396_v18, %v8369_v51  ;;  %v2480_v22 = vsel %vm2472_vm4, %v2448_v1, 0.0 }
 0x27b   : > { %4142 = vrot.lane.b32.xlu0 %v8376_v31, %s11235_s12  ;;  %v2398_v53 = vpop.f32.mrf.mxu0  ;;  %2816 = vrot.lane.b32.xlu1 %v8412_v32, %s11227_s15 }
 0x27c   : > { %v2481_v17 = vsel %vm2473_vm1, %v2449_v61, 0.0  ;;  %v2456_v26 = vmax.f32 %v2397_v5, 0.0  ;;  %v2399_v38 = vadd.f32 %v2398_v53, %v8369_v51 }
 0x27d   : > { %v6830_v25 = vpack.c.bf16 %v2481_v17, %v2480_v22 }
 0x27e   : > { %v2488_v57 = vsel %vm2472_vm4, %v2456_v26, 0.0  ;;  %v2457_v39 = vmax.f32 %v2399_v38, 0.0  ;;  %vm438_vm4 = vmand %vm422_vm6, %vm430_vm9  ;;  %vm6013_vm6 = vcmask 392192   ;;  %vm11290_vm9 = vcmask 1043456  }
 0x27f   : > { %2542 = vst [vmem:[#allocation3 + $0x14] sm:$0xff] %v6830_v25  ;;  %2896 = vrot.lane.b32.xlu0 %v8384_v30, %s11224_s30  ;;  %3980 = vrot.lane.b32.xlu1 %v8402_v0, %s11237_s19  ;;  %vm11291_vm3 = vmmov %vm11290_vm9 }
 0x280   : > { %v2489_v9 = vsel %vm2473_vm1, %v2457_v39, 0.0  ;;  %vm446_vm1 = vcmp.ge.f32.partialorder %v366_v6, 1.0  ;;  %vm11295_vm10 = vmmov %vm11291_vm3 }
 0x281   : > { %v6834_v52 = vpack.c.bf16 %v2489_v9, %v2488_v57  ;;  %vm454_vm12 = vmand %vm438_vm4, %vm446_vm1 }
 0x282   : > { %vm470_vm0 = vmand %vm454_vm12, %vm462_vm13 }
 0x283   : > { %2546 = vst [vmem:[#allocation3 + $0x3c] sm:$0xff] %v6834_v52  ;;  %4060 = vrot.lane.b32.xlu0 %v8376_v31, %s11238_s29  ;;  %3896 = vrot.lane.b32.xlu1 %v8376_v31, %s11240_s25  ;;  %v2466_v47 = vsel %vm470_vm0, 1, %v11284_v27  ;;  %vm11293_vm4 = vmmov %vm11291_vm3 }
 0x284   : > { %vm2474_vm7 = vcmp.eq.s32.totalorder %v2466_v47, 1  ;;  %vm11294_vm1 = vmmov %vm11292_vm5 }
 0x285   : > { %vm11297_vm12 = vmmov %vm11291_vm3 }
 0x286   : > { %v8640_v59 = vld [vmem:[#allocation3 + $0x10] sm:$0xff]  ;;  %vm11298_vm13 = vmmov %vm11296_vm11 }
 0x287   : > { %2814 = vrot.lane.b32.xlu0 %v8384_v30, %s11227_s15  ;;  %3814 = vrot.lane.b32.xlu1 %v8376_v31, %s11239_s21  ;;  %vm11299_vm14 = vmmov %vm11291_vm3 }
 0x288   : > { %vm11301_vm0 = vmmov %vm11291_vm3 }
 0x28b   : > { %3978 = vrot.lane.b32.xlu0 %v8376_v31, %s11237_s19  ;;  %4634 = vrot.lane.b32.xlu1 %v8376_v31, %s11230_s9 }
 0x28f   : > { %2734 = vrot.lane.b32.xlu0 %v8412_v32, %s11226_s23  ;;  %3732 = vrot.lane.b32.xlu1 %v8376_v31, %s11242_s5 }
 0x293   : > { %3898 = vrot.lane.b32.xlu0 %v8402_v0, %s11240_s25  ;;  %2580 = vrot.lane.b32.xlu1 %v8482_v36, %s11228_s26 }
 0x297   : > { %3816 = vrot.lane.b32.xlu0 %v8402_v0, %s11239_s21  ;;  %2662 = vrot.lane.b32.xlu1 %v8482_v36, %s11229_s16 }
 0x29b   : > { %4636 = vrot.lane.b32.xlu0 %v8402_v0, %s11230_s9  ;;  %4400 = vrot.lane.b32.xlu1 %v8409_v54, %s11234_s3 }
 0x29f   : > { %2578 = vrot.lane.b32.xlu0 %v8496_v16, %s11228_s26  ;;  %3154 = vrot.lane.b32.xlu1 %v8482_v36, %s11223_s24 }
 0x2a3   : > { %2660 = vrot.lane.b32.xlu0 %v8496_v16, %s11229_s16  ;;  %4318 = vrot.lane.b32.xlu1 %v8409_v54, %s11233_s0 }
 0x2a7   : > { %4398 = vrot.lane.b32.xlu0 %v8381_v56, %s11234_s3  ;;  %3072 = vrot.lane.b32.xlu1 %v8482_v36, %s11222_s6 }
 0x2a9   : > { %v2435_v40 = vpop.f32.mrf.mxu1 }
 0x2aa   : > { %v2436_v2 = vadd.f32 %v2435_v40, %v8364_v3 }
 0x2ab   : > { %v2437_v58 = vpop.f32.mrf.mxu1  ;;  %3152 = vrot.lane.b32.xlu0 %v8496_v16, %s11223_s24  ;;  %4236 = vrot.lane.b32.xlu1 %v8409_v54, %s11236_s20 }
 0x2ac   : > { %v2450_v20 = vmax.f32 %v2436_v2, 0.0  ;;  %v2438_v10 = vadd.f32 %v2437_v58, %v8364_v3  ;;  %v8689_v2 = vld [vmem:[#allocation3 + $0x38] sm:$0xff] }
 0x2ad   : > { %v2439_v29 = vpop.f32.mrf.mxu1 }
 0x2ae   : > { %v2451_v24 = vmax.f32 %v2438_v10, 0.0  ;;  %v2440_v34 = vadd.f32 %v2439_v29, %v8369_v51  ;;  %v2482_v27 = vsel %vm2474_vm7, %v2450_v20, 0.0  ;;  %v8705_v29 = vld [vmem:[#allocation8 + $0x8] sm:$0xff] }
 0x2af   : > { %v2441_v48 = vpop.f32.mrf.mxu1  ;;  %4316 = vrot.lane.b32.xlu0 %v8381_v56, %s11233_s0  ;;  %2990 = vrot.lane.b32.xlu1 %v8482_v36, %s11225_s14 }
 0x2b0   : > { %v2483_v60 = vsel %vm2475_vm8, %v2451_v24, 0.0  ;;  %v2458_v49 = vmax.f32 %v2440_v34, 0.0  ;;  %v2442_v3 = vadd.f32 %v2441_v48, %v8369_v51  ;;  %v8713_v24 = vcombine.high %v8705_v29, %v8705_v29 }
 0x2b1   : > { %v6831_v55 = vpack.c.bf16 %v2483_v60, %v2482_v27  ;;  %v8536_v51 = vpop.permute.xlu1 %2568 }
 0x2b2   : > { %v2459_v11 = vmax.f32 %v2442_v3, 0.0  ;;  %v2490_v4 = vsel %vm2474_vm7, %v2458_v49, 0.0  ;;  %11288 = vst [vmem:[#allocation28_spill] sm:$0xff] %v8713_v24  ;;  %6818 = vmatprep.mubr.msk.bf16.mxu1 %vm6013_vm6, %v8713_v24  ;;  %vm11304_vm7 = vmmov %vm11301_vm0 }
 0x2b3   : > { %2543 = vst [vmem:[#allocation3 + $0x1c] sm:$0xff] %v6831_v55  ;;  %3070 = vrot.lane.b32.xlu0 %v8496_v16, %s11222_s6  ;;  %4154 = vrot.lane.b32.xlu1 %v8409_v54, %s11235_s12 }
 0x2b4   : > { %v2491_v45 = vsel %vm2475_vm8, %v2459_v11, 0.0  ;;  %vm11305_vm8 = vcmask 744448  }
 0x2b5   : > { %v6835_v62 = vpack.c.bf16 %v2491_v45, %v2490_v4  ;;  %v8542_v44 = vpop.permute.xlu1 %2650 }
 0x2b7   : > { %2547 = vst [vmem:[#allocation3 + $0x44] sm:$0xff] %v6835_v62  ;;  %4234 = vrot.lane.b32.xlu0 %v8381_v56, %s11236_s20  ;;  %2908 = vrot.lane.b32.xlu1 %v8482_v36, %s11224_s30 }
 0x2b9   : > { %v8552_v1 = vpop.permute.xlu1 %2732 }
 0x2ba   : > { %v2552_v46 = vld [vmem:[#allocation3 + $0x20] sm:$0xf]  ;;  %v8672_v42 = vld [vmem:[#allocation3 + $0x18] sm:$0xff] }
 0x2bb   : > { %2988 = vrot.lane.b32.xlu0 %v8496_v16, %s11225_s14  ;;  %4072 = vrot.lane.b32.xlu1 %v8409_v54, %s11238_s29  ;;  %v2634_v7 = vld [vmem:[#allocation3 + $0x20] sm:$0xf]  ;;  %11286 = vst [vmem:[#allocation26_spill] sm:$0xff] %v8672_v42 }
 0x2be   : > { %v2556_v21 = vld [vmem:[#allocation3 + $0x40] sm:$0xff]  ;;  %v2557_v58 = vld [vmem:[#allocation3 + $0x48] sm:$0xf] }
 0x2bf   : > { %4152 = vrot.lane.b32.xlu0 %v8381_v56, %s11235_s12  ;;  %2826 = vrot.lane.b32.xlu1 %v8482_v36, %s11227_s15  ;;  %v2639_v60 = vld [vmem:[#allocation3 + $0x48] sm:$0xf] }
 0x2c3   : > { %2906 = vrot.lane.b32.xlu0 %v8496_v16, %s11224_s30  ;;  %3990 = vrot.lane.b32.xlu1 %v8409_v54, %s11237_s19 }
 0x2c5   : > { %v8558_v63 = vpop.permute.xlu1 %4390 }
 0x2c6   : > { %11285 = vst [vmem:[#allocation25_spill] sm:$0xff] %v8558_v63  ;;  %v10977_v49 = vrot.slane %v8558_v63, 4 }
 0x2c7   : > { %4070 = vrot.lane.b32.xlu0 %v8381_v56, %s11238_s29  ;;  %2742 = vrot.lane.b32.xlu1 %v8496_v16, %s11226_s23 }
 0x2cb   : > { %2824 = vrot.lane.b32.xlu0 %v8496_v16, %s11227_s15  ;;  %3906 = vrot.lane.b32.xlu1 %v8381_v56, %s11240_s25 }
 0x2cd   : > { %v8564_v18 = vpop.permute.xlu0 %2570  ;;  %v8566_v50 = vpop.permute.xlu1 %3144 }
 0x2cf   : > { %3988 = vrot.lane.b32.xlu0 %v8381_v56, %s11237_s19  ;;  %3824 = vrot.lane.b32.xlu1 %v8381_v56, %s11239_s21 }
 0x2d1   : > { %v8572_v61 = vpop.permute.xlu0 %2652  ;;  %v8574_v5 = vpop.permute.xlu1 %4308 }
 0x2d3   : > { %2744 = vrot.lane.b32.xlu0 %v8482_v36, %s11226_s23  ;;  %4644 = vrot.lane.b32.xlu1 %v8381_v56, %s11230_s9 }
 0x2d5   : > { %v8580_v53 = vpop.permute.xlu0 %4388  ;;  %v8582_v15 = vpop.permute.xlu1 %3062 }
 0x2d6   : > { %v4408_v27 = vrot.slane %v8580_v53, 4 }
 0x2d7   : > { %3908 = vrot.lane.b32.xlu0 %v8409_v54, %s11240_s25  ;;  %3742 = vrot.lane.b32.xlu1 %v8381_v56, %s11242_s5 }
 0x2d8   : > { %v4418_v4 = vsel %vm11290_vm9, %v4408_v27, %v10977_v49  ;;  %vm11306_vm9 = vmmov %vm11301_vm0 }
 0x2d9   : > { %v8588_v22 = vpop.permute.xlu0 %3142  ;;  %v8590_v17 = vpop.permute.xlu1 %4226 }
 0x2da   : > { %v3162_v3 = vrot.slane %v8588_v22, 4 }
 0x2db   : > { %3826 = vrot.lane.b32.xlu0 %v8409_v54, %s11239_s21  ;;  %4552 = vrot.lane.b32.xlu1 %v8376_v31, %s11232_s10 }
 0x2dd   : > { %v8596_v26 = vpop.permute.xlu0 %4306  ;;  %v8598_v38 = vpop.permute.xlu1 %2980 }
 0x2de   : > { %v4326_v27 = vrot.slane %v8596_v26, 4 }
 0x2df   : > { %4646 = vrot.lane.b32.xlu0 %v8409_v54, %s11230_s9  ;;  %4562 = vrot.lane.b32.xlu1 %v8381_v56, %s11232_s10 }
 0x2e1   : > { %v8604_v25 = vpop.permute.xlu0 %3060  ;;  %v8606_v23 = vpop.permute.xlu1 %4144 }
 0x2e3   : > { %3734 = vrot.lane.b32.xlu0 %v8402_v0, %s11242_s5  ;;  %3650 = vrot.lane.b32.xlu1 %v8376_v31, %s11241_s18 }
 0x2e5   : > { %v8612_v57 = vpop.permute.xlu0 %4224  ;;  %v8614_v39 = vpop.permute.xlu1 %2898 }
 0x2e7   : > { %3744 = vrot.lane.b32.xlu0 %v8409_v54, %s11242_s5  ;;  %3660 = vrot.lane.b32.xlu1 %v8381_v56, %s11241_s18 }
 0x2e9   : > { %v8620_v9 = vpop.permute.xlu0 %2978  ;;  %v8622_v41 = vpop.permute.xlu1 %4062 }
 0x2eb   : > { %4554 = vrot.lane.b32.xlu0 %v8402_v0, %s11232_s10  ;;  %4470 = vrot.lane.b32.xlu1 %v8376_v31, %s11231_s11 }
 0x2ed   : > { %v8628_v52 = vpop.permute.xlu0 %4142  ;;  %v8630_v12 = vpop.permute.xlu1 %2816 }
 0x2ef   : > { %4564 = vrot.lane.b32.xlu0 %v8409_v54, %s11232_s10  ;;  %4480 = vrot.lane.b32.xlu1 %v8381_v56, %s11231_s11 }
 0x2f1   : > { %v8636_v43 = vpop.permute.xlu0 %2896  ;;  %v8638_v19 = vpop.permute.xlu1 %3980 }
 0x2f3   : > { %3652 = vrot.lane.b32.xlu0 %v8402_v0, %s11241_s18  ;;  %2572 = vrot.lane.b32.xlu1 %v8640_v59, %s11228_s26 }
 0x2f5   : > { %v8646_v31 = vpop.permute.xlu0 %4060  ;;  %v8648_v8 = vpop.permute.xlu1 %3896 }
 0x2f7   : > { %3662 = vrot.lane.b32.xlu0 %v8409_v54, %s11241_s18  ;;  %2576 = vrot.lane.b32.xlu1 %v2552_v46, %s11228_s26  ;;  %v10986_v46 = vrot.slane %v8566_v50, 4 }
 0x2f9   : > { %v8653_v56 = vpop.permute.xlu0 %2814  ;;  %v8655_v33 = vpop.permute.xlu1 %3814 }
 0x2fb   : > { %4472 = vrot.lane.b32.xlu0 %v8402_v0, %s11231_s11  ;;  %2654 = vrot.lane.b32.xlu1 %v8640_v59, %s11229_s16 }
 0x2fd   : > { %v8661_v37 = vpop.permute.xlu0 %3978  ;;  %v8663_v14 = vpop.permute.xlu1 %4634 }
 0x2ff   : > { %4482 = vrot.lane.b32.xlu0 %v8409_v54, %s11231_s11  ;;  %2658 = vrot.lane.b32.xlu1 %v2634_v7, %s11229_s16 }
 0x301   : > { %v8668_v35 = vpop.permute.xlu0 %2734  ;;  %v8670_v28 = vpop.permute.xlu1 %3732 }
 0x303   : > { %2574 = vrot.lane.b32.xlu0 %v8672_v42, %s11228_s26  ;;  %3146 = vrot.lane.b32.xlu1 %v8640_v59, %s11223_s24 }
 0x305   : > { %v8678_v0 = vpop.permute.xlu0 %3898  ;;  %v8680_v6 = vpop.permute.xlu1 %2580 }
 0x307   : > { %2656 = vrot.lane.b32.xlu0 %v8672_v42, %s11229_s16  ;;  %2584 = vrot.lane.b32.xlu1 %v2556_v21, %s11228_s26 }
 0x309   : > { %v8685_v54 = vpop.permute.xlu0 %3816  ;;  %v8687_v40 = vpop.permute.xlu1 %2662 }
 0x30b   : > { %2582 = vrot.lane.b32.xlu0 %v8689_v2, %s11228_s26  ;;  %2666 = vrot.lane.b32.xlu1 %v2556_v21, %s11229_s16  ;;  %v4419_v21 = vsel %vm11292_vm5, %v8580_v53, %v4418_v4  ;;  %v3080_v4 = vrot.slane %v8604_v25, 4  ;;  %vm11308_vm5 = vmmov %vm11301_vm0 }
 0x30d   : > { %v8694_v47 = vpop.permute.xlu0 %4636  ;;  %v8696_v13 = vpop.permute.xlu1 %4400 }
 0x30e   : > { %11287 = vst [vmem:[#allocation27_spill] sm:$0xff] %v8696_v13  ;;  %v10985_v45 = vrot.slane %v8696_v13, 4 }
 0x30f   : > { %2586 = vrot.lane.b32.xlu0 %v2557_v58, %s11228_s26  ;;  %3552 = vrot.lane.b32.xlu1 %v8384_v30, %s11243_s13  ;;  %v3172_v58 = vsel %vm11293_vm4, %v3162_v3, %v10986_v46  ;;  %vm11309_vm4 = vcmask 236544  }
 0x310   : > { %v3173_v3 = vsel %vm11296_vm11, %v8588_v22, %v3172_v58  ;;  %v4244_v58 = vrot.slane %v8612_v57, 4  ;;  %vm11312_vm11 = vmmov %vm11301_vm0 }
 0x311   : > { %v8701_v20 = vpop.permute.xlu0 %2578  ;;  %v8703_v10 = vpop.permute.xlu1 %3154 }
 0x313   : > { %2664 = vrot.lane.b32.xlu0 %v8689_v2, %s11229_s16  ;;  %3562 = vrot.lane.b32.xlu1 %v8496_v16, %s11243_s13 }
 0x315   : > { %v8715_v34 = vpop.permute.xlu0 %2660  ;;  %v8717_v48 = vpop.permute.xlu1 %4318 }
 0x316   : > { %11289 = vst [vmem:[#allocation29_spill] sm:$0xff] %v8717_v48 }
 0x317   : > { %2668 = vrot.lane.b32.xlu0 %v2639_v60, %s11229_s16  ;;  %3064 = vrot.lane.b32.xlu1 %v8640_v59, %s11222_s6 }
 0x319   : > { %v4399_v55 = vpop.permute.xlu0 %4398  ;;  %v8727_v11 = vpop.permute.xlu1 %3072 }
 0x31a   : > { %v4413_v62 = vrot.slane %v4399_v55, 4 }
 0x31b   : > { %3156 = vrot.lane.b32.xlu0 %v8689_v2, %s11223_s24  ;;  %3470 = vrot.lane.b32.xlu1 %v8384_v30, %s11219_s17  ;;  %v10987_v30 = vrot.slane %v8703_v10, 4 }
 0x31c   : > { %v4426_v7 = vsel %vm11291_vm3, %v4413_v62, %v10985_v45  ;;  %v10988_v62 = vrot.slane %v8574_v5, 4  ;;  %v10989_v45 = vrot.slane %v8717_v48, 4  ;;  %vm11307_vm3 = vmmov %vm11305_vm8 }
 0x31d   : > { %v4427_v60 = vsel %vm11294_vm1, %v4399_v55, %v4426_v7  ;;  %v3153_v49 = vpop.permute.xlu0 %3152  ;;  %v8748_v24 = vpop.permute.xlu1 %4236  ;;  %vm11310_vm1 = vmmov %vm11301_vm0 }
 0x31e   : > { %v6786_v63 = vcombine.low %v4419_v21, %v4427_v60  ;;  %v3167_v13 = vrot.slane %v3153_v49, 4  ;;  %v6787_v42 = vcombine.high %v4419_v21, %v4427_v60  ;;  %v4336_v55 = vsel %vm11297_vm12, %v4326_v27, %v10988_v62 }
 0x31f   : > { %3554 = vrot.lane.b32.xlu0 %v8412_v32, %s11243_s13  ;;  %3480 = vrot.lane.b32.xlu1 %v8496_v16, %s11219_s17  ;;  %vm11313_vm12 = vcmask 809984  }
 0x320   : > { %v3180_v53 = vsel %vm11295_vm10, %v3167_v13, %v10987_v30  ;;  %6058 = vmatprep.subr.bf16.mxu1 %v6787_v42  ;;  %v10990_v30 = vrot.slane %v8582_v15, 4  ;;  %vm11311_vm10 = vmmov %vm11309_vm4 }
 0x321   : > { %v3181_v7 = vsel %vm11298_vm13, %v3153_v49, %v3180_v53  ;;  %v4317_v21 = vpop.permute.xlu0 %4316  ;;  %6059 = vmatpush1.bf16.msra.mxu1 %v6786_v63  ;;  %v8766_v60 = vpop.permute.xlu1 %2990  ;;  %v4337_v63 = vsel %vm11300_vm15, %v8596_v26, %v4336_v55  ;;  %v10995_v26 = vrot.slane %v8590_v17, 4  ;;  %vm11314_vm13 = vmmov %vm11301_vm0 }
 0x322   : > { %v6658_v46 = vcombine.low %v3173_v3, %v3181_v7  ;;  %v4331_v13 = vrot.slane %v4317_v21, 4  ;;  %v6659_v42 = vcombine.high %v3173_v3, %v3181_v7  ;;  %v3090_v49 = vsel %vm11301_vm0, %v3080_v4, %v10990_v30  ;;  %vm11317_vm15 = vmmov %vm11301_vm0 }
 0x323   : > { %3564 = vrot.lane.b32.xlu0 %v8482_v36, %s11243_s13  ;;  %2982 = vrot.lane.b32.xlu1 %v8640_v59, %s11225_s14  ;;  %v10993_v7 = vrot.slane %v8727_v11, 4  ;;  %v3091_v55 = vsel %vm11305_vm8, %v8604_v25, %v3090_v49  ;;  %v4254_v4 = vsel %vm11306_vm9, %v4244_v58, %v10995_v26  ;;  %v10994_v30 = vrot.slane %v8748_v24, 4  ;;  %vm11322_vm8 = vmmov %vm11310_vm1 }
 0x324   : > { %v4344_v22 = vsel %vm11299_vm14, %v4331_v13, %v10989_v45  ;;  %6017 = vmatprep.subr.bf16.mxu0 %v6659_v42  ;;  %v8787_v45 = vld [vmem:[#allocation3] sm:$0xff]  ;;  %v4162_v58 = vrot.slane %v8628_v52, 4  ;;  %vm11315_vm14 = vmmov %vm11313_vm12  ;;  %vm11318_vm0 = vcmask 302080   ;;  %vm11323_vm9 = vcmask 818176  }
 0x325   : > { %v4345_v27 = vsel %vm11302_vm2, %v4317_v21, %v4344_v22  ;;  %v3071_v53 = vpop.permute.xlu0 %3070  ;;  %6018 = vmatpush1.bf16.msra.mxu0 %v6658_v46  ;;  %v8784_v3 = vpop.permute.xlu1 %4154  ;;  %v2998_v21 = vrot.slane %v8620_v9, 4  ;;  %vm11319_vm2 = vmmov %vm11310_vm1 }
 0x326   : > { %v6778_v62 = vcombine.low %v4337_v63, %v4345_v27  ;;  %v3085_v13 = vrot.slane %v3071_v53, 4  ;;  %v6779_v42 = vcombine.high %v4337_v63, %v4345_v27 }
 0x327   : > { %3074 = vrot.lane.b32.xlu0 %v8689_v2, %s11222_s6  ;;  %3388 = vrot.lane.b32.xlu1 %v8787_v45, %s11303_s8 }
 0x328   : > { %v3098_v46 = vsel %vm11304_vm7, %v3085_v13, %v10993_v7  ;;  %6060 = vmatprep.subr.bf16.mxu1 %v6779_v42  ;;  %v11000_v7 = vrot.slane %v8598_v38, 4  ;;  %vm11320_vm7 = vmmov %vm11318_vm0 }
 0x329   : > { %v3099_v22 = vsel %vm11307_vm3, %v3071_v53, %v3098_v46  ;;  %v4235_v63 = vpop.permute.xlu0 %4234  ;;  %6061 = vmatpush1.bf16.msra.mxu1 %v6778_v62  ;;  %v8804_v27 = vpop.permute.xlu1 %2908  ;;  %v4255_v62 = vsel %vm11309_vm4, %v8612_v57, %v4254_v4  ;;  %vm11324_vm3 = vmmov %vm11310_vm1 }
 0x32a   : > { %v6650_v48 = vcombine.low %v3091_v55, %v3099_v22  ;;  %v4249_v13 = vrot.slane %v4235_v63, 4  ;;  %v6651_v42 = vcombine.high %v3091_v55, %v3099_v22  ;;  %v3008_v49 = vsel %vm11310_vm1, %v2998_v21, %v11000_v7  ;;  %vm11326_vm4 = vmmov %vm11310_vm1 }
 0x32b   : > { %3472 = vrot.lane.b32.xlu0 %v8412_v32, %s11219_s17  ;;  %3398 = vrot.lane.b32.xlu1 %v8496_v16, %s11303_s8  ;;  %v10996_v55 = vrot.slane %v8766_v60, 4  ;;  %v2916_v21 = vrot.slane %v8636_v43, 4  ;;  %vm11327_vm1 = vcmask 310272  }
 0x32c   : > { %v4262_v25 = vsel %vm11308_vm5, %v4249_v13, %v10994_v30  ;;  %6019 = vmatprep.subr.bf16.mxu0 %v6651_v42  ;;  %v10997_v30 = vrot.slane %v8606_v23, 4  ;;  %vm11325_vm5 = vmmov %vm11323_vm9 }
 0x32d   : > { %v4263_v53 = vsel %vm11311_vm10, %v4235_v63, %v4262_v25  ;;  %v2989_v32 = vpop.permute.xlu0 %2988  ;;  %6020 = vmatpush1.bf16.msra.mxu0 %v6650_v48  ;;  %v8822_v46 = vpop.permute.xlu1 %4072  ;;  %v3009_v48 = vsel %vm11313_vm12, %v8620_v9, %v3008_v49  ;;  %vm11328_vm10 = vmmov %vm11319_vm2  ;;  %vm11331_vm12 = vcmask 826368  }
 0x32e   : > { %v6770_v22 = vcombine.low %v4255_v62, %v4263_v53  ;;  %v3003_v13 = vrot.slane %v2989_v32, 4  ;;  %v6771_v42 = vcombine.high %v4255_v62, %v4263_v53  ;;  %v4172_v4 = vsel %vm11314_vm13, %v4162_v58, %v10997_v30  ;;  %vm11332_vm13 = vmmov %vm11319_vm2 }
 0x32f   : > { %3482 = vrot.lane.b32.xlu0 %v8482_v36, %s11219_s17  ;;  %2900 = vrot.lane.b32.xlu1 %v8640_v59, %s11224_s30  ;;  %v10998_v53 = vrot.slane %v8784_v3, 4  ;;  %v4173_v49 = vsel %vm11318_vm0, %v8628_v52, %v4172_v4  ;;  %v11002_v52 = vrot.slane %v8622_v41, 4  ;;  %vm11335_vm0 = vcmask 318464  }
 0x330   : > { %v3016_v57 = vsel %vm11312_vm11, %v3003_v13, %v10996_v55  ;;  %6062 = vmatprep.subr.bf16.mxu1 %v6771_v42  ;;  %v10999_v55 = vrot.slane %v8614_v39, 4  ;;  %vm11329_vm11 = vmmov %vm11327_vm1 }
 0x331   : > { %v3017_v63 = vsel %vm11315_vm14, %v2989_v32, %v3016_v57  ;;  %v4153_v25 = vpop.permute.xlu0 %4152  ;;  %6063 = vmatpush1.bf16.msra.mxu1 %v6770_v22  ;;  %v8840_v62 = vpop.permute.xlu1 %2826  ;;  %v4080_v32 = vrot.slane %v8646_v31, 4  ;;  %vm11333_vm14 = vmmov %vm11319_vm2 }
 0x332   : > { %v6642_v26 = vcombine.low %v3009_v48, %v3017_v63  ;;  %v4167_v13 = vrot.slane %v4153_v25, 4  ;;  %v6643_v42 = vcombine.high %v3009_v48, %v3017_v63  ;;  %v2926_v58 = vsel %vm11319_vm2, %v2916_v21, %v10999_v55 }
 0x333   : > { %2992 = vrot.lane.b32.xlu0 %v8689_v2, %s11225_s14  ;;  %3306 = vrot.lane.b32.xlu1 %v8787_v45, %s11316_s27  ;;  %v11001_v63 = vrot.slane %v8804_v27, 4  ;;  %v2927_v4 = vsel %vm11323_vm9, %v8636_v43, %v2926_v58  ;;  %v4090_v21 = vsel %vm11324_vm3, %v4080_v32, %v11002_v52  ;;  %v11003_v55 = vrot.slane %v8822_v46, 4  ;;  %vm11339_vm9 = vmmov %vm11319_vm2 }
 0x334   : > { %v4180_v9 = vsel %vm11317_vm15, %v4167_v13, %v10998_v53  ;;  %6021 = vmatprep.subr.bf16.mxu0 %v6643_v42  ;;  %v8861_v42 = vld [vmem:[#allocation3 + $0x8] sm:$0xff]  ;;  %v3998_v32 = vrot.slane %v8661_v37, 4  ;;  %vm11334_vm15 = vmmov %vm11331_vm12 }
 0x335   : > { %v4181_v22 = vsel %vm11320_vm7, %v4153_v25, %v4180_v9  ;;  %v2907_v57 = vpop.permute.xlu0 %2906  ;;  %6022 = vmatpush1.bf16.msra.mxu0 %v6642_v26  ;;  %v8858_v48 = vpop.permute.xlu1 %3990  ;;  %v2834_v25 = vrot.slane %v8653_v56, 4  ;;  %vm11336_vm7 = vmmov %vm11319_vm2 }
 0x336   : > { %11321 = vst [vmem:[#allocation30_spill] sm:$0xff] %v8858_v48  ;;  %v6762_v30 = vcombine.low %v4173_v49, %v4181_v22  ;;  %v2921_v13 = vrot.slane %v2907_v57, 4  ;;  %v6763_v53 = vcombine.high %v4173_v49, %v4181_v22  ;;  %vm11341_vm3 = vmmov %vm11319_vm2 }
 0x337   : > { %3390 = vrot.lane.b32.xlu0 %v8861_v42, %s11303_s8  ;;  %3316 = vrot.lane.b32.xlu1 %v8496_v16, %s11316_s27 }
 0x338   : > { %v2934_v26 = vsel %vm11322_vm8, %v2921_v13, %v11001_v63  ;;  %6064 = vmatprep.subr.bf16.mxu1 %v6763_v53  ;;  %v11006_v63 = vrot.slane %v8630_v12, 4  ;;  %vm11337_vm8 = vmmov %vm11335_vm0 }
 0x339   : > { %v2935_v9 = vsel %vm11325_vm5, %v2907_v57, %v2934_v26  ;;  %v4071_v49 = vpop.permute.xlu0 %4070  ;;  %6065 = vmatpush1.bf16.msra.mxu1 %v6762_v30  ;;  %v8878_v22 = vpop.permute.xlu1 %2742  ;;  %v4091_v30 = vsel %vm11327_vm1, %v8646_v31, %v4090_v21  ;;  %vm11342_vm5 = vcmask 891904   ;;  %vm11345_vm1 = vmmov %vm11319_vm2 }
 0x33a   : > { %v6634_v7 = vcombine.low %v2927_v4, %v2935_v9  ;;  %v4085_v13 = vrot.slane %v4071_v49, 4  ;;  %v6635_v53 = vcombine.high %v2927_v4, %v2935_v9  ;;  %v2844_v58 = vsel %vm11328_vm10, %v2834_v25, %v11006_v63  ;;  %vm11346_vm10 = vmmov %vm11345_vm1 }
 0x33b   : > { %3400 = vrot.lane.b32.xlu0 %v8482_v36, %s11303_s8  ;;  %2818 = vrot.lane.b32.xlu1 %v8640_v59, %s11227_s15  ;;  %v11004_v9 = vrot.slane %v8840_v62, 4  ;;  %v2845_v31 = vsel %vm11331_vm12, %v8653_v56, %v2844_v58  ;;  %v11007_v56 = vrot.slane %v8858_v48, 4  ;;  %v2588_v48 = vrot.slane %v8536_v51, 4  ;;  %vm11348_vm12 = vmmov %vm11342_vm5 }
 0x33c   : > { %v4098_v43 = vsel %vm11326_vm4, %v4085_v13, %v11003_v55  ;;  %6023 = vmatprep.subr.bf16.mxu0 %v6635_v53  ;;  %v11005_v55 = vrot.slane %v8638_v19, 4  ;;  %vm11343_vm4 = vmmov %vm11319_vm2 }
 0x33d   : > { %v4099_v57 = vsel %vm11329_vm11, %v4071_v49, %v4098_v43  ;;  %v2825_v26 = vpop.permute.xlu0 %2824  ;;  %6024 = vmatpush1.bf16.msra.mxu0 %v6634_v7  ;;  %v8896_v4 = vpop.permute.xlu1 %3906  ;;  %v2675_v49 = vrot.slane %v8715_v34, 4  ;;  %vm11347_vm11 = vcmask 900096  }
 0x33e   : > { %v6754_v52 = vcombine.low %v4091_v30, %v4099_v57  ;;  %v2839_v13 = vrot.slane %v2825_v26, 4  ;;  %v6755_v53 = vcombine.high %v4091_v30, %v4099_v57  ;;  %v4008_v21 = vsel %vm11333_vm14, %v3998_v32, %v11005_v55  ;;  %vm11350_vm14 = vmmov %vm11345_vm1 }
 0x33f   : > { %2910 = vrot.lane.b32.xlu0 %v8689_v2, %s11224_s30  ;;  %3224 = vrot.lane.b32.xlu1 %v8787_v45, %s11330_s7  ;;  %v11010_v55 = vrot.slane %v8687_v40, 4 }
 0x340   : > { %v2852_v7 = vsel %vm11332_vm13, %v2839_v13, %v11004_v9  ;;  %6066 = vmatprep.subr.bf16.mxu1 %v6755_v53  ;;  %v2670_v53 = vrot.slane %v8542_v44, 4  ;;  %v2752_v9 = vrot.slane %v8552_v1, 4  ;;  %vm11349_vm13 = vmmov %vm11347_vm11 }
 0x341   : > { %v2853_v43 = vsel %vm11334_vm15, %v2825_v26, %v2852_v7  ;;  %v3989_v30 = vpop.permute.xlu0 %3988  ;;  %6067 = vmatpush1.bf16.msra.mxu1 %v6754_v52  ;;  %v8915_v45 = vpop.permute.xlu1 %3824  ;;  %v3916_v52 = vrot.slane %v8648_v8, 4  ;;  %v4009_v26 = vsel %vm11335_vm0, %v8661_v37, %v4008_v21  ;;  %v2688_v63 = vsel %vm11336_vm7, %v2675_v49, %v11010_v55  ;;  %vm11352_vm0 = vmmov %vm11345_vm1 }
 0x342   : > { %v6626_v58 = vcombine.low %v2845_v31, %v2853_v43  ;;  %v4003_v57 = vrot.slane %v3989_v30, 4  ;;  %v6627_v13 = vcombine.high %v2845_v31, %v2853_v43  ;;  %v2593_v43 = vrot.slane %v8701_v20, 4 }
 0x343   : > { %3308 = vrot.lane.b32.xlu0 %v8861_v42, %s11316_s27  ;;  %3234 = vrot.lane.b32.xlu1 %v8496_v16, %s11330_s7  ;;  %v11338_v37 = vrot.slane %v8668_v35, 4  ;;  %v11025_v49 = vrot.slane %v8564_v18, 4  ;;  %vm11351_vm15 = vcmask 957440  }
 0x344   : > { %v4016_v7 = vsel %vm11319_vm2, %v4003_v57, %v11007_v56  ;;  %6025 = vmatprep.subr.bf16.mxu0 %v6627_v13  ;;  %v2757_v57 = vrot.slane %v8878_v22, 4  ;;  %vm11353_vm2 = vcmask 908288   ;;  %vm11354_vm7 = vmmov %vm11351_vm15 }
 0x345   : > { %v4017_v16 = vsel %vm11337_vm8, %v3989_v30, %v4016_v7  ;;  %v8938_v32 = vpop.permute.xlu0 %2744  ;;  %6026 = vmatpush1.bf16.msra.mxu0 %v6626_v58  ;;  %v8940_v25 = vpop.permute.xlu1 %4644  ;;  %v2762_v21 = vsel %vm11339_vm9, %v2752_v9, %v11338_v37  ;;  %v11026_v30 = vrot.slane %v8680_v6, 4  ;;  %v11340_v9 = vrot.slane %v8572_v61, 4  ;;  %vm11355_vm8 = vmmov %vm11352_vm0 }
 0x346   : > { %v6746_v13 = vcombine.low %v4009_v26, %v4017_v16  ;;  %v11011_v56 = vrot.slane %v8938_v32, 4  ;;  %v6747_v31 = vcombine.high %v4009_v26, %v4017_v16  ;;  %v2763_v26 = vsel %vm11342_vm5, %v8552_v1, %v2762_v21  ;;  %vm11356_vm9 = vmmov %vm11353_vm2 }
 0x347   : > { %3318 = vrot.lane.b32.xlu0 %v8482_v36, %s11316_s27  ;;  %2736 = vrot.lane.b32.xlu1 %v8640_v59, %s11226_s23  ;;  %v2680_v58 = vsel %vm11341_vm3, %v2670_v53, %v11340_v9  ;;  %v11344_v16 = vrot.slane %v8678_v0, 4  ;;  %v11018_v36 = vrot.slane %v8685_v54, 4  ;;  %v2606_v55 = vsel %vm11346_vm10, %v2593_v43, %v11026_v30  ;;  %vm11357_vm3 = vmmov %vm11352_vm0 }
 0x348   : > { %6068 = vmatprep.subr.bf16.mxu1 %v6747_v31  ;;  %v2770_v7 = vsel %vm11343_vm4, %v2757_v57, %v11011_v56  ;;  %v2689_v53 = vsel %vm11347_vm11, %v8715_v34, %v2688_v63  ;;  %v3921_v57 = vrot.slane %v8896_v4, 4  ;;  %v8979_v56 = vld [vmem:[#allocation3 + $0x14] sm:$0xff]  ;;  %v3834_v43 = vrot.slane %v8655_v33, 4  ;;  %vm11363_vm10 = vmmov %vm11352_vm0 }
 0x349   : > { %v3926_v37 = vsel %vm11345_vm1, %v3916_v52, %v11344_v16  ;;  %v8971_v31 = vpop.permute.xlu0 %3908  ;;  %6069 = vmatpush1.bf16.msra.mxu1 %v6746_v13  ;;  %v2771_v1 = vsel %vm11348_vm12, %v8878_v22, %v2770_v7  ;;  %v8975_v21 = vpop.permute.xlu1 %3742  ;;  %v2681_v34 = vsel %vm11349_vm13, %v8542_v44, %v2680_v58  ;;  %v2598_v63 = vsel %vm11350_vm14, %v2588_v48, %v11025_v49  ;;  %vm11361_vm1 = vmmov %vm11352_vm0 }
 0x34a   : > { %v11012_v52 = vrot.slane %v8971_v31, 4  ;;  %v6618_v9 = vcombine.low %v2763_v26, %v2771_v1  ;;  %v6619_v16 = vcombine.high %v2763_v26, %v2771_v1  ;;  %v6611_v22 = vcombine.high %v2681_v34, %v2689_v53  ;;  %vm11366_vm13 = vmmov %vm11352_vm0 }
 0x34b   : > { %2828 = vrot.lane.b32.xlu0 %v8689_v2, %s11227_s15  ;;  %4392 = vrot.lane.b32.xlu1 %v8979_v56, %s11234_s3  ;;  %v3927_v13 = vsel %vm11351_vm15, %v8648_v8, %v3926_v37  ;;  %v11015_v44 = vrot.slane %v8694_v47, 4  ;;  %v2607_v58 = vsel %vm11353_vm2, %v8701_v20, %v2606_v55  ;;  %v3844_v8 = vsel %vm11355_vm8, %v3834_v43, %v11018_v36  ;;  %vm11367_vm14 = vmmov %vm11352_vm0 }
 0x34c   : > { %6027 = vmatprep.subr.bf16.mxu0 %v6619_v16  ;;  %v3934_v26 = vsel %vm11352_vm0, %v3921_v57, %v11012_v52  ;;  %v3839_v37 = vrot.slane %v8915_v45, 4  ;;  %v4654_v20 = vrot.slane %v8663_v14, 4  ;;  %v2599_v55 = vsel %vm11356_vm9, %v8536_v51, %v2598_v63  ;;  %vm11372_vm2 = vmmov %vm11361_vm1 }
 0x34d   : > { %v8999_v7 = vpop.permute.xlu0 %3826  ;;  %6028 = vmatpush1.bf16.msra.mxu0 %v6618_v9  ;;  %v3935_v48 = vsel %vm11354_vm7, %v8896_v4, %v3934_v26  ;;  %v9003_v1 = vpop.permute.xlu1 %4552  ;;  %v6610_v9 = vcombine.low %v2681_v34, %v2689_v53  ;;  %v6603_v4 = vcombine.high %v2599_v55, %v2607_v58  ;;  %vm11359_vm5 = vcmask 965632   ;;  %vm11373_vm7 = vmmov %vm11361_vm1 }
 0x34e   : > { %v11017_v57 = vrot.slane %v8999_v7, 4  ;;  %6029 = vmatprep.subr.bf16.mxu0 %v6611_v22  ;;  %v6738_v16 = vcombine.low %v3927_v13, %v3935_v48  ;;  %v6739_v52 = vcombine.high %v3927_v13, %v3935_v48  ;;  %v3845_v51 = vsel %vm11359_vm5, %v8655_v33, %v3844_v8  ;;  %vm11360_vm4 = vmmov %vm11359_vm5  ;;  %v3210_v13 = vld [vmem:[#allocation3 + $0x30] sm:$0xff] }
 0x34f   : > { %3226 = vrot.lane.b32.xlu0 %v8861_v42, %s11330_s7  ;;  %4310 = vrot.lane.b32.xlu1 %v8979_v56, %s11233_s0  ;;  %v4659_v34 = vrot.slane %v8940_v25, 4  ;;  %vm11364_vm11 = vcmask 138240   ;;  %vm11369_vm15 = vcmask 973824   ;;  %vm11374_vm8 = vcmask 146432   ;;  %vm11377_vm5 = vmmov %vm11361_vm1 }
 0x350   : > { %6070 = vmatprep.subr.bf16.mxu1 %v6739_v52  ;;  %v3852_v43 = vsel %vm11357_vm3, %v3839_v37, %v11017_v57  ;;  %v4664_v52 = vsel %vm11361_vm1, %v4654_v20, %v11015_v44  ;;  %v9031_v37 = vld [vmem:[#allocation8] sm:$0xff]  ;;  %vm11365_vm12 = vmmov %vm11364_vm11 }
 0x351   : > { %v9020_v22 = vpop.permute.xlu0 %4646  ;;  %6030 = vmatpush1.bf16.msra.mxu0 %v6610_v9  ;;  %6071 = vmatpush1.bf16.msra.mxu1 %v6738_v16  ;;  %v3853_v53 = vsel %vm11360_vm4, %v8915_v45, %v3852_v43  ;;  %v4563_v42 = vpop.permute.xlu1 %4562  ;;  %v6602_v16 = vcombine.low %v2599_v55, %v2607_v58  ;;  %v9038_v33 = vcombine.high %v9031_v37, %v9031_v37  ;;  %vm11370_vm0 = vmmov %vm11369_vm15  ;;  %vm11379_vm4 = vcmask 1039360  }
 0x352   : > { %11358 = vst [vmem:[#allocation31_spill] sm:$0xff] %v9020_v22  ;;  %v11013_v63 = vrot.slane %v9020_v22, 4  ;;  %6031 = vmatprep.subr.bf16.mxu0 %v6603_v4  ;;  %v6730_v26 = vcombine.low %v3845_v51, %v3853_v53  ;;  %v6731_v48 = vcombine.high %v3845_v51, %v3853_v53  ;;  %v4665_v58 = vsel %vm11364_vm11, %v8663_v14, %v4664_v52  ;;  %vm11375_vm9 = vmmov %vm11374_vm8 }
 0x353   : > { %3236 = vrot.lane.b32.xlu0 %v3210_v13, %s11330_s7  ;;  %4228 = vrot.lane.b32.xlu1 %v8979_v56, %s11236_s20  ;;  %11362 = vst [vmem:[#allocation32_spill] sm:$0xff] %v9038_v33  ;;  %v3752_v51 = vrot.slane %v8670_v28, 4  ;;  %v3757_v53 = vrot.slane %v8975_v21, 4  ;;  %vm11376_vm3 = vmmov %vm11361_vm1 }
 0x354   : > { %6072 = vmatprep.subr.bf16.mxu1 %v6731_v48  ;;  %v4672_v45 = vsel %vm11363_vm10, %v4659_v34, %v11013_v63  ;;  %6049 = vmatprep.mubr.bf16.mxu0 %v9038_v33  ;;  %v9060_v34 = vld [vmem:[#allocation3 + $0x3c] sm:$0xff]  ;;  %vm11380_vm1 = vmmov %vm11379_vm4 }
 0x355   : > { %v9043_v8 = vpop.permute.xlu0 %3734  ;;  %6032 = vmatpush1.bf16.msra.mxu0 %v6602_v16  ;;  %6073 = vmatpush1.bf16.msra.mxu1 %v6730_v26  ;;  %v4673_v20 = vsel %vm11365_vm12, %v8940_v25, %v4672_v45  ;;  %v3651_v55 = vpop.permute.xlu1 %3650  ;;  %vm11382_vm10 = vmmov %vm11372_vm2  ;;  %vm11384_vm12 = vcmask 154624  }
 0x356   : > { %v11022_v9 = vrot.slane %v9043_v8, 4  ;;  %v6810_v4 = vcombine.low %v4665_v58, %v4673_v20  ;;  %v6811_v43 = vcombine.high %v4665_v58, %v4673_v20  ;;  %vm11383_vm11 = vmmov %vm11372_vm2 }
 0x357   : > { %2746 = vrot.lane.b32.xlu0 %v8689_v2, %s11226_s23  ;;  %3736 = vrot.lane.b32.xlu1 %v8979_v56, %s11242_s5 }
 0x358   : > { %6084 = vmatprep.subr.bf16.mxu1 %v6811_v43  ;;  %v3762_v13 = vsel %vm11366_vm13, %v3752_v51, %v11022_v9  ;;  %v4572_v51 = vrot.slane %v9003_v1, 4  ;;  %vm11385_vm13 = vmmov %vm11384_vm12 }
 0x359   : > { %v9056_v14 = vpop.permute.xlu0 %3744  ;;  %6085 = vmatpush2.bf16.msra.mxu1 %v6810_v4  ;;  %v3661_v25 = vpop.permute.xlu1 %3660  ;;  %v3763_v16 = vsel %vm11369_vm15, %v8670_v28, %v3762_v13  ;;  %vm11388_vm15 = vmmov %vm11372_vm2 }
 0x35a   : > { %v11021_v52 = vrot.slane %v9056_v14, 4 }
 0x35b   : > { %4402 = vrot.lane.b32.xlu0 %v9060_v34, %s11234_s3  ;;  %4146 = vrot.lane.b32.xlu1 %v8979_v56, %s11235_s12 }
 0x35c   : > { %v3770_v26 = vsel %vm11367_vm14, %v3757_v53, %v11021_v52  ;;  %vm11387_vm14 = vmmov %vm11372_vm2 }
 0x35d   : > { %v9072_v48 = vpop.permute.xlu0 %4554  ;;  %v3771_v45 = vsel %vm11370_vm0, %v8975_v21, %v3770_v26  ;;  %v9078_v58 = vpop.permute.xlu1 %4470  ;;  %v4577_v21 = vrot.slane %v4563_v42, 4  ;;  %vm11389_vm0 = vcmask 908288  }
 0x35e   : > { %11368 = vst [vmem:[#allocation33_spill] sm:$0xff] %v9072_v48  ;;  %v11014_v20 = vrot.slane %v9072_v48, 4  ;;  %v6722_v4 = vcombine.low %v3763_v16, %v3771_v45  ;;  %v6723_v43 = vcombine.high %v3763_v16, %v3771_v45 }
 0x35f   : > { %4320 = vrot.lane.b32.xlu0 %v9060_v34, %s11233_s0  ;;  %3654 = vrot.lane.b32.xlu1 %v8979_v56, %s11241_s18 }
 0x360   : > { %6033 = vmatprep.subr.bf16.mxu0 %v6723_v43  ;;  %v4582_v26 = vsel %vm11372_vm2, %v4572_v51, %v11014_v20 }
 0x361   : > { %v9086_v53 = vpop.permute.xlu0 %4564  ;;  %6034 = vmatpush2.bf16.msra.mxu0 %v6722_v4  ;;  %v4481_v28 = vpop.permute.xlu1 %4480  ;;  %v4583_v4 = vsel %vm11374_vm8, %v9003_v1, %v4582_v26  ;;  %vm11393_vm8 = vmmov %vm11372_vm2 }
 0x362   : > { %11371 = vst [vmem:[#allocation34_spill] sm:$0xff] %v9086_v53  ;;  %v11016_v13 = vrot.slane %v9086_v53, 4 }
 0x363   : > { %4238 = vrot.lane.b32.xlu0 %v9060_v34, %s11236_s20  ;;  %4064 = vrot.lane.b32.xlu1 %v8979_v56, %s11238_s29 }
 0x364   : > { %v4590_v16 = vsel %vm11373_vm7, %v4577_v21, %v11016_v13  ;;  %v3670_v21 = vrot.slane %v3651_v55, 4  ;;  %vm11391_vm7 = vmmov %vm11389_vm0 }
 0x365   : > { %v9099_v45 = vpop.permute.xlu0 %3652  ;;  %v4591_v43 = vsel %vm11375_vm9, %v4563_v42, %v4590_v16  ;;  %v9104_v63 = vpop.permute.xlu1 %2572  ;;  %v3675_v42 = vrot.slane %v3661_v25, 4  ;;  %vm11394_vm9 = vmmov %vm11389_vm0 }
 0x366   : > { %v11019_v51 = vrot.slane %v9099_v45, 4  ;;  %v6802_v20 = vcombine.low %v4583_v4, %v4591_v43  ;;  %v6803_v44 = vcombine.high %v4583_v4, %v4591_v43 }
 0x367   : > { %3746 = vrot.lane.b32.xlu0 %v9060_v34, %s11242_s5  ;;  %3982 = vrot.lane.b32.xlu1 %v8979_v56, %s11237_s19 }
 0x368   : > { %6086 = vmatprep.subr.bf16.mxu1 %v6803_v44  ;;  %v3680_v16 = vsel %vm11376_vm3, %v3670_v21, %v11019_v51  ;;  %vm11396_vm3 = vmmov %vm11372_vm2 }
 0x369   : > { %v9111_v13 = vpop.permute.xlu0 %3662  ;;  %6087 = vmatpush2.bf16.msra.mxu1 %v6802_v20  ;;  %v9113_v1 = vpop.permute.xlu1 %2576  ;;  %v3681_v4 = vsel %vm11379_vm4, %v3651_v55, %v3680_v16  ;;  %vm11399_vm4 = vmmov %vm11372_vm2 }
 0x36a   : > { %v11020_v26 = vrot.slane %v9111_v13, 4 }
 0x36b   : > { %4156 = vrot.lane.b32.xlu0 %v9060_v34, %s11235_s12  ;;  %3556 = vrot.lane.b32.xlu1 %v8640_v59, %s11243_s13 }
 0x36c   : > { %v3688_v44 = vsel %vm11377_vm5, %v3675_v42, %v11020_v26  ;;  %v4490_v42 = vrot.slane %v9078_v58, 4  ;;  %v6929_v26 = vld [vmem:[#allocation3 + $0x8] ss:$40 sps:$4 sm:$0xff]   ;;  %vm11397_vm5 = vmmov %vm11389_vm0 }
 0x36d   : > { %v9126_v20 = vpop.permute.xlu0 %4472  ;;  %v3689_v43 = vsel %vm11380_vm1, %v3661_v25, %v3688_v44  ;;  %v9130_v57 = vpop.permute.xlu1 %2654  ;;  %v4495_v25 = vrot.slane %v4481_v28, 4  ;;  %vm11400_vm1 = vcmask 900096  }
 0x36e   : > { %11378 = vst [vmem:[#allocation35_spill] sm:$0xff] %v9126_v20  ;;  %v11023_v21 = vrot.slane %v9126_v20, 4  ;;  %v6714_v36 = vcombine.low %v3681_v4, %v3689_v43  ;;  %v6715_v51 = vcombine.high %v3681_v4, %v3689_v43  ;;  %v6927_v4 = vld [vmem:[#allocation3 + $0x4] ss:$40 sps:$4 sm:$0xff]  }
 0x36f   : > { %3664 = vrot.lane.b32.xlu0 %v9060_v34, %s11241_s18  ;;  %3900 = vrot.lane.b32.xlu1 %v8979_v56, %s11240_s25 }
 0x370   : > { %6035 = vmatprep.subr.bf16.mxu0 %v6715_v51  ;;  %v4500_v44 = vsel %vm11382_vm10, %v4490_v42, %v11023_v21  ;;  %vm11402_vm10 = vmmov %vm11400_vm1 }
 0x371   : > { %v9138_v52 = vpop.permute.xlu0 %4482  ;;  %6036 = vmatpush2.bf16.msra.mxu0 %v6714_v36  ;;  %v9140_v55 = vpop.permute.xlu1 %2658 }
 0x372   : > { %11381 = vst [vmem:[#allocation36_spill] sm:$0xff] %v9138_v52  ;;  %v11024_v16 = vrot.slane %v9138_v52, 4  ;;  %6037 = vmatprep.subr.bf16.mxu0 %v6929_v26  ;;  %v4501_v26 = vsel %vm11384_vm12, %v9078_v58, %v4500_v44  ;;  %vm11406_vm12 = vmmov %vm11372_vm2 }
 0x373   : > { %4074 = vrot.lane.b32.xlu0 %v9060_v34, %s11238_s29  ;;  %3474 = vrot.lane.b32.xlu1 %v8640_v59, %s11219_s17 }
 0x374   : > { %v4508_v36 = vsel %vm11383_vm11, %v4495_v25, %v11024_v16  ;;  %v9164_v25 = vcombine.low %v8705_v29, %v8705_v29  ;;  %vm11405_vm11 = vmmov %vm11372_vm2 }
 0x375   : > { %v2575_v51 = vpop.permute.xlu0 %2574  ;;  %6038 = vmatpush2.bf16.msra.mxu0 %v6927_v4  ;;  %v4509_v43 = vsel %vm11385_vm13, %v4481_v28, %v4508_v36  ;;  %v9156_v9 = vpop.permute.xlu1 %3146  ;;  %v11035_v28 = vrot.slane %v9104_v63, 4  ;;  %vm11407_vm13 = vmmov %vm11400_vm1 }
 0x376   : > { %v6794_v42 = vcombine.low %v4501_v26, %v4509_v43  ;;  %v6795_v21 = vcombine.high %v4501_v26, %v4509_v43  ;;  %11386 = vst [vmem:[#allocation37_spill] sm:$0xff] %v9164_v25  ;;  %v2591_v44 = vrot.slane %v2575_v51, 4 }
 0x377   : > { %3992 = vrot.lane.b32.xlu0 %v9060_v34, %s11237_s19  ;;  %3818 = vrot.lane.b32.xlu1 %v8979_v56, %s11239_s21 }
 0x378   : > { %6088 = vmatprep.subr.bf16.mxu1 %v6795_v21  ;;  %v2602_v43 = vsel %vm11387_vm14, %v11035_v28, %v2591_v44  ;;  %vm11409_vm14 = vmmov %vm11400_vm1 }
 0x379   : > { %v2657_v4 = vpop.permute.xlu0 %2656  ;;  %6089 = vmatpush2.bf16.msra.mxu1 %v6794_v42  ;;  %v2585_v58 = vpop.permute.xlu1 %2584  ;;  %v2592_v42 = vrot.slane %v9113_v1, 4  ;;  %v9196_v28 = vsel %vm11391_vm7, %v9104_v63, %v2602_v43  ;;  %v11043_v1 = vrot.slane %v9130_v57, 4 }
 0x37a   : > { %v2596_v26 = vrot.slane %v2585_v58, 4  ;;  %v2673_v49 = vrot.slane %v2657_v4, 4  ;;  %11392 = vst [vmem:[#allocation39_spill] sm:$0xff] %v9196_v28 }
 0x37b   : > { %3566 = vrot.lane.b32.xlu0 %v8689_v2, %s11243_s13  ;;  %3392 = vrot.lane.b32.xlu1 %v8640_v59, %s11303_s8  ;;  %v2604_v52 = vsel %vm11372_vm2, %v2591_v44, %v2592_v42 }
 0x37c   : > { %6091 = vmatmul.mubr.bf16.vlgmr.msra.gmra.mxu1 %v9164_v25  ;;  %v9209_v44 = vsel %vm11394_vm9, %v2575_v51, %v2604_v52  ;;  %v2684_v42 = vsel %vm11396_vm3, %v11043_v1, %v2673_v49  ;;  %v11047_v1 = vrot.slane %v9156_v9, 4  ;;  %vm11422_vm3 = vcmask 7168  }
 0x37d   : > { %v9172_v36 = vpop.permute.xlu0 %2582  ;;  %v2667_v21 = vpop.permute.xlu1 %2666  ;;  %6131 = vmatprep.mubr.bf16.mxu1 %v9038_v33  ;;  %11395 = vst [vmem:[#allocation40_spill] sm:$0xff] %v9209_v44 }
 0x37e   : > { %v11036_v29 = vrot.slane %v9172_v36, 4  ;;  %v2678_v22 = vrot.slane %v2667_v21, 4 }
 0x37f   : > { %3910 = vrot.lane.b32.xlu0 %v9060_v34, %s11240_s25  ;;  %4638 = vrot.lane.b32.xlu1 %v8979_v56, %s11230_s9 }
 0x380   : > { %v2610_v16 = vsel %vm11388_vm15, %v11036_v29, %v2596_v26  ;;  %vm11412_vm15 = vmmov %vm11372_vm2 }
 0x381   : > { %v2587_v30 = vpop.permute.xlu0 %2586  ;;  %v9187_v33 = vpop.permute.xlu1 %3552  ;;  %v9191_v25 = vsel %vm11389_vm0, %v9172_v36, %v2610_v16  ;;  %vm11414_vm0 = vmmov %vm11372_vm2  ;;  %vm11415_vm2 = vcmask 736256  }
 0x382   : > { %11390 = vst [vmem:[#allocation38_spill] sm:$0xff] %v9191_v25  ;;  %v2597_v20 = vrot.slane %v2587_v30, 4  ;;  %vm11416_vm7 = vmmov %vm11415_vm2 }
 0x383   : > { %3484 = vrot.lane.b32.xlu0 %v8689_v2, %s11219_s17  ;;  %3310 = vrot.lane.b32.xlu1 %v8640_v59, %s11316_s27  ;;  %vm11420_vm9 = vmmov %vm11414_vm0 }
 0x384   : > { %v2612_v30 = vsel %vm11393_vm8, %v2596_v26, %v2597_v20  ;;  %v2674_v20 = vrot.slane %v9140_v55, 4  ;;  %vm11418_vm8 = vmmov %vm11414_vm0 }
 0x385   : > { %v9211_v43 = vpop.permute.xlu0 %2664  ;;  %v3563_v53 = vpop.permute.xlu1 %3562  ;;  %v9217_v48 = vsel %vm11397_vm5, %v2585_v58, %v2612_v30  ;;  %v9234_v58 = vsel %vm11400_vm1, %v9130_v57, %v2684_v42  ;;  %vm11423_vm5 = vmmov %vm11422_vm3 }
 0x386   : > { %11398 = vst [vmem:[#allocation41_spill] sm:$0xff] %v9217_v48  ;;  %v11046_v29 = vrot.slane %v9211_v43, 4  ;;  %11401 = vst [vmem:[#allocation42_spill] sm:$0xff] %v9234_v58  ;;  %v2686_v52 = vsel %vm11405_vm11, %v2673_v49, %v2674_v20  ;;  %v11437_v58 = vrot.slane %v8598_v38, 4 }
 0x387   : > { %3828 = vrot.lane.b32.xlu0 %v9060_v34, %s11239_s21  ;;  %4556 = vrot.lane.b32.xlu1 %v8979_v56, %s11232_s10  ;;  %vm11428_vm1 = vmmov %vm11414_vm0 }
 0x388   : > { %v2692_v51 = vsel %vm11399_vm4, %v11046_v29, %v2678_v22  ;;  %v9254_v29 = vsel %vm11407_vm13, %v2657_v4, %v2686_v52  ;;  %v11413_v4 = vrot.slane %v8703_v10, 4  ;;  %vm11426_vm4 = vmmov %vm11414_vm0 }
 0x389   : > { %v9238_v26 = vsel %vm11402_vm10, %v9211_v43, %v2692_v51  ;;  %v2669_v30 = vpop.permute.xlu0 %2668  ;;  %v9240_v16 = vpop.permute.xlu1 %3064  ;;  %11408 = vst [vmem:[#allocation45_spill] sm:$0xff] %v9254_v29  ;;  %vm11429_vm10 = vcmask 744448   ;;  %vm11433_vm13 = vmmov %vm11414_vm0 }
 0x38a   : > { %11403 = vst [vmem:[#allocation43_spill] sm:$0xff] %v9238_v26  ;;  %11404 = vst [vmem:[#allocation44_spill] sm:$0xff] %v9240_v16  ;;  %v2679_v48 = vrot.slane %v2669_v30, 4  ;;  %v11424_v28 = vrot.slane %v9240_v16, 4 }
 0x38b   : > { %3402 = vrot.lane.b32.xlu0 %v8689_v2, %s11303_s8  ;;  %3228 = vrot.lane.b32.xlu1 %v8640_v59, %s11330_s7  ;;  %v11411_v59 = vrot.slane %v8566_v50, 4  ;;  %vm11430_vm11 = vmmov %vm11429_vm10 }
 0x38c   : > { %v2694_v51 = vsel %vm11406_vm12, %v2678_v22, %v2679_v48  ;;  %vm11432_vm12 = vmmov %vm11414_vm0 }
 0x38d   : > { %v9256_v49 = vpop.permute.xlu0 %3156  ;;  %v9258_v20 = vpop.permute.xlu1 %3470  ;;  %v9261_v30 = vsel %vm11409_vm14, %v2667_v21, %v2694_v51  ;;  %v3174_v42 = vsel %vm11412_vm15, %v11411_v59, %v11047_v1  ;;  %vm11435_vm14 = vcmask 72704  }
 0x38e   : > { %11410 = vst [vmem:[#allocation46_spill] sm:$0xff] %v9261_v30  ;;  %v11050_v55 = vrot.slane %v9256_v49, 4  ;;  %v3175_v51 = vsel %vm11415_vm2, %v8566_v50, %v3174_v42  ;;  %v3577_v42 = vrot.slane %v3563_v53, 4  ;;  %vm11436_vm15 = vmmov %vm11435_vm14 }
 0x38f   : > { %4648 = vrot.lane.b32.xlu0 %v9060_v34, %s11230_s9  ;;  %4474 = vrot.lane.b32.xlu1 %v8979_v56, %s11231_s11  ;;  %v9289_v56 = vld [vmem:[#allocation3 + $0x1c] sm:$0xff]  ;;  %vm11439_vm2 = vmmov %vm11414_vm0 }
 0x390   : > { %v3182_v21 = vsel %vm11414_vm0, %v11413_v4, %v11050_v55  ;;  %v3572_v4 = vrot.slane %v9187_v33, 4  ;;  %v11419_v55 = vld [vmem:[#allocation26_spill] sm:$0xff] }
 0x391   : > { %v9282_v52 = vpop.permute.xlu0 %3554  ;;  %v3183_v59 = vsel %vm11416_vm7, %v8703_v10, %v3182_v21  ;;  %v3481_v22 = vpop.permute.xlu1 %3480  ;;  %vm11440_vm7 = vcmask 809984  }
 0x392   : > { %v11055_v48 = vrot.slane %v9282_v52, 4  ;;  %v6660_v1 = vcombine.low %v3175_v51, %v3183_v59  ;;  %v6661_v44 = vcombine.high %v3175_v51, %v3183_v59 }
 0x393   : > { %3320 = vrot.lane.b32.xlu0 %v8689_v2, %s11316_s27  ;;  %4394 = vrot.lane.b32.xlu1 %v9289_v56, %s11234_s3 }
 0x394   : > { %6099 = vmatprep.subr.bf16.mxu1 %v6661_v44  ;;  %v3582_v59 = vsel %vm11418_vm8, %v3572_v4, %v11055_v48  ;;  %vm11441_vm8 = vmmov %vm11440_vm7 }
 0x395   : > { %v9296_v50 = vpop.permute.xlu0 %3564  ;;  %6100 = vmatpush1.bf16.msra.mxu1 %v6660_v1  ;;  %v9298_v10 = vpop.permute.xlu1 %2982  ;;  %v3583_v21 = vsel %vm11422_vm3, %v9187_v33, %v3582_v59  ;;  %v11427_v33 = vrot.slane %v8727_v11, 4  ;;  %vm11444_vm3 = vmmov %vm11414_vm0 }
 0x396   : > { %11417 = vst [vmem:[#allocation47_spill] sm:$0xff] %v9298_v10  ;;  %v11064_v51 = vrot.slane %v9296_v50, 4 }
 0x397   : > { %4566 = vrot.lane.b32.xlu0 %v9060_v34, %s11232_s10  ;;  %3148 = vrot.lane.b32.xlu1 %v11419_v55, %s11223_s24  ;;  %v11425_v55 = vrot.slane %v8582_v15, 4 }
 0x398   : > { %v3590_v1 = vsel %vm11420_vm9, %v3577_v42, %v11064_v51  ;;  %vm11443_vm9 = vmmov %vm11414_vm0 }
 0x399   : > { %v9312_v44 = vpop.permute.xlu0 %3074  ;;  %v3591_v30 = vsel %vm11423_vm5, %v3563_v53, %v3590_v1  ;;  %v9317_v29 = vpop.permute.xlu1 %3388  ;;  %v3092_v26 = vsel %vm11426_vm4, %v11425_v55, %v11424_v28  ;;  %v9341_v1 = vld [vmem:[#allocation3 + $0x18] sm:$0xff]  ;;  %v11070_v55 = vrot.slane %v9298_v10, 4  ;;  %vm11446_vm5 = vcmask 80896  }
 0x39a   : > { %11421 = vst [vmem:[#allocation26_spill] sm:$0xff] %v9312_v44  ;;  %v11062_v4 = vrot.slane %v9312_v44, 4  ;;  %v6698_v48 = vcombine.low %v3583_v21, %v3591_v30  ;;  %v6699_v25 = vcombine.high %v3583_v21, %v3591_v30  ;;  %v3093_v42 = vsel %vm11429_vm10, %v8582_v15, %v3092_v26  ;;  %vm11447_vm4 = vmmov %vm11446_vm5 }
 0x39b   : > { %3238 = vrot.lane.b32.xlu0 %v8689_v2, %s11330_s7  ;;  %4312 = vrot.lane.b32.xlu1 %v9289_v56, %s11233_s0  ;;  %v3495_v26 = vrot.slane %v3481_v22, 4  ;;  %v3010_v44 = vsel %vm11414_vm0, %v11437_v58, %v11070_v55  ;;  %v11449_v10 = vrot.slane %v8614_v39, 4  ;;  %vm11452_vm10 = vmmov %vm11414_vm0 }
 0x39c   : > { %6039 = vmatprep.subr.bf16.mxu0 %v6699_v25  ;;  %v3100_v53 = vsel %vm11428_vm1, %v11427_v33, %v11062_v4  ;;  %vm11450_vm1 = vmmov %vm11414_vm0 }
 0x39d   : > { %v9334_v30 = vpop.permute.xlu0 %3472  ;;  %6040 = vmatpush2.bf16.msra.mxu0 %v6698_v48  ;;  %v3101_v28 = vsel %vm11430_vm11, %v8727_v11, %v3100_v53  ;;  %v3399_v2 = vpop.permute.xlu1 %3398  ;;  %v3490_v48 = vrot.slane %v9258_v20, 4  ;;  %v9354_v53 = vld [vmem:[#allocation3 + $0x44] sm:$0xff]  ;;  %vm11453_vm11 = vcmask 818176  }
 0x39e   : > { %v11063_v21 = vrot.slane %v9334_v30, 4  ;;  %v6652_v59 = vcombine.low %v3093_v42, %v3101_v28  ;;  %v6653_v25 = vcombine.high %v3093_v42, %v3101_v28 }
 0x39f   : > { %4484 = vrot.lane.b32.xlu0 %v9060_v34, %s11231_s11  ;;  %3066 = vrot.lane.b32.xlu1 %v9341_v1, %s11222_s6 }
 0x3a0   : > { %6101 = vmatprep.subr.bf16.mxu1 %v6653_v25  ;;  %v3500_v34 = vsel %vm11432_vm12, %v3490_v48, %v11063_v21  ;;  %vm11454_vm12 = vmmov %vm11453_vm11 }
 0x3a1   : > { %v9348_v15 = vpop.permute.xlu0 %3482  ;;  %6102 = vmatpush1.bf16.msra.mxu1 %v6652_v59  ;;  %v9350_v11 = vpop.permute.xlu1 %2900  ;;  %v3501_v59 = vsel %vm11435_vm14, %v9258_v20, %v3500_v34  ;;  %v11438_v20 = vrot.slane %v8766_v60, 4  ;;  %vm11456_vm14 = vmmov %vm11414_vm0 }
 0x3a2   : > { %11431 = vst [vmem:[#allocation48_spill] sm:$0xff] %v9350_v11  ;;  %v11071_v33 = vrot.slane %v9348_v15, 4 }
 0x3a3   : > { %4404 = vrot.lane.b32.xlu0 %v9354_v53, %s11234_s3  ;;  %4230 = vrot.lane.b32.xlu1 %v9289_v56, %s11236_s20 }
 0x3a4   : > { %v3508_v42 = vsel %vm11433_vm13, %v3495_v26, %v11071_v33  ;;  %v6944_v26 = vld [vmem:[#allocation3 + $0x40] sm:$0xff]  ;;  %vm11455_vm13 = vmmov %vm11414_vm0 }
 0x3a5   : > { %v9366_v28 = vpop.permute.xlu0 %2992  ;;  %v3509_v25 = vsel %vm11436_vm15, %v3481_v22, %v3508_v42  ;;  %v9371_v4 = vpop.permute.xlu1 %3306  ;;  %v3011_v42 = vsel %vm11440_vm7, %v8598_v38, %v3010_v44  ;;  %vm11458_vm15 = vcmask 89088   ;;  %vm11463_vm7 = vmmov %vm11450_vm1 }
 0x3a6   : > { %11434 = vst [vmem:[#allocation49_spill] sm:$0xff] %v9366_v28  ;;  %v11069_v48 = vrot.slane %v9366_v28, 4  ;;  %v6690_v21 = vcombine.low %v3501_v59, %v3509_v25  ;;  %v6691_v51 = vcombine.high %v3501_v59, %v3509_v25  ;;  %v11448_v28 = vrot.slane %v9350_v11, 4  ;;  %vm11459_vm0 = vmmov %vm11458_vm15 }
 0x3a7   : > { %3158 = vrot.lane.b32.xlu0 %v6944_v26, %s11223_s24  ;;  %2984 = vrot.lane.b32.xlu1 %v9341_v1, %s11225_s14 }
 0x3a8   : > { %6041 = vmatprep.subr.bf16.mxu0 %v6691_v51  ;;  %v3018_v22 = vsel %vm11439_vm2, %v11438_v20, %v11069_v48  ;;  %v3408_v20 = vrot.slane %v9317_v29, 4  ;;  %v2928_v16 = vsel %vm11450_vm1, %v11449_v10, %v11448_v28  ;;  %vm11461_vm2 = vmmov %vm11450_vm1 }
 0x3a9   : > { %v9387_v34 = vpop.permute.xlu0 %3390  ;;  %6042 = vmatpush2.bf16.msra.mxu0 %v6690_v21  ;;  %v3019_v58 = vsel %vm11441_vm8, %v8766_v60, %v3018_v22  ;;  %v3317_v59 = vpop.permute.xlu1 %3316  ;;  %v3413_v60 = vrot.slane %v3399_v2, 4  ;;  %vm11464_vm8 = vcmask 826368  }
 0x3aa   : > { %v11072_v25 = vrot.slane %v9387_v34, 4  ;;  %v6644_v26 = vcombine.low %v3011_v42, %v3019_v58  ;;  %v6645_v51 = vcombine.high %v3011_v42, %v3019_v58  ;;  %v9405_v42 = vld [vmem:[#allocation3 + $0x40] sm:$0xff] }
 0x3ab   : > { %4322 = vrot.lane.b32.xlu0 %v9354_v53, %s11233_s0  ;;  %4148 = vrot.lane.b32.xlu1 %v9289_v56, %s11235_s12 }
 0x3ac   : > { %6103 = vmatprep.subr.bf16.mxu1 %v6645_v51  ;;  %v3418_v58 = vsel %vm11443_vm9, %v3408_v20, %v11072_v25  ;;  %vm11465_vm9 = vmmov %vm11464_vm8 }
 0x3ad   : > { %v9399_v21 = vpop.permute.xlu0 %3400  ;;  %6104 = vmatpush1.bf16.msra.mxu1 %v6644_v26  ;;  %v9401_v38 = vpop.permute.xlu1 %2818  ;;  %v3419_v48 = vsel %vm11446_vm5, %v9317_v29, %v3418_v58  ;;  %v11451_v29 = vrot.slane %v8804_v27, 4  ;;  %vm11467_vm5 = vmmov %vm11450_vm1 }
 0x3ae   : > { %11442 = vst [vmem:[#allocation50_spill] sm:$0xff] %v9401_v38  ;;  %v11081_v22 = vrot.slane %v9399_v21, 4 }
 0x3af   : > { %3076 = vrot.lane.b32.xlu0 %v9405_v42, %s11222_s6  ;;  %2902 = vrot.lane.b32.xlu1 %v9341_v1, %s11224_s30 }
 0x3b0   : > { %v3426_v26 = vsel %vm11444_vm3, %v3413_v60, %v11081_v22  ;;  %vm11466_vm3 = vmmov %vm11450_vm1 }
 0x3b1   : > { %v9417_v51 = vpop.permute.xlu0 %2910  ;;  %v3427_v55 = vsel %vm11447_vm4, %v3399_v2, %v3426_v26  ;;  %v9422_v33 = vpop.permute.xlu1 %3224  ;;  %v3326_v26 = vrot.slane %v9371_v4, 4  ;;  %vm11468_vm4 = vcmask 728064  }
 0x3b2   : > { %11445 = vst [vmem:[#allocation51_spill] sm:$0xff] %v9417_v51  ;;  %v11079_v20 = vrot.slane %v9417_v51, 4  ;;  %v6682_v25 = vcombine.low %v3419_v48, %v3427_v55  ;;  %v6683_v44 = vcombine.high %v3419_v48, %v3427_v55  ;;  %v2929_v48 = vsel %vm11453_vm11, %v8614_v39, %v2928_v16  ;;  %vm11469_vm1 = vmmov %vm11468_vm4 }
 0x3b3   : > { %4240 = vrot.lane.b32.xlu0 %v9354_v53, %s11236_s20  ;;  %4066 = vrot.lane.b32.xlu1 %v9289_v56, %s11238_s29  ;;  %v11087_v16 = vrot.slane %v9401_v38, 4  ;;  %v11460_v51 = vrot.slane %v8630_v12, 4  ;;  %v11474_v38 = vrot.slane %v8668_v35, 4  ;;  %vm11475_vm11 = vmmov %vm11461_vm2 }
 0x3b4   : > { %6043 = vmatprep.subr.bf16.mxu0 %v6683_v44  ;;  %v2936_v2 = vsel %vm11452_vm10, %v11451_v29, %v11079_v20  ;;  %vm11472_vm10 = vmmov %vm11461_vm2 }
 0x3b5   : > { %v9439_v55 = vpop.permute.xlu0 %3308  ;;  %6044 = vmatpush2.bf16.msra.mxu0 %v6682_v25  ;;  %v2937_v10 = vsel %vm11454_vm12, %v8804_v27, %v2936_v2  ;;  %v3235_v28 = vpop.permute.xlu1 %3234  ;;  %v3331_v27 = vrot.slane %v3317_v59, 4  ;;  %v2846_v11 = vsel %vm11461_vm2, %v11460_v51, %v11087_v16  ;;  %vm11477_vm12 = vmmov %vm11461_vm2 }
 0x3b6   : > { %v11080_v60 = vrot.slane %v9439_v55, 4  ;;  %v6636_v58 = vcombine.low %v2929_v48, %v2937_v10  ;;  %v6637_v44 = vcombine.high %v2929_v48, %v2937_v10 }
 0x3b7   : > { %2994 = vrot.lane.b32.xlu0 %v9405_v42, %s11225_s14  ;;  %2820 = vrot.lane.b32.xlu1 %v9341_v1, %s11227_s15 }
 0x3b8   : > { %6105 = vmatprep.subr.bf16.mxu1 %v6637_v44  ;;  %v3336_v2 = vsel %vm11455_vm13, %v3326_v26, %v11080_v60  ;;  %vm11480_vm13 = vmmov %vm11461_vm2 }
 0x3b9   : > { %v9451_v25 = vpop.permute.xlu0 %3318  ;;  %6106 = vmatpush1.bf16.msra.mxu1 %v6636_v58  ;;  %v9453_v39 = vpop.permute.xlu1 %2736  ;;  %v3337_v58 = vsel %vm11458_vm15, %v9371_v4, %v3336_v2  ;;  %v11462_v4 = vrot.slane %v8840_v62, 4  ;;  %v2847_v2 = vsel %vm11464_vm8, %v8630_v12, %v2846_v11  ;;  %vm11484_vm15 = vcmask 891904  }
 0x3ba   : > { %v11089_v29 = vrot.slane %v9451_v25, 4 }
 0x3bb   : > { %4158 = vrot.lane.b32.xlu0 %v9354_v53, %s11235_s12  ;;  %3984 = vrot.lane.b32.xlu1 %v9289_v56, %s11237_s19 }
 0x3bc   : > { %v3344_v48 = vsel %vm11456_vm14, %v3331_v27, %v11089_v29  ;;  %v11471_v29 = vrot.slane %v8687_v40, 4  ;;  %vm11483_vm14 = vmmov %vm11461_vm2  ;;  %vm11486_vm2 = vcmask 900096  }
 0x3bd   : > { %v9467_v10 = vpop.permute.xlu0 %2828  ;;  %v3345_v44 = vsel %vm11459_vm0, %v3317_v59, %v3344_v48  ;;  %v9472_v20 = vpop.permute.xlu1 %4392  ;;  %vm11485_vm0 = vmmov %vm11484_vm15 }
 0x3be   : > { %11457 = vst [vmem:[#allocation52_spill] sm:$0xff] %v9467_v10  ;;  %v11086_v26 = vrot.slane %v9467_v10, 4  ;;  %v6674_v60 = vcombine.low %v3337_v58, %v3345_v44  ;;  %v6675_v22 = vcombine.high %v3337_v58, %v3345_v44  ;;  %vm11491_vm8 = vmmov %vm11486_vm2 }
 0x3bf   : > { %2912 = vrot.lane.b32.xlu0 %v9405_v42, %s11224_s30  ;;  %2738 = vrot.lane.b32.xlu1 %v9341_v1, %s11226_s23 }
 0x3c0   : > { %6045 = vmatprep.subr.bf16.mxu0 %v6675_v22  ;;  %v2854_v59 = vsel %vm11463_vm7, %v11462_v4, %v11086_v26  ;;  %vm11490_vm7 = vmmov %vm11466_vm3 }
 0x3c1   : > { %v9489_v27 = vpop.permute.xlu0 %3226  ;;  %6046 = vmatpush2.bf16.msra.mxu0 %v6674_v60  ;;  %v2855_v51 = vsel %vm11465_vm9, %v8840_v62, %v2854_v59  ;;  %v9495_v48 = vpop.permute.xlu1 %4310  ;;  %v3244_v60 = vrot.slane %v9422_v33, 4  ;;  %v3249_v62 = vrot.slane %v3235_v28, 4  ;;  %vm11494_vm9 = vmmov %vm11466_vm3 }
 0x3c2   : > { %v11088_v58 = vrot.slane %v9489_v27, 4  ;;  %v6628_v22 = vcombine.low %v2847_v2, %v2855_v51  ;;  %v6629_v44 = vcombine.high %v2847_v2, %v2855_v51 }
 0x3c3   : > { %4076 = vrot.lane.b32.xlu0 %v9354_v53, %s11238_s29  ;;  %3902 = vrot.lane.b32.xlu1 %v9289_v56, %s11240_s25 }
 0x3c4   : > { %6107 = vmatprep.subr.bf16.mxu1 %v6629_v44  ;;  %v3254_v2 = vsel %vm11466_vm3, %v3244_v60, %v11088_v58  ;;  %v11470_v58 = vrot.slane %v9211_v43, 4  ;;  %v11476_v43 = vrot.slane %v8938_v32, 4 }
 0x3c5   : > { %v9503_v4 = vpop.permute.xlu0 %3236  ;;  %6108 = vmatpush1.bf16.msra.mxu1 %v6628_v22  ;;  %v9505_v12 = vpop.permute.xlu1 %4228  ;;  %v3255_v26 = vsel %vm11468_vm4, %v9422_v33, %v3254_v2  ;;  %v11473_v22 = vrot.slane %v9453_v39, 4 }
 0x3c6   : > { %v11092_v59 = vrot.slane %v9503_v4, 4  ;;  %v2690_v11 = vsel %vm11472_vm10, %v11471_v29, %v11470_v58  ;;  %v11479_v29 = vrot.slane %v8572_v61, 4  ;;  %v11481_v58 = vrot.slane %v9172_v36, 4  ;;  %vm11502_vm10 = vmmov %vm11466_vm3 }
 0x3c7   : > { %2830 = vrot.lane.b32.xlu0 %v9405_v42, %s11227_s15  ;;  %3820 = vrot.lane.b32.xlu1 %v9289_v56, %s11239_s21  ;;  %v2764_v33 = vsel %vm11475_vm11, %v11474_v38, %v11473_v22  ;;  %v9554_v38 = vcombine.low %v9031_v37, %v9031_v37  ;;  %v2691_v37 = vsel %vm11486_vm2, %v8687_v40, %v2690_v11  ;;  %v11487_v36 = vrot.slane %v9472_v20, 4  ;;  %v11492_v11 = vld [vmem:[#allocation27_spill] sm:$0xff] }
 0x3c8   : > { %v3262_v51 = vsel %vm11467_vm5, %v3249_v62, %v11092_v59  ;;  %vm11497_vm5 = vcmask 220160   ;;  %vm11514_vm2 = vcmask 236544  }
 0x3c9   : > { %v9520_v44 = vpop.permute.xlu0 %2746  ;;  %v3263_v16 = vsel %vm11469_vm1, %v3235_v28, %v3262_v51  ;;  %v9525_v60 = vpop.permute.xlu1 %3736  ;;  %vm11498_vm4 = vmmov %vm11497_vm5  ;;  %vm11499_vm1 = vcmask 908288  }
 0x3ca   : > { %v11095_v10 = vrot.slane %v9520_v44, 4  ;;  %v6666_v62 = vcombine.low %v3255_v26, %v3263_v16  ;;  %v6667_v59 = vcombine.high %v3255_v26, %v3263_v16  ;;  %v11478_v16 = vrot.slane %v9130_v57, 4  ;;  %vm11503_vm11 = vmmov %vm11499_vm1 }
 0x3cb   : > { %3994 = vrot.lane.b32.xlu0 %v9354_v53, %s11237_s19  ;;  %4640 = vrot.lane.b32.xlu1 %v9289_v56, %s11230_s9  ;;  %v2765_v57 = vsel %vm11484_vm15, %v8668_v35, %v2764_v33  ;;  %v11493_v33 = vrot.slane %v11492_v11, 4  ;;  %vm11511_vm15 = vmmov %vm11466_vm3 }
 0x3cc   : > { %6047 = vmatprep.subr.bf16.mxu0 %v6667_v59  ;;  %v2772_v28 = vsel %vm11477_vm12, %v11476_v43, %v11095_v10  ;;  %v2682_v26 = vsel %vm11480_vm13, %v11479_v29, %v11478_v16  ;;  %v11482_v59 = vrot.slane %v8680_v6, 4  ;;  %v11488_v16 = vld [vmem:[#allocation25_spill] sm:$0xff]  ;;  %vm11506_vm12 = vmmov %vm11466_vm3  ;;  %vm11507_vm13 = vcmask 228352  }
 0x3cd   : > { %v9561_v51 = vpop.permute.xlu0 %4402  ;;  %6048 = vmatpush2.bf16.msra.mxu0 %v6666_v62  ;;  %v2773_v22 = vsel %vm11485_vm0, %v8938_v32, %v2772_v28  ;;  %v9567_v43 = vpop.permute.xlu1 %4146  ;;  %v11489_v29 = vrot.slane %v11488_v16, 4  ;;  %v2683_v32 = vsel %vm11491_vm8, %v8572_v61, %v2682_v26  ;;  %vm11513_vm0 = vmmov %vm11466_vm3 }
 0x3ce   : > { %v2608_v2 = vsel %vm11483_vm14, %v11482_v59, %v11481_v58  ;;  %v11129_v59 = vrot.slane %v9495_v48, 4  ;;  %v11096_v62 = vrot.slane %v9561_v51, 4  ;;  %v6620_v10 = vcombine.low %v2765_v57, %v2773_v22  ;;  %vm11508_vm14 = vmmov %vm11507_vm13 }
 0x3cf   : > { %v4420_v58 = vsel %vm11490_vm7, %v11489_v29, %v11487_v36  ;;  %v6621_v35 = vcombine.high %v2765_v57, %v2773_v22  ;;  %2748 = vrot.lane.b32.xlu0 %v9405_v42, %s11226_s23  ;;  %3738 = vrot.lane.b32.xlu1 %v9289_v56, %s11242_s5  ;;  %v6613_v40 = vcombine.high %v2683_v32, %v2691_v37  ;;  %v11495_v57 = vrot.slane %v9104_v63, 4  ;;  %vm11515_vm7 = vmmov %vm11514_vm2 }
 0x3d0   : > { %v4428_v28 = vsel %vm11494_vm9, %v11493_v33, %v11096_v62  ;;  %6050 = vmatmul.mubr.bf16.vlgmr.msra.gmra.mxu0 %v9554_v38  ;;  %v11496_v22 = vrot.slane %v8564_v18, 4  ;;  %v4421_v29 = vsel %vm11497_vm5, %v11488_v16, %v4420_v58  ;;  %v2609_v63 = vsel %vm11499_vm1, %v8680_v6, %v2608_v2  ;;  %v11500_v62 = vld [vmem:[#allocation28_spill] sm:$0xff]  ;;  %vm11517_vm8 = vmmov %vm11513_vm0 }
 0x3d1   : > { %6109 = vmatprep.subr.bf16.mxu1 %v6621_v35  ;;  %v9596_v26 = vpop.permute.xlu0 %4320  ;;  %v4429_v35 = vsel %vm11498_vm4, %v11492_v11, %v4428_v28  ;;  %v9602_v33 = vpop.permute.xlu1 %3654  ;;  %6819 = vmatprep.mubr.msk.bf16.mxu0 %vm6013_vm6, %v11500_v62  ;;  %v6612_v58 = vcombine.low %v2683_v32, %v2691_v37  ;;  %vm11519_vm9 = vmmov %vm11513_vm0 }
 0x3d2   : > { %v2600_v36 = vsel %vm11466_vm3, %v11496_v22, %v11495_v57  ;;  %6110 = vmatpush1.bf16.msra.mxu1 %v6620_v10  ;;  %v11097_v57 = vrot.slane %v9596_v26, 4  ;;  %v6788_v22 = vcombine.low %v4421_v29, %v4429_v35  ;;  %v6789_v61 = vcombine.high %v4421_v29, %v4429_v35  ;;  %vm11523_vm4 = vmmov %vm11513_vm0 }
 0x3d3   : > { %6111 = vmatprep.subr.bf16.mxu1 %v6613_v40  ;;  %v11501_v10 = vrot.slane %v8574_v5, 4  ;;  %3912 = vrot.lane.b32.xlu0 %v9354_v53, %s11240_s25  ;;  %v2601_v6 = vsel %vm11503_vm11, %v8564_v18, %v2600_v36  ;;  %v11504_v40 = vld [vmem:[#allocation29_spill] sm:$0xff]  ;;  %v11509_v36 = vrot.slane %v9505_v12, 4  ;;  %vm11520_vm3 = vcmask 973824   ;;  %vm11525_vm1 = vmmov %vm11513_vm0 }
 0x3d4   : > { %4558 = vrot.lane.b32.xlu1 %v9289_v56, %s11232_s10  ;;  %6140 = vmatprep.subr.bf16.mxu0 %v6789_v61  ;;  %v6605_v2 = vcombine.high %v2601_v6, %v2609_v63  ;;  %v11505_v11 = vrot.slane %v11504_v40, 4  ;;  %v11510_v61 = vrot.slane %v8590_v17, 4  ;;  %vm11521_vm5 = vmmov %vm11520_vm3 }
 0x3d5   : > { %v4338_v16 = vsel %vm11502_vm10, %v11501_v10, %v11129_v59  ;;  %v9625_v29 = vpop.permute.xlu0 %4238  ;;  %6141 = vmatpush1.bf16.msra.mxu0 %v6788_v22  ;;  %v9631_v32 = vpop.permute.xlu1 %4064  ;;  %v11101_v10 = vrot.slane %v9525_v60, 4  ;;  %vm11526_vm10 = vcmask 302080  }
 0x3d6   : > { %v4346_v28 = vsel %vm11506_vm12, %v11505_v11, %v11097_v57  ;;  %6112 = vmatpush1.bf16.msra.mxu1 %v6612_v58  ;;  %v4339_v37 = vsel %vm11507_vm13, %v8574_v5, %v4338_v16  ;;  %v4256_v35 = vsel %vm11511_vm15, %v11510_v61, %v11509_v36  ;;  %v11126_v11 = vrot.slane %v9625_v29, 4  ;;  %vm11527_vm11 = vmmov %vm11526_vm10 }
 0x3d7   : > { %v4347_v18 = vsel %vm11508_vm14, %v11504_v40, %v4346_v28  ;;  %6113 = vmatprep.subr.bf16.mxu1 %v6605_v2  ;;  %v6604_v57 = vcombine.low %v2601_v6, %v2609_v63  ;;  %3830 = vrot.lane.b32.xlu0 %v9354_v53, %s11239_s21  ;;  %v11512_v5 = vrot.slane %v8748_v24, 4  ;;  %v11123_v40 = vrot.slane %v9567_v43, 4  ;;  %vm11529_vm12 = vmmov %vm11513_vm0 }
 0x3d8   : > { %v6780_v22 = vcombine.low %v4339_v37, %v4347_v18  ;;  %v6781_v58 = vcombine.high %v4339_v37, %v4347_v18  ;;  %3656 = vrot.lane.b32.xlu1 %v9289_v56, %s11241_s18  ;;  %v4257_v63 = vsel %vm11514_vm2, %v8590_v17, %v4256_v35  ;;  %v11516_v61 = vrot.slane %v9043_v8, 4  ;;  %vm11531_vm13 = vmmov %vm11513_vm0 }
 0x3d9   : > { %v4264_v16 = vsel %vm11513_vm0, %v11512_v5, %v11126_v11  ;;  %v9650_v28 = vpop.permute.xlu0 %3746  ;;  %v9656_v2 = vpop.permute.xlu1 %3982  ;;  %v11518_v17 = vrot.slane %v9056_v14, 4  ;;  %vm11532_vm14 = vcmask 1039360   ;;  %vm11536_vm2 = vmmov %vm11513_vm0 }
 0x3da   : > { %6142 = vmatprep.subr.bf16.mxu0 %v6781_v58  ;;  %6114 = vmatpush1.bf16.msra.mxu1 %v6604_v57  ;;  %v4265_v6 = vsel %vm11515_vm7, %v8748_v24, %v4264_v16  ;;  %v11098_v37 = vrot.slane %v9650_v28, 4  ;;  %v3764_v58 = vsel %vm11517_vm8, %v11516_v61, %v11101_v10  ;;  %v3126_v61 = vld [vmem:[#allocation3 + $0x20] sm:$0xf]  ;;  %vm11533_vm15 = vmmov %vm11532_vm14  ;;  %vm11537_vm7 = vcmask 310272  }
 0x3db   : > { %6143 = vmatpush1.bf16.msra.mxu0 %v6780_v22  ;;  %v6772_v18 = vcombine.low %v4257_v63, %v4265_v6  ;;  %v6773_v36 = vcombine.high %v4257_v63, %v4265_v6  ;;  %4650 = vrot.lane.b32.xlu0 %v9354_v53, %s11230_s9  ;;  %v3765_v35 = vsel %vm11520_vm3, %v9043_v8, %v3764_v58  ;;  %v11100_v63 = vrot.slane %v9602_v33, 4  ;;  %vm11538_vm8 = vmmov %vm11537_vm7 }
 0x3dc   : > { %4476 = vrot.lane.b32.xlu1 %v9289_v56, %s11231_s11  ;;  %v3772_v24 = vsel %vm11519_vm9, %v11518_v17, %v11098_v37  ;;  %v11522_v56 = vrot.slane %v8606_v23, 4  ;;  %v11524_v8 = vrot.slane %v8784_v3, 4  ;;  %v11102_v58 = vrot.slane %v9631_v32, 4  ;;  %vm11540_vm9 = vmmov %vm11513_vm0 }
 0x3dd   : > { %6144 = vmatprep.subr.bf16.mxu0 %v6773_v36  ;;  %v9673_v57 = vpop.permute.xlu0 %4156  ;;  %v3773_v22 = vsel %vm11521_vm5, %v9056_v14, %v3772_v24  ;;  %v9679_v5 = vpop.permute.xlu1 %3556  ;;  %vm11543_vm3 = vmmov %vm11513_vm0  ;;  %vm11544_vm5 = vcmask 318464  }
 0x3de   : > { %v4174_v16 = vsel %vm11523_vm4, %v11522_v56, %v11123_v40  ;;  %v11120_v6 = vrot.slane %v9673_v57, 4  ;;  %v6724_v36 = vcombine.low %v3765_v35, %v3773_v22  ;;  %vm11545_vm4 = vmmov %vm11544_vm5 }
 0x3df   : > { %6145 = vmatpush1.bf16.msra.mxu0 %v6772_v18  ;;  %v6725_v18 = vcombine.high %v3765_v35, %v3773_v22  ;;  %3748 = vrot.lane.b32.xlu0 %v9354_v53, %s11242_s5  ;;  %v4175_v24 = vsel %vm11526_vm10, %v8606_v23, %v4174_v16  ;;  %v11530_v23 = vrot.slane %v9111_v13, 4  ;;  %vm11549_vm10 = vmmov %vm11513_vm0 }
 0x3e0   : > { %3150 = vrot.lane.b32.xlu1 %v3126_v61, %s11223_s24  ;;  %v4182_v14 = vsel %vm11525_vm1, %v11524_v8, %v11120_v6  ;;  %v11528_v8 = vrot.slane %v9099_v45, 4  ;;  %vm11547_vm1 = vmmov %vm11513_vm0 }
 0x3e1   : > { %6115 = vmatprep.subr.bf16.mxu1 %v6725_v18  ;;  %v9697_v17 = vpop.permute.xlu0 %3664  ;;  %v4183_v35 = vsel %vm11527_vm11, %v8784_v3, %v4182_v14  ;;  %v9703_v22 = vpop.permute.xlu1 %3900  ;;  %vm11550_vm11 = vcmask 7168  }
 0x3e2   : > { %6116 = vmatpush2.bf16.msra.mxu1 %v6724_v36  ;;  %v11099_v56 = vrot.slane %v9697_v17, 4  ;;  %v6764_v18 = vcombine.low %v4175_v24, %v4183_v35  ;;  %v6765_v61 = vcombine.high %v4175_v24, %v4183_v35  ;;  %v3682_v37 = vsel %vm11529_vm12, %v11528_v8, %v11100_v63  ;;  %v3044_v63 = vld [vmem:[#allocation3 + $0x20] sm:$0xf]  ;;  %vm11551_vm12 = vmmov %vm11550_vm11 }
 0x3e3   : > { %4568 = vrot.lane.b32.xlu0 %v9354_v53, %s11232_s10  ;;  %v3683_v36 = vsel %vm11532_vm14, %v9099_v45, %v3682_v37  ;;  %v11534_v35 = vrot.slane %v8622_v41, 4  ;;  %v11105_v8 = vrot.slane %v9656_v2, 4  ;;  %v11535_v45 = vrot.slane %v8822_v46, 4  ;;  %vm11555_vm14 = vmmov %vm11513_vm0 }
 0x3e4   : > { %3558 = vrot.lane.b32.xlu1 %v9341_v1, %s11243_s13  ;;  %6146 = vmatprep.subr.bf16.mxu0 %v6765_v61  ;;  %v3690_v3 = vsel %vm11531_vm13, %v11530_v23, %v11099_v56  ;;  %vm11553_vm13 = vmmov %vm11513_vm0 }
 0x3e5   : > { %v9720_v16 = vpop.permute.xlu0 %4074  ;;  %6147 = vmatpush1.bf16.msra.mxu0 %v6764_v18  ;;  %v3691_v14 = vsel %vm11533_vm15, %v9111_v13, %v3690_v3  ;;  %v9726_v24 = vpop.permute.xlu1 %3474  ;;  %v4092_v61 = vsel %vm11513_vm0, %v11534_v35, %v11102_v58  ;;  %v6936_v13 = vld [vmem:[#allocation3 + $0x10] ss:$40 sps:$4 sm:$0xff]   ;;  %v11107_v3 = vrot.slane %v9679_v5, 4  ;;  %vm11556_vm15 = vcmask 957440  }
 0x3e6   : > { %v11103_v23 = vrot.slane %v9720_v16, 4  ;;  %v6716_v56 = vcombine.low %v3683_v36, %v3691_v14  ;;  %v6717_v18 = vcombine.high %v3683_v36, %v3691_v14  ;;  %v4093_v36 = vsel %vm11537_vm7, %v8622_v41, %v4092_v61  ;;  %v11541_v41 = vld [vmem:[#allocation30_spill] sm:$0xff]  ;;  %vm11557_vm0 = vmmov %vm11556_vm15 }
 0x3e7   : > { %3666 = vrot.lane.b32.xlu0 %v9354_v53, %s11241_s18  ;;  %vm11561_vm7 = vmmov %vm11547_vm1 }
 0x3e8   : > { %3068 = vrot.lane.b32.xlu1 %v3044_v63, %s11222_s6  ;;  %6117 = vmatprep.subr.bf16.mxu1 %v6717_v18  ;;  %v4100_v37 = vsel %vm11536_vm2, %v11535_v45, %v11103_v23  ;;  %v11539_v45 = vrot.slane %v8638_v19, 4  ;;  %vm11559_vm2 = vmmov %vm11547_vm1 }
 0x3e9   : > { %v9744_v35 = vpop.permute.xlu0 %3992  ;;  %6118 = vmatpush2.bf16.msra.mxu1 %v6716_v56  ;;  %v4101_v14 = vsel %vm11538_vm8, %v8822_v46, %v4100_v37  ;;  %v9750_v63 = vpop.permute.xlu1 %3818  ;;  %v6934_v56 = vld [vmem:[#allocation3 + $0xc] ss:$40 sps:$4 sm:$0xff]   ;;  %v11542_v46 = vrot.slane %v11541_v41, 4  ;;  %vm11562_vm8 = vcmask 72704  }
 0x3ea   : > { %v11104_v18 = vrot.slane %v9744_v35, 4  ;;  %6119 = vmatprep.subr.bf16.mxu1 %v6936_v13  ;;  %v6756_v10 = vcombine.low %v4093_v36, %v4101_v14  ;;  %v6757_v58 = vcombine.high %v4093_v36, %v4101_v14  ;;  %v4010_v23 = vsel %vm11540_vm9, %v11539_v45, %v11105_v8  ;;  %v2962_v8 = vld [vmem:[#allocation3 + $0x20] sm:$0xf]  ;;  %vm11563_vm9 = vmmov %vm11562_vm8 }
 0x3eb   : > { %4486 = vrot.lane.b32.xlu0 %v9354_v53, %s11231_s11  ;;  %v4011_v37 = vsel %vm11544_vm5, %v8638_v19, %v4010_v23  ;;  %v11109_v45 = vrot.slane %v9703_v22, 4  ;;  %v11548_v19 = vrot.slane %v9296_v50, 4  ;;  %vm11567_vm5 = vmmov %vm11547_vm1 }
 0x3ec   : > { %3476 = vrot.lane.b32.xlu1 %v9341_v1, %s11219_s17  ;;  %6148 = vmatprep.subr.bf16.mxu0 %v6757_v58  ;;  %v4018_v61 = vsel %vm11543_vm3, %v11542_v46, %v11104_v18  ;;  %v11546_v58 = vrot.slane %v9282_v52, 4  ;;  %vm11565_vm3 = vmmov %vm11547_vm1 }
 0x3ed   : > { %v9767_v13 = vpop.permute.xlu0 %3566  ;;  %6120 = vmatpush2.bf16.msra.mxu1 %v6934_v56  ;;  %6149 = vmatpush1.bf16.msra.mxu0 %v6756_v10  ;;  %v4019_v53 = vsel %vm11545_vm4, %v11541_v41, %v4018_v61  ;;  %v9773_v36 = vpop.permute.xlu1 %3392  ;;  %v3131_v56 = vld [vmem:[#allocation3 + $0x48] sm:$0xf]  ;;  %v11111_v41 = vrot.slane %v9726_v24, 4  ;;  %vm11568_vm4 = vcmask 965632  }
 0x3ee   : > { %v3584_v14 = vsel %vm11547_vm1, %v11546_v58, %v11107_v3  ;;  %v11106_v46 = vrot.slane %v9767_v13, 4  ;;  %v6748_v10 = vcombine.low %v4011_v37, %v4019_v53  ;;  %v6749_v18 = vcombine.high %v4011_v37, %v4019_v53  ;;  %v3049_v3 = vld [vmem:[#allocation3 + $0x48] sm:$0xf]  ;;  %vm11569_vm1 = vmmov %vm11568_vm4 }
 0x3ef   : > { %3160 = vrot.lane.b32.xlu0 %v3131_v56, %s11223_s24  ;;  %v3585_v37 = vsel %vm11550_vm11, %v9282_v52, %v3584_v14  ;;  %v11554_v52 = vrot.slane %v8971_v31, 4  ;;  %vm11573_vm11 = vmmov %vm11559_vm2  ;;  %s11941_s24 = sld [smem:[#allocation56_spill]] }
 0x3f0   : > { %2986 = vrot.lane.b32.xlu1 %v2962_v8, %s11225_s14  ;;  %6150 = vmatprep.subr.bf16.mxu0 %v6749_v18  ;;  %v3592_v23 = vsel %vm11549_vm10, %v11548_v19, %v11106_v46  ;;  %v11552_v19 = vrot.slane %v8678_v0, 4  ;;  %vm11571_vm10 = vmmov %vm11559_vm2 }
 0x3f1   : > { %v9790_v61 = vpop.permute.xlu0 %3910  ;;  %6151 = vmatpush1.bf16.msra.mxu0 %v6748_v10  ;;  %v3593_v53 = vsel %vm11551_vm12, %v9296_v50, %v3592_v23  ;;  %v9796_v58 = vpop.permute.xlu1 %4638  ;;  %vm11574_vm12 = vcmask 80896  }
 0x3f2   : > { %v11108_v8 = vrot.slane %v9790_v61, 4  ;;  %v6700_v18 = vcombine.low %v3585_v37, %v3593_v53  ;;  %v6701_v56 = vcombine.high %v3585_v37, %v3593_v53  ;;  %v3928_v46 = vsel %vm11553_vm13, %v11552_v19, %v11109_v45  ;;  %v2880_v45 = vld [vmem:[#allocation3 + $0x20] sm:$0xf]  ;;  %vm11575_vm13 = vmmov %vm11574_vm12 }
 0x3f3   : > { %3568 = vrot.lane.b32.xlu0 %v9405_v42, %s11243_s13  ;;  %v3929_v10 = vsel %vm11556_vm15, %v8678_v0, %v3928_v46  ;;  %v11558_v53 = vrot.slane %v9334_v30, 4  ;;  %v11113_v19 = vrot.slane %v9750_v63, 4  ;;  %v11560_v0 = vrot.slane %v9348_v15, 4  ;;  %vm11580_vm15 = vmmov %vm11559_vm2 }
 0x3f4   : > { %3394 = vrot.lane.b32.xlu1 %v9341_v1, %s11303_s8  ;;  %6121 = vmatprep.subr.bf16.mxu1 %v6701_v56  ;;  %v3936_v50 = vsel %vm11555_vm14, %v11554_v52, %v11108_v8  ;;  %v11115_v46 = vrot.slane %v9773_v36, 4  ;;  %vm11577_vm14 = vmmov %vm11559_vm2 }
 0x3f5   : > { %v9813_v14 = vpop.permute.xlu0 %3484  ;;  %6122 = vmatpush2.bf16.msra.mxu1 %v6700_v18  ;;  %v3937_v23 = vsel %vm11557_vm0, %v8971_v31, %v3936_v50  ;;  %v9819_v37 = vpop.permute.xlu1 %3310  ;;  %v3502_v56 = vsel %vm11559_vm2, %v11558_v53, %v11111_v41  ;;  %v2967_v41 = vld [vmem:[#allocation3 + $0x48] sm:$0xf]  ;;  %vm11581_vm0 = vcmask 138240  }
 0x3f6   : > { %v11110_v52 = vrot.slane %v9813_v14, 4  ;;  %v6740_v18 = vcombine.low %v3929_v10, %v3937_v23  ;;  %v6741_v8 = vcombine.high %v3929_v10, %v3937_v23  ;;  %v3503_v10 = vsel %vm11562_vm8, %v9334_v30, %v3502_v56  ;;  %vm11582_vm2 = vmmov %vm11581_vm0 }
 0x3f7   : > { %3078 = vrot.lane.b32.xlu0 %v3049_v3, %s11222_s6  ;;  %v11566_v30 = vrot.slane %v8999_v7, 4  ;;  %vm11586_vm8 = vmmov %vm11565_vm3 }
 0x3f8   : > { %2904 = vrot.lane.b32.xlu1 %v2880_v45, %s11224_s30  ;;  %6152 = vmatprep.subr.bf16.mxu0 %v6741_v8  ;;  %v3510_v31 = vsel %vm11561_vm7, %v11560_v0, %v11110_v52  ;;  %v11564_v0 = vrot.slane %v8685_v54, 4  ;;  %vm11584_vm7 = vmmov %vm11565_vm3 }
 0x3f9   : > { %v9836_v50 = vpop.permute.xlu0 %3828  ;;  %6153 = vmatpush1.bf16.msra.mxu0 %v6740_v18  ;;  %v3511_v3 = vsel %vm11563_vm9, %v9348_v15, %v3510_v31  ;;  %v9842_v23 = vpop.permute.xlu1 %4556  ;;  %vm11587_vm9 = vcmask 89088  }
 0x3fa   : > { %v11112_v45 = vrot.slane %v9836_v50, 4  ;;  %v6692_v8 = vcombine.low %v3503_v10, %v3511_v3  ;;  %v6693_v53 = vcombine.high %v3503_v10, %v3511_v3  ;;  %v3846_v52 = vsel %vm11565_vm3, %v11564_v0, %v11113_v19  ;;  %v2798_v19 = vld [vmem:[#allocation3 + $0x20] sm:$0xf]  ;;  %vm11588_vm3 = vmmov %vm11587_vm9 }
 0x3fb   : > { %3486 = vrot.lane.b32.xlu0 %v9405_v42, %s11219_s17  ;;  %v3847_v18 = vsel %vm11568_vm4, %v8685_v54, %v3846_v52  ;;  %v11570_v3 = vrot.slane %v9387_v34, 4  ;;  %v11117_v0 = vrot.slane %v9796_v58, 4  ;;  %v11572_v54 = vrot.slane %v9399_v21, 4  ;;  %vm11593_vm4 = vmmov %vm11567_vm5 }
 0x3fc   : > { %3312 = vrot.lane.b32.xlu1 %v9341_v1, %s11316_s27  ;;  %6123 = vmatprep.subr.bf16.mxu1 %v6693_v53  ;;  %v3854_v15 = vsel %vm11567_vm5, %v11566_v30, %v11112_v45  ;;  %v11118_v52 = vrot.slane %v9819_v37, 4 }
 0x3fd   : > { %v9859_v56 = vpop.permute.xlu0 %3402  ;;  %6124 = vmatpush2.bf16.msra.mxu1 %v6692_v8  ;;  %v3855_v31 = vsel %vm11569_vm1, %v8999_v7, %v3854_v15  ;;  %v9865_v10 = vpop.permute.xlu1 %3228  ;;  %v3420_v53 = vsel %vm11571_vm10, %v11570_v3, %v11115_v46  ;;  %v2885_v46 = vld [vmem:[#allocation3 + $0x48] sm:$0xf]  ;;  %vm11594_vm1 = vcmask 146432  }
 0x3fe   : > { %v11114_v30 = vrot.slane %v9859_v56, 4  ;;  %v6732_v8 = vcombine.low %v3847_v18, %v3855_v31  ;;  %v6733_v45 = vcombine.high %v3847_v18, %v3855_v31  ;;  %v3421_v18 = vsel %vm11574_vm12, %v9387_v34, %v3420_v53  ;;  %v11578_v34 = vld [vmem:[#allocation31_spill] sm:$0xff]  ;;  %vm11595_vm10 = vmmov %vm11594_vm1 }
 0x3ff   : > { %2996 = vrot.lane.b32.xlu0 %v2967_v41, %s11225_s14  ;;  %vm11600_vm12 = vmmov %vm11593_vm4 }
 0x400   : > { %2822 = vrot.lane.b32.xlu1 %v2798_v19, %s11227_s15  ;;  %6154 = vmatprep.subr.bf16.mxu0 %v6733_v45  ;;  %v3428_v7 = vsel %vm11573_vm11, %v11572_v54, %v11114_v30  ;;  %v11576_v54 = vrot.slane %v8694_v47, 4  ;;  %vm11598_vm11 = vmmov %vm11593_vm4 }
 0x401   : > { %v9882_v15 = vpop.permute.xlu0 %4648  ;;  %6155 = vmatpush1.bf16.msra.mxu0 %v6732_v8  ;;  %v3429_v41 = vsel %vm11575_vm13, %v9399_v21, %v3428_v7  ;;  %v9888_v31 = vpop.permute.xlu1 %4474  ;;  %v11579_v21 = vrot.slane %v11578_v34, 4  ;;  %vm11601_vm13 = vcmask 728064  }
 0x402   : > { %v11116_v19 = vrot.slane %v9882_v15, 4  ;;  %v6684_v45 = vcombine.low %v3421_v18, %v3429_v41  ;;  %v6685_v3 = vcombine.high %v3421_v18, %v3429_v41  ;;  %v4666_v30 = vsel %vm11577_vm14, %v11576_v54, %v11117_v0  ;;  %v2716_v0 = vld [vmem:[#allocation3 + $0x20] sm:$0xf]  ;;  %vm11602_vm14 = vmmov %vm11601_vm13 }
 0x403   : > { %3404 = vrot.lane.b32.xlu0 %v9405_v42, %s11303_s8  ;;  %v4667_v7 = vsel %vm11581_vm0, %v8694_v47, %v4666_v30  ;;  %v11122_v54 = vrot.slane %v9842_v23, 4  ;;  %v11585_v47 = vrot.slane %v9451_v25, 4  ;;  %vm11608_vm0 = vmmov %vm11593_vm4 }
 0x404   : > { %3230 = vrot.lane.b32.xlu1 %v9341_v1, %s11330_s7  ;;  %6125 = vmatprep.subr.bf16.mxu1 %v6685_v3  ;;  %v4674_v53 = vsel %vm11580_vm15, %v11579_v21, %v11116_v19  ;;  %v11583_v1 = vrot.slane %v9439_v55, 4  ;;  %vm11605_vm15 = vmmov %vm11593_vm4 }
 0x405   : > { %v9905_v8 = vpop.permute.xlu0 %3320  ;;  %6126 = vmatpush2.bf16.msra.mxu1 %v6684_v45  ;;  %v4675_v18 = vsel %vm11582_vm2, %v11578_v34, %v4674_v53  ;;  %v9911_v41 = vpop.permute.xlu1 %4394  ;;  %v4372_v34 = vld [vmem:[#allocation3 + $0x24] sm:$0xf]  ;;  %v11124_v53 = vrot.slane %v9865_v10, 4  ;;  %vm11610_vm2 = vmmov %vm11608_vm0 }
 0x406   : > { %v3338_v3 = vsel %vm11584_vm7, %v11583_v1, %v11118_v52  ;;  %v11119_v21 = vrot.slane %v9905_v8, 4  ;;  %v6812_v45 = vcombine.low %v4667_v7, %v4675_v18  ;;  %v6813_v19 = vcombine.high %v4667_v7, %v4675_v18 }
 0x407   : > { %2914 = vrot.lane.b32.xlu0 %v2885_v46, %s11224_s30  ;;  %v3339_v7 = vsel %vm11587_vm9, %v9439_v55, %v3338_v3  ;;  %v11591_v55 = vld [vmem:[#allocation34_spill] sm:$0xff]  ;;  %vm11611_vm7 = vcmask 154624   ;;  %vm11615_vm9 = vmmov %vm11608_vm0 }
 0x408   : > { %2740 = vrot.lane.b32.xlu1 %v2716_v0, %s11226_s23  ;;  %6166 = vmatprep.subr.bf16.mxu0 %v6813_v19  ;;  %v3346_v30 = vsel %vm11586_vm8, %v11585_v47, %v11119_v21  ;;  %v11589_v47 = vld [vmem:[#allocation33_spill] sm:$0xff]  ;;  %vm11612_vm8 = vmmov %vm11611_vm7 }
 0x409   : > { %v9928_v1 = vpop.permute.xlu0 %4566  ;;  %6167 = vmatpush2.bf16.msra.mxu0 %v6812_v45  ;;  %v3347_v46 = vsel %vm11588_vm3, %v9451_v25, %v3346_v30  ;;  %v9934_v0 = vpop.permute.xlu1 %3148  ;;  %v11590_v21 = vrot.slane %v11589_v47, 4  ;;  %v11592_v25 = vrot.slane %v11591_v55, 4  ;;  %v4290_v45 = vld [vmem:[#allocation3 + $0x24] sm:$0xf]  ;;  %vm11616_vm3 = vcmask 220160  }
 0x40a   : > { %v11121_v19 = vrot.slane %v9928_v1, 4  ;;  %v6676_v18 = vcombine.low %v3339_v7, %v3347_v46  ;;  %v6677_v52 = vcombine.high %v3339_v7, %v3347_v46 }
 0x40b   : > { %v4584_v6 = vsel %vm11567_vm5, %v11590_v21, %v11122_v54  ;;  %3322 = vrot.lane.b32.xlu0 %v9405_v42, %s11316_s27  ;;  %v2803_v54 = vld [vmem:[#allocation3 + $0x48] sm:$0xf]  ;;  %vm11617_vm5 = vmmov %vm11616_vm3 }
 0x40c   : > { %4396 = vrot.lane.b32.xlu1 %v4372_v34, %s11234_s3  ;;  %6127 = vmatprep.subr.bf16.mxu1 %v6677_v52  ;;  %v4592_v3 = vsel %vm11593_vm4, %v11592_v25, %v11121_v19  ;;  %v4585_v7 = vsel %vm11594_vm1, %v11589_v47, %v4584_v6  ;;  %v11597_v52 = vrot.slane %v9489_v27, 4  ;;  %v11128_v25 = vrot.slane %v9888_v31, 4  ;;  %vm11619_vm4 = vmmov %vm11608_vm0 }
 0x40d   : > { %v9950_v30 = vpop.permute.xlu0 %3238  ;;  %6128 = vmatpush2.bf16.msra.mxu1 %v6676_v18  ;;  %v4593_v21 = vsel %vm11595_vm10, %v11591_v55, %v4592_v3  ;;  %v9956_v46 = vpop.permute.xlu1 %4312  ;;  %v11599_v6 = vrot.slane %v9503_v4, 4  ;;  %v4208_v55 = vld [vmem:[#allocation3 + $0x24] sm:$0xf]  ;;  %v11131_v3 = vrot.slane %v9911_v41, 4  ;;  %vm11621_vm1 = vmmov %vm11608_vm0 }
 0x40e   : > { %11596 = vst [vmem:[#allocation25_spill] sm:$0xff] %v9956_v46  ;;  %v3256_v34 = vsel %vm11598_vm11, %v11597_v52, %v11124_v53  ;;  %v11125_v19 = vrot.slane %v9950_v30, 4  ;;  %v6804_v18 = vcombine.low %v4585_v7, %v4593_v21  ;;  %v6805_v40 = vcombine.high %v4585_v7, %v4593_v21  ;;  %vm11624_vm10 = vmmov %vm11608_vm0 }
 0x40f   : > { %2832 = vrot.lane.b32.xlu0 %v2803_v54, %s11227_s15  ;;  %v3257_v7 = vsel %vm11601_vm13, %v9489_v27, %v3256_v34  ;;  %v11606_v27 = vld [vmem:[#allocation36_spill] sm:$0xff]  ;;  %vm11626_vm11 = vcmask 736256   ;;  %vm11631_vm13 = vmmov %vm11608_vm0  ;;  %s7099_s15 = smov [#allocation10]  }
 0x410   : > { %4314 = vrot.lane.b32.xlu1 %v4290_v45, %s11233_s0  ;;  %6168 = vmatprep.subr.bf16.mxu0 %v6805_v40  ;;  %v3264_v47 = vsel %vm11600_vm12, %v11599_v6, %v11125_v19  ;;  %v11603_v6 = vld [vmem:[#allocation35_spill] sm:$0xff]  ;;  %vm11627_vm12 = vmmov %vm11626_vm11  ;;  %s7003_s14 = sshll.u32 %s7099_s15, 4  ;;  %s7004_s14 = int_to_ptr.vmem [resolvable:$false] %s7003_s14 }
 0x411   : > { %v9973_v52 = vpop.permute.xlu0 %4484  ;;  %6169 = vmatpush2.bf16.msra.mxu0 %v6804_v18  ;;  %v3265_v54 = vsel %vm11602_vm14, %v9503_v4, %v3264_v47  ;;  %v9979_v45 = vpop.permute.xlu1 %3066  ;;  %v11604_v19 = vrot.slane %v11603_v6, 4  ;;  %v11607_v4 = vrot.slane %v11606_v27, 4  ;;  %v3716_v18 = vld [vmem:[#allocation3 + $0x24] sm:$0xf]  ;;  %v11609_v47 = vrot.slane %v9472_v20, 4 }
 0x412   : > { %v11127_v40 = vrot.slane %v9973_v52, 4  ;;  %v6668_v21 = vcombine.low %v3257_v7, %v3265_v54  ;;  %v6669_v53 = vcombine.high %v3257_v7, %v3265_v54  ;;  %vm11632_vm14 = vcmask 228352  }
 0x413   : > { %v4502_v11 = vsel %vm11605_vm15, %v11604_v19, %v11128_v25  ;;  %3240 = vrot.lane.b32.xlu0 %v9405_v42, %s11330_s7  ;;  %v4422_v7 = vsel %vm11610_vm2, %v11609_v47, %v11131_v3  ;;  %v3634_v3 = vld [vmem:[#allocation3 + $0x24] sm:$0xf]  ;;  %vm11633_vm15 = vmmov %vm11632_vm14 }
 0x414   : > { %4232 = vrot.lane.b32.xlu1 %v4208_v55, %s11236_s20  ;;  %v4510_v34 = vsel %vm11608_vm0, %v11607_v4, %v11127_v40  ;;  %6129 = vmatprep.subr.bf16.mxu1 %v6669_v53  ;;  %v4503_v42 = vsel %vm11611_vm7, %v11603_v6, %v4502_v11  ;;  %v11133_v53 = vrot.slane %v9934_v0, 4  ;;  %v2721_v40 = vld [vmem:[#allocation3 + $0x48] sm:$0xf]  ;;  %v11614_v11 = vrot.slane %v9561_v51, 4  ;;  %v4377_v6 = vld [vmem:[#allocation3 + $0x4c] sm:$0xf]  ;;  %vm11638_vm2 = vmmov %vm11608_vm0 }
 0x415   : > { %v10000_v19 = vpop.permute.xlu0 %4404  ;;  %6130 = vmatpush2.bf16.msra.mxu1 %v6668_v21  ;;  %v4511_v55 = vsel %vm11612_vm8, %v11606_v27, %v4510_v34  ;;  %v10006_v54 = vpop.permute.xlu1 %4230  ;;  %v4126_v27 = vld [vmem:[#allocation3 + $0x24] sm:$0xf]  ;;  %v11138_v34 = vrot.slane %v9956_v46, 4  ;;  %vm11641_vm7 = vmmov %vm11608_vm0  ;;  %vm11643_vm8 = vcmask 744448  }
 0x416   : > { %11613 = vst [vmem:[#allocation27_spill] sm:$0xff] %v10006_v54  ;;  %v11130_v4 = vrot.slane %v10000_v19, 4  ;;  %v6796_v25 = vcombine.low %v4503_v42, %v4511_v55  ;;  %v6797_v59 = vcombine.high %v4503_v42, %v4511_v55 }
 0x417   : > { %2750 = vrot.lane.b32.xlu0 %v2721_v40, %s11226_s23  ;;  %v4423_v40 = vsel %vm11616_vm3, %v9472_v20, %v4422_v7  ;;  %v11620_v20 = vrot.slane %v9256_v49, 4  ;;  %v11622_v7 = vld [vmem:[#allocation37_spill] sm:$0xff]  ;;  %vm11647_vm3 = vmmov %vm11608_vm0  ;;  %s7005_s23 = scalar_lea.vmem %s7004_s14, 2048 }
 0x418   : > { %3740 = vrot.lane.b32.xlu1 %v3716_v18, %s11242_s5  ;;  %v4430_v21 = vsel %vm11615_vm9, %v11614_v11, %v11130_v4  ;;  %6132 = vmatmul.mubr.bf16.vlgmr.msra.gmra.mxu1 %v9554_v38  ;;  %vm11644_vm9 = vmmov %vm11643_vm8 }
 0x419   : > { %6170 = vmatprep.subr.bf16.mxu0 %v6797_v59  ;;  %v10019_v47 = vpop.permute.xlu0 %3158  ;;  %v4431_v18 = vsel %vm11617_vm5, %v9561_v51, %v4430_v21  ;;  %v10025_v42 = vpop.permute.xlu1 %2984  ;;  %6820 = vmatprep.mubr.msk.bf16.mxu1 %vm6013_vm6, %v11500_v62  ;;  %v11618_v59 = vrot.slane %v9156_v9, 4  ;;  %v4295_v21 = vld [vmem:[#allocation3 + $0x4c] sm:$0xf]  ;;  %vm11648_vm5 = vcmask 236544  }
 0x41a   : > { %6171 = vmatpush2.bf16.msra.mxu0 %v6796_v25  ;;  %v11132_v11 = vrot.slane %v10019_v47, 4  ;;  %v6790_v25 = vcombine.low %v4423_v40, %v4431_v18  ;;  %v6791_v4 = vcombine.high %v4423_v40, %v4431_v18 }
 0x41b   : > { %v3176_v55 = vsel %vm11619_vm4, %v11618_v59, %v11133_v53  ;;  %4406 = vrot.lane.b32.xlu0 %v4377_v6, %s11234_s3  ;;  %v11623_v59 = vrot.slane %v9495_v48, 4  ;;  %vm11649_vm4 = vmmov %vm11648_vm5 }
 0x41c   : > { %4150 = vrot.lane.b32.xlu1 %v4126_v27, %s11235_s12  ;;  %v3184_v51 = vsel %vm11621_vm1, %v11620_v20, %v11132_v11  ;;  %6222 = vmatprep.subr.bf16.mxu1 %v6791_v4  ;;  %v3177_v27 = vsel %vm11626_vm11, %v9156_v9, %v3176_v55  ;;  %v11629_v4 = vld [vmem:[#allocation32_spill] sm:$0xff]  ;;  %v11141_v11 = vrot.slane %v9979_v45, 4  ;;  %v11630_v9 = vrot.slane %v9596_v26, 4  ;;  %v4213_v55 = vld [vmem:[#allocation3 + $0x4c] sm:$0xf]  ;;  %vm11652_vm1 = vmmov %vm11608_vm0 }
 0x41d   : > { %6173 = vmatmul.mubr.bf16.vlgmr.msra.gmra.mxu0 %v11622_v7  ;;  %v4340_v40 = vsel %vm11624_vm10, %v11623_v59, %v11138_v34  ;;  %v10048_v6 = vpop.permute.xlu0 %4322  ;;  %6223 = vmatpush1.bf16.msra.mxu1 %v6790_v25  ;;  %v3185_v18 = vsel %vm11627_vm12, %v9256_v49, %v3184_v51  ;;  %v10054_v20 = vpop.permute.xlu1 %4148  ;;  %v4044_v25 = vld [vmem:[#allocation3 + $0x24] sm:$0xf]  ;;  %vm11655_vm10 = vmmov %vm11608_vm0  ;;  %vm11660_vm12 = vcmask 809984  }
 0x41e   : > { %11625 = vst [vmem:[#allocation29_spill] sm:$0xff] %v10048_v6  ;;  %11628 = vst [vmem:[#allocation30_spill] sm:$0xff] %v10054_v20  ;;  %6213 = vmatprep.mubr.bf16.mxu0 %v11629_v4  ;;  %v11137_v53 = vrot.slane %v10048_v6, 4  ;;  %v6662_v46 = vcombine.low %v3177_v27, %v3185_v18  ;;  %v6663_v62 = vcombine.high %v3177_v27, %v3185_v18  ;;  %v11634_v18 = vld [vmem:[#allocation44_spill] sm:$0xff]  ;;  %v11639_v6 = vrot.slane %v10006_v54, 4 }
 0x41f   : > { %4324 = vrot.lane.b32.xlu0 %v4295_v21, %s11233_s0  ;;  %v4341_v27 = vsel %vm11632_vm14, %v9495_v48, %v4340_v40  ;;  %v11636_v48 = vld [vmem:[#allocation26_spill] sm:$0xff]  ;;  %vm11658_vm11 = vmmov %vm11608_vm0 }
 0x420   : > { %3658 = vrot.lane.b32.xlu1 %v3634_v3, %s11241_s18  ;;  %v4348_v49 = vsel %vm11631_vm13, %v11630_v9, %v11137_v53  ;;  %6181 = vmatprep.subr.bf16.mxu0 %v6663_v62  ;;  %v11635_v9 = vrot.slane %v11634_v18, 4  ;;  %v3721_v40 = vld [vmem:[#allocation3 + $0x4c] sm:$0xf]  ;;  %vm11661_vm13 = vmmov %vm11660_vm12 }
 0x421   : > { %v10067_v59 = vpop.permute.xlu0 %3076  ;;  %6182 = vmatpush1.bf16.msra.mxu0 %v6662_v46  ;;  %v4349_v3 = vsel %vm11633_vm15, %v9596_v26, %v4348_v49  ;;  %v10073_v21 = vpop.permute.xlu1 %2902  ;;  %v11637_v26 = vrot.slane %v11636_v48, 4  ;;  %v3962_v49 = vld [vmem:[#allocation3 + $0x24] sm:$0xf]  ;;  %vm11664_vm14 = vmmov %vm11608_vm0  ;;  %vm11665_vm15 = vcmask 302080  }
 0x422   : > { %v3094_v62 = vsel %vm11608_vm0, %v11635_v9, %v11141_v11  ;;  %v11142_v53 = vrot.slane %v10067_v59, 4  ;;  %v6782_v34 = vcombine.low %v4341_v27, %v4349_v3  ;;  %v6783_v51 = vcombine.high %v4341_v27, %v4349_v3  ;;  %vm11666_vm0 = vmmov %vm11665_vm15 }
 0x423   : > { %4242 = vrot.lane.b32.xlu0 %v4213_v55, %s11236_s20  ;;  %v11640_v9 = vrot.slane %v9505_v12, 4  ;;  %v3095_v55 = vsel %vm11643_vm8, %v11634_v18, %v3094_v62  ;;  %v4131_v18 = vld [vmem:[#allocation3 + $0x4c] sm:$0xf]  ;;  %v3536_v62 = vld [vmem:[#allocation3 + $0x20] sm:$0xf]  ;;  %vm11675_vm8 = vmmov %vm11652_vm1  ;;  %s11939_s20 = sld [smem:[#allocation23_spill]] }
 0x424   : > { %4068 = vrot.lane.b32.xlu1 %v4044_v25, %s11238_s29  ;;  %v3102_v46 = vsel %vm11638_vm2, %v11637_v26, %v11142_v53  ;;  %6224 = vmatprep.subr.bf16.mxu1 %v6783_v51  ;;  %v11146_v51 = vrot.slane %v10025_v42, 4  ;;  %vm11669_vm2 = vmmov %vm11652_vm1 }
 0x425   : > { %v4258_v11 = vsel %vm11641_vm7, %v11640_v9, %v11639_v6  ;;  %v10093_v27 = vpop.permute.xlu0 %4240  ;;  %6225 = vmatpush1.bf16.msra.mxu1 %v6782_v34  ;;  %v3103_v25 = vsel %vm11644_vm9, %v11636_v48, %v3102_v46  ;;  %v10099_v3 = vpop.permute.xlu1 %4066  ;;  %v11646_v34 = vrot.slane %v9625_v29, 4  ;;  %v11650_v9 = vld [vmem:[#allocation47_spill] sm:$0xff]  ;;  %vm11672_vm7 = vmmov %vm11652_vm1  ;;  %vm11677_vm9 = vcmask 818176  }
 0x426   : > { %11642 = vst [vmem:[#allocation31_spill] sm:$0xff] %v10093_v27  ;;  %11645 = vst [vmem:[#allocation33_spill] sm:$0xff] %v10099_v3  ;;  %v11145_v26 = vrot.slane %v10093_v27, 4  ;;  %v6654_v53 = vcombine.low %v3095_v55, %v3103_v25  ;;  %v6655_v54 = vcombine.high %v3095_v55, %v3103_v25  ;;  %v4259_v46 = vsel %vm11648_vm5, %v9505_v12, %v4258_v11  ;;  %v11653_v12 = vld [vmem:[#allocation49_spill] sm:$0xff]  ;;  %v3639_v11 = vld [vmem:[#allocation3 + $0x4c] sm:$0xf] }
 0x427   : > { %3750 = vrot.lane.b32.xlu0 %v3721_v40, %s11242_s5  ;;  %v11651_v55 = vrot.slane %v11650_v9, 4  ;;  %vm11680_vm5 = vmmov %vm11652_vm1  ;;  %s11730_s5 = sld [smem:[#allocation55_spill]] }
 0x428   : > { %3986 = vrot.lane.b32.xlu1 %v3962_v49, %s11237_s19  ;;  %v4266_v6 = vsel %vm11647_vm3, %v11646_v34, %v11145_v26  ;;  %6183 = vmatprep.subr.bf16.mxu0 %v6655_v54  ;;  %vm11678_vm3 = vmmov %vm11677_vm9 }
 0x429   : > { %v10111_v48 = vpop.permute.xlu0 %2994  ;;  %6184 = vmatpush1.bf16.msra.mxu0 %v6654_v53  ;;  %v4267_v40 = vsel %vm11649_vm4, %v9625_v29, %v4266_v6  ;;  %v10117_v49 = vpop.permute.xlu1 %2820  ;;  %v3012_v54 = vsel %vm11652_vm1, %v11651_v55, %v11146_v51  ;;  %v11654_v29 = vrot.slane %v11653_v12, 4  ;;  %v3880_v6 = vld [vmem:[#allocation3 + $0x24] sm:$0xf]  ;;  %v11656_v55 = vrot.slane %v10054_v20, 4  ;;  %s6362_s6 = scalar_lea.sflag [#allocation7], %s11939_s20 }
 0x42a   : > { %v11149_v25 = vrot.slane %v10111_v48, 4  ;;  %v6774_v34 = vcombine.low %v4259_v46, %v4267_v40  ;;  %v6775_v26 = vcombine.high %v4259_v46, %v4267_v40  ;;  %v11657_v51 = vrot.slane %v9567_v43, 4 }
 0x42b   : > { %4160 = vrot.lane.b32.xlu0 %v4131_v18, %s11235_s12  ;;  %v3013_v18 = vsel %vm11660_vm12, %v11650_v9, %v3012_v54  ;;  %v4049_v54 = vld [vmem:[#allocation3 + $0x4c] sm:$0xf]  ;;  %vm11681_vm4 = vcmask 310272   ;;  %vm11692_vm12 = vmmov %vm11669_vm2 }
 0x42c   : > { %3560 = vrot.lane.b32.xlu1 %v3536_v62, %s11243_s13  ;;  %v3020_v53 = vsel %vm11655_vm10, %v11654_v29, %v11149_v25  ;;  %6226 = vmatprep.subr.bf16.mxu1 %v6775_v26  ;;  %v4176_v46 = vsel %vm11658_vm11, %v11657_v51, %v11656_v55  ;;  %v11153_v26 = vrot.slane %v10073_v21, 4  ;;  %v11663_v51 = vrot.slane %v9673_v57, 4  ;;  %v11667_v55 = vld [vmem:[#allocation48_spill] sm:$0xff]  ;;  %vm11682_vm1 = vmmov %vm11681_vm4 }
 0x42d   : > { %v10137_v40 = vpop.permute.xlu0 %4158  ;;  %6227 = vmatpush1.bf16.msra.mxu1 %v6774_v34  ;;  %v3021_v62 = vsel %vm11661_vm13, %v11653_v12, %v3020_v53  ;;  %v10143_v27 = vpop.permute.xlu1 %3984  ;;  %v4177_v53 = vsel %vm11665_vm15, %v9567_v43, %v4176_v46  ;;  %v3454_v34 = vld [vmem:[#allocation3 + $0x20] sm:$0xf]  ;;  %v11670_v43 = vld [vmem:[#allocation51_spill] sm:$0xff]  ;;  %v3967_v46 = vld [vmem:[#allocation3 + $0x4c] sm:$0xf]  ;;  %vm11693_vm13 = vcmask 826368  }
 0x42e   : > { %11659 = vst [vmem:[#allocation34_spill] sm:$0xff] %v10137_v40  ;;  %11662 = vst [vmem:[#allocation35_spill] sm:$0xff] %v10143_v27  ;;  %v11152_v29 = vrot.slane %v10137_v40, 4  ;;  %v6646_v25 = vcombine.low %v3013_v18, %v3021_v62  ;;  %v6647_v20 = vcombine.high %v3013_v18, %v3021_v62  ;;  %v11668_v18 = vrot.slane %v11667_v55, 4 }
 0x42f   : > { %3668 = vrot.lane.b32.xlu0 %v3639_v11, %s11241_s18  ;;  %vm11686_vm10 = vmmov %vm11669_vm2  ;;  %s11929_s18 = sld [smem:[#allocation24_spill]] }
 0x430   : > { %3904 = vrot.lane.b32.xlu1 %v3880_v6, %s11240_s25  ;;  %v4184_v9 = vsel %vm11664_vm14, %v11663_v51, %v11152_v29  ;;  %6185 = vmatprep.subr.bf16.mxu0 %v6647_v20  ;;  %v2930_v20 = vsel %vm11669_vm2, %v11668_v18, %v11153_v26  ;;  %v11673_v18 = vrot.slane %v10099_v3, 4  ;;  %v11674_v26 = vrot.slane %v9631_v32, 4  ;;  %vm11689_vm11 = vmmov %vm11669_vm2 }
 0x431   : > { %v10155_v12 = vpop.permute.xlu0 %2912  ;;  %6186 = vmatpush1.bf16.msra.mxu0 %v6646_v25  ;;  %v4185_v11 = vsel %vm11666_vm0, %v9673_v57, %v4184_v9  ;;  %v10161_v6 = vpop.permute.xlu1 %2738  ;;  %v11671_v57 = vrot.slane %v11670_v43, 4  ;;  %v3798_v9 = vld [vmem:[#allocation3 + $0x24] sm:$0xf]  ;;  %vm11694_vm14 = vmmov %vm11693_vm13  ;;  %vm11698_vm0 = vcmask 318464  }
 0x432   : > { %v11156_v62 = vrot.slane %v10155_v12, 4  ;;  %v6766_v51 = vcombine.low %v4177_v53, %v4185_v11  ;;  %v6767_v29 = vcombine.high %v4177_v53, %v4185_v11  ;;  %v4094_v53 = vsel %vm11675_vm8, %v11674_v26, %v11673_v18  ;;  %vm11697_vm15 = vmmov %vm11669_vm2 }
 0x433   : > { %4078 = vrot.lane.b32.xlu0 %v4049_v54, %s11238_s29  ;;  %v2931_v54 = vsel %vm11677_vm9, %v11667_v55, %v2930_v20  ;;  %v11679_v26 = vrot.slane %v9720_v16, 4  ;;  %v4618_v20 = vld [vmem:[#allocation3 + $0x24] sm:$0xf]  ;;  %vm11699_vm2 = vmmov %vm11698_vm0 }
 0x434   : > { %3478 = vrot.lane.b32.xlu1 %v3454_v34, %s11219_s17  ;;  %v2938_v25 = vsel %vm11672_vm7, %v11671_v57, %v11156_v62  ;;  %6228 = vmatprep.subr.bf16.mxu1 %v6767_v29  ;;  %v11160_v29 = vrot.slane %v10117_v49, 4  ;;  %vm11701_vm7 = vmmov %vm11680_vm5 }
 0x435   : > { %v10181_v11 = vpop.permute.xlu0 %4076  ;;  %6229 = vmatpush1.bf16.msra.mxu1 %v6766_v51  ;;  %v2939_v34 = vsel %vm11678_vm3, %v11670_v43, %v2938_v25  ;;  %v10187_v40 = vpop.permute.xlu1 %3902  ;;  %v4095_v43 = vsel %vm11681_vm4, %v9631_v32, %v4094_v53  ;;  %v11687_v32 = vld [vmem:[#allocation52_spill] sm:$0xff]  ;;  %vm11703_vm8 = vmmov %vm11680_vm5  ;;  %vm11706_vm3 = vcmask 891904   ;;  %s6376_s29 = sshll.u32 %s11929_s18, 4  ;;  %s6377_s29 = int_to_ptr.vmem [resolvable:$true] %s6376_s29 }
 0x436   : > { %11676 = vst [vmem:[#allocation36_spill] sm:$0xff] %v10181_v11  ;;  %v11159_v57 = vrot.slane %v10181_v11, 4  ;;  %v6638_v62 = vcombine.low %v2931_v54, %v2939_v34  ;;  %v6639_v3 = vcombine.high %v2931_v54, %v2939_v34  ;;  %v3541_v34 = vld [vmem:[#allocation3 + $0x48] sm:$0xf]  ;;  %vm11705_vm9 = vmmov %vm11680_vm5  ;;  %s6999_s16 = scalar_lea.vmem %s6377_s29, 1024  ;;  %p7006_p2 = scmp.lt.s32.totalorder %s6377_s29, %s7004_s14 }
 0x437   : > { %3996 = vrot.lane.b32.xlu0 %v3967_v46, %s11237_s19  ;;  %vm11709_vm4 = vmmov %vm11701_vm7  ;;  %s11938_s19 = sld [smem:[#allocation18_spill]]  ;;  %p7000_p12 = scmp.ne.s32.totalorder %s6377_s29, %s6999_s16 }
 0x438   : > { %3822 = vrot.lane.b32.xlu1 %v3798_v9, %s11239_s21  ;;  %v4102_v55 = vsel %vm11680_vm5, %v11679_v26, %v11159_v57  ;;  %6187 = vmatprep.subr.bf16.mxu0 %v6639_v3  ;;  %v11684_v9 = vld [vmem:[#allocation50_spill] sm:$0xff]  ;;  %vm11707_vm5 = vmmov %vm11706_vm3  ;;  %p7007_p10 = scmp.lt.s32.totalorder %s7005_s23, %s6999_s16 }
 0x439   : > { %v10199_v51 = vpop.permute.xlu0 %2830  ;;  %6188 = vmatpush1.bf16.msra.mxu0 %v6638_v62  ;;  %v4103_v25 = vsel %vm11682_vm1, %v9720_v16, %v4102_v55  ;;  %v10205_v46 = vpop.permute.xlu1 %3820  ;;  %v11685_v18 = vrot.slane %v11684_v9, 4  ;;  %v3372_v62 = vld [vmem:[#allocation3 + $0x20] sm:$0xf]  ;;  %v11688_v16 = vrot.slane %v11687_v32, 4  ;;  %v3885_v55 = vld [vmem:[#allocation3 + $0x4c] sm:$0xf] }
 0x43a   : > { %11683 = vst [vmem:[#allocation37_spill] sm:$0xff] %v10205_v46  ;;  %v11163_v3 = vrot.slane %v10199_v51, 4  ;;  %v6758_v26 = vcombine.low %v4095_v43, %v4103_v25  ;;  %v6759_v57 = vcombine.high %v4095_v43, %v4103_v25  ;;  %vm11711_vm1 = vcmask 957440   ;;  %p7008_p3 = por %p7007_p10, %p7006_p2 }
 0x43b   : > { %v2848_v54 = vsel %vm11686_vm10, %v11685_v18, %v11160_v29  ;;  %3570 = vrot.lane.b32.xlu0 %v3541_v34, %s11243_s13  ;;  %v11690_v18 = vrot.slane %v10143_v27, 4  ;;  %v11691_v29 = vrot.slane %v9656_v2, 4  ;;  %vm11712_vm10 = vmmov %vm11711_vm1 }
 0x43c   : > { %3396 = vrot.lane.b32.xlu1 %v3372_v62, %s11303_s8  ;;  %v2856_v53 = vsel %vm11689_vm11, %v11688_v16, %v11163_v3  ;;  %6230 = vmatprep.subr.bf16.mxu1 %v6759_v57  ;;  %v2849_v34 = vsel %vm11693_vm13, %v11684_v9, %v2848_v54  ;;  %v11168_v57 = vrot.slane %v10161_v6, 4  ;;  %v11170_v54 = vrot.slane %v10187_v40, 4  ;;  %vm11714_vm11 = vmmov %vm11709_vm4 }
 0x43d   : > { %v4012_v43 = vsel %vm11692_vm12, %v11691_v29, %v11690_v18  ;;  %v10225_v25 = vpop.permute.xlu0 %3994  ;;  %6231 = vmatpush1.bf16.msra.mxu1 %v6758_v26  ;;  %v2857_v62 = vsel %vm11694_vm14, %v11687_v32, %v2856_v53  ;;  %v10231_v11 = vpop.permute.xlu1 %4640  ;;  %v11696_v29 = vrot.slane %v9744_v35, 4  ;;  %vm11719_vm12 = vmmov %vm11709_vm4  ;;  %vm11723_vm14 = vcmask 965632  }
 0x43e   : > { %11695 = vst [vmem:[#allocation32_spill] sm:$0xff] %v10231_v11  ;;  %v11166_v16 = vrot.slane %v10225_v25, 4  ;;  %v6630_v3 = vcombine.low %v2849_v34, %v2857_v62  ;;  %v6631_v27 = vcombine.high %v2849_v34, %v2857_v62  ;;  %v4013_v32 = vsel %vm11698_vm0, %v9656_v2, %v4012_v43  ;;  %v3459_v34 = vld [vmem:[#allocation3 + $0x48] sm:$0xf]  ;;  %v3803_v43 = vld [vmem:[#allocation3 + $0x4c] sm:$0xf]  ;;  %vm11721_vm13 = vmmov %vm11709_vm4 }
 0x43f   : > { %3914 = vrot.lane.b32.xlu0 %v3885_v55, %s11240_s25  ;;  %v11702_v2 = vrot.slane %v9520_v44, 4  ;;  %vm11729_vm0 = vmmov %vm11709_vm4  ;;  %s6836_s25 = sshll.u32 %s11938_s19, 10 }
 0x440   : > { %4642 = vrot.lane.b32.xlu1 %v4618_v20, %s11230_s9  ;;  %v4020_v9 = vsel %vm11697_vm15, %v11696_v29, %v11166_v16  ;;  %6189 = vmatprep.subr.bf16.mxu0 %v6631_v27  ;;  %v11700_v20 = vrot.slane %v9453_v39, 4  ;;  %vm11724_vm15 = vmmov %vm11723_vm14  ;;  %s10820_s30 = scalar_lea.hbm %s11941_s24, %s6836_s25 }
 0x441   : > { %v10243_v26 = vpop.permute.xlu0 %2748  ;;  %6190 = vmatpush1.bf16.msra.mxu0 %v6630_v3  ;;  %v4021_v53 = vsel %vm11699_vm2, %v9744_v35, %v4020_v9  ;;  %v10249_v55 = vpop.permute.xlu1 %3738  ;;  %v3290_v3 = vld [vmem:[#allocation3 + $0x20] sm:$0xf]  ;;  %v4536_v9 = vld [vmem:[#allocation3 + $0x24] sm:$0xf]  ;;  %vm11732_vm2 = vcmask 138240  }
 0x442   : > { %v2766_v18 = vsel %vm11701_vm7, %v11700_v20, %v11168_v57  ;;  %v11167_v27 = vrot.slane %v10243_v26, 4  ;;  %v6750_v62 = vcombine.low %v4013_v32, %v4021_v53  ;;  %v6751_v29 = vcombine.high %v4013_v32, %v4021_v53  ;;  %vm11733_vm7 = vmmov %vm11732_vm2 }
 0x443   : > { %3488 = vrot.lane.b32.xlu0 %v3459_v34, %s11219_s17  ;;  %v11704_v20 = vrot.slane %v9703_v22, 4  ;;  %v2767_v34 = vsel %vm11706_vm3, %v9453_v39, %v2766_v18  ;;  %vm11739_vm3 = vmmov %vm11729_vm0 }
 0x444   : > { %3314 = vrot.lane.b32.xlu1 %v3290_v3, %s11316_s27  ;;  %v2774_v35 = vsel %vm11703_vm8, %v11702_v2, %v11167_v27  ;;  %6232 = vmatprep.subr.bf16.mxu1 %v6751_v29  ;;  %v11171_v29 = vrot.slane %v10205_v46, 4  ;;  %vm11735_vm8 = vmmov %vm11729_vm0 }
 0x445   : > { %v3930_v32 = vsel %vm11705_vm9, %v11704_v20, %v11170_v54  ;;  %v10269_v53 = vpop.permute.xlu0 %3912  ;;  %6233 = vmatpush1.bf16.msra.mxu1 %v6750_v62  ;;  %v2775_v3 = vsel %vm11707_vm5, %v9520_v44, %v2774_v35  ;;  %v11708_v62 = vrot.slane %v9790_v61, 4  ;;  %v11175_v44 = vrot.slane %v10231_v11, 4  ;;  %vm11737_vm9 = vmmov %vm11729_vm0 }
 0x446   : > { %v10275_v16 = vpop.permute.xlu1 %4558  ;;  %v11169_v2 = vrot.slane %v10269_v53, 4  ;;  %v6622_v27 = vcombine.low %v2767_v34, %v2775_v3  ;;  %v6623_v57 = vcombine.high %v2767_v34, %v2775_v3  ;;  %v3931_v35 = vsel %vm11711_vm1, %v9703_v22, %v3930_v32  ;;  %v11715_v3 = vld [vmem:[#allocation42_spill] sm:$0xff]  ;;  %v3208_v32 = vld [vmem:[#allocation3 + $0x20] sm:$0xf]  ;;  %vm11743_vm1 = vmmov %vm11729_vm0 }
 0x447   : > { %3832 = vrot.lane.b32.xlu0 %v3803_v43, %s11239_s21  ;;  %vm11740_vm5 = vcmask 973824   ;;  %s11940_s21 = sld [smem:[#allocation22_spill]] }
 0x448   : > { %4560 = vrot.lane.b32.xlu1 %v4536_v9, %s11232_s10  ;;  %v3938_v39 = vsel %vm11709_vm4, %v11708_v62, %v11169_v2  ;;  %6191 = vmatprep.subr.bf16.mxu0 %v6623_v57  ;;  %v11713_v9 = vrot.slane %v9750_v63, 4  ;;  %v11716_v62 = vld [vmem:[#allocation43_spill] sm:$0xff]  ;;  %vm11741_vm4 = vmmov %vm11740_vm5 }
 0x449   : > { %v10287_v18 = vpop.permute.xlu0 %3830  ;;  %6192 = vmatpush1.bf16.msra.mxu0 %v6622_v27  ;;  %v3939_v43 = vsel %vm11712_vm10, %v9790_v61, %v3938_v39  ;;  %v11717_v2 = vcombine.high %v11715_v3, %v11716_v62  ;;  %v3377_v27 = vld [vmem:[#allocation3 + $0x48] sm:$0xf]  ;;  %v11718_v61 = vrot.slane %v9836_v50, 4  ;;  %vm11744_vm10 = vcmask 146432  }
 0x44a   : > { %11710 = vst [vmem:[#allocation44_spill] sm:$0xff] %v10287_v18  ;;  %v10293_v20 = vpop.permute.xlu1 %3656  ;;  %v3848_v34 = vsel %vm11714_vm11, %v11713_v9, %v11171_v29  ;;  %v11172_v57 = vrot.slane %v10287_v18, 4  ;;  %v6742_v54 = vcombine.low %v3931_v35, %v3939_v43  ;;  %v6743_v22 = vcombine.high %v3931_v35, %v3939_v43  ;;  %v4623_v9 = vld [vmem:[#allocation3 + $0x4c] sm:$0xf]  ;;  %v4454_v29 = vld [vmem:[#allocation3 + $0x24] sm:$0xf]  ;;  %vm11745_vm11 = vmmov %vm11744_vm10 }
 0x44b   : > { %6193 = vmatprep.subr.bf16.mxu0 %v11717_v2  ;;  %3406 = vrot.lane.b32.xlu0 %v3377_v27, %s11303_s8  ;;  %v11720_v2 = vrot.slane %v9796_v58, 4  ;;  %v11722_v27 = vcombine.low %v11715_v3, %v11716_v62 }
 0x44c   : > { %3232 = vrot.lane.b32.xlu1 %v3208_v32, %s11330_s7  ;;  %v3856_v39 = vsel %vm11719_vm12, %v11718_v61, %v11172_v57  ;;  %6234 = vmatprep.subr.bf16.mxu1 %v6743_v22  ;;  %v3849_v32 = vsel %vm11723_vm14, %v9750_v63, %v3848_v34  ;;  %v3755_v57 = vrot.slane %v10249_v55, 4  ;;  %v11728_v63 = vrot.slane %v9882_v15, 4  ;;  %v10342_v34 = vpop.f32.mrf.mxu1  ;;  %vm11747_vm12 = vmmov %vm11729_vm0 }
 0x44d   : > { %v4668_v35 = vsel %vm11721_vm13, %v11720_v2, %v11175_v44  ;;  %v10316_v43 = vpop.permute.xlu0 %4650  ;;  %6194 = vmatpush1.bf16.msra.mxu0 %v11722_v27  ;;  %6235 = vmatpush1.bf16.msra.mxu1 %v6742_v54  ;;  %v3857_v22 = vsel %vm11724_vm15, %v9836_v50, %v3856_v39  ;;  %v11725_v2 = vld [vmem:[#allocation39_spill] sm:$0xff]  ;;  %v11726_v44 = vld [vmem:[#allocation38_spill] sm:$0xff]  ;;  %v4914_v54 = vld [vmem:[%s11730_s5] sm:$0xff]  ;;  %vm11752_vm15 = vcmask 1039360   ;;  %p11942_p0 = scmp.ne.s32.totalorder %s11940_s21, 0 }
 0x44e   : > { %v10325_v61 = vpop.permute.xlu1 %4476  ;;  %v11180_v11 = vrot.slane %v10316_v43, 4  ;;  %v11727_v18 = vcombine.high %v11725_v2, %v11726_v44  ;;  %v6734_v46 = vcombine.low %v3849_v32, %v3857_v22  ;;  %v6735_v3 = vcombine.high %v3849_v32, %v3857_v22  ;;  %vm11749_vm13 = vmmov %vm11729_vm0 }
 0x44f   : > { %4652 = vrot.lane.b32.xlu0 %v4623_v9, %s11230_s9  ;;  %v4669_v39 = vsel %vm11732_vm2, %v9796_v58, %v4668_v35  ;;  %v11734_v32 = vrot.slane %v9525_v60, 4  ;;  %v11736_v58 = vrot.slane %v9650_v28, 4  ;;  %v10368_v35 = vpop.f32.mrf.mxu1  ;;  %vm11751_vm14 = vmmov %vm11729_vm0  ;;  %p7001_p11 = pnand %p7000_p12, %p11942_p0 }
 0x450   : > { %6195 = vmatprep.subr.bf16.mxu0 %v11727_v18  ;;  %4478 = vrot.lane.b32.xlu1 %v4454_v29, %s11231_s11  ;;  %v4676_v50 = vsel %vm11729_vm0, %v11728_v63, %v11180_v11  ;;  %v11183_v18 = vrot.slane %v10275_v16, 4  ;;  %v11731_v29 = vcombine.low %v11725_v2, %v11726_v44  ;;  %v3295_v63 = vld [vmem:[#allocation3 + $0x48] sm:$0xf]  ;;  %vm11753_vm0 = vmmov %vm11752_vm15 }
 0x451   : > { %6236 = vmatprep.subr.bf16.mxu1 %v6735_v3  ;;  %v10345_v62 = vpop.permute.xlu0 %3748  ;;  %v4677_v9 = vsel %vm11733_vm7, %v9882_v15, %v4676_v50  ;;  %v3766_v22 = vsel %vm11735_vm8, %v11734_v32, %v3755_v57  ;;  %v11738_v50 = vrot.slane %v9842_v23, 4  ;;  %vm11755_vm2 = vmmov %vm11743_vm1  ;;  %vm11756_vm7 = vcmask 154624   ;;  %p7002_p1 = pneg %p7001_p11 }
 0x452   : > { %6196 = vmatpush1.bf16.msra.mxu0 %v11731_v29  ;;  %6237 = vmatpush1.bf16.msra.mxu1 %v6734_v46  ;;  %v10354_v27 = vpop.permute.xlu1 %3150  ;;  %v11181_v3 = vrot.slane %v10345_v62, 4  ;;  %v6814_v44 = vcombine.low %v4669_v39, %v4677_v9  ;;  %v6815_v2 = vcombine.high %v4669_v39, %v4677_v9  ;;  %v4541_v46 = vld [vmem:[#allocation3 + $0x4c] sm:$0xf]  ;;  %vm11757_vm8 = vmmov %vm11756_vm7 }
 0x453   : > { %3324 = vrot.lane.b32.xlu0 %v3295_v63, %s11316_s27  ;;  %v4586_v29 = vsel %vm11739_vm3, %v11738_v50, %v11183_v18  ;;  %v11187_v63 = vrot.slane %v10293_v20, 4  ;;  %vm11761_vm3 = vmmov %vm11743_vm1  ;;  %p7009_p13 = pnand %p7008_p3, %p7002_p1 }
 0x454   : > { %4917 = vperm.xlu1 %6923, %v4914_v54   ;;  %v3774_v15 = vsel %vm11737_vm9, %v11736_v58, %v11181_v3  ;;  %6248 = vmatprep.subr.bf16.mxu1 %v6815_v2  ;;  %v3767_v54 = vsel %vm11740_vm5, %v9525_v60, %v3766_v22  ;;  %v6096_v3 = vpop.f32.mrf.mxu1  ;;  %v4587_v50 = vsel %vm11744_vm10, %v9842_v23, %v4586_v29  ;;  %v11748_v23 = vrot.slane %v9697_v17, 4  ;;  %v4459_v29 = vld [vmem:[#allocation3 + $0x4c] sm:$0xf]  ;;  %vm11759_vm9 = vmmov %vm11743_vm1 }
 0x455   : > { %v10375_v39 = vpop.permute.xlu0 %4568  ;;  %v3775_v9 = vsel %vm11741_vm4, %v9650_v28, %v3774_v15  ;;  %v11185_v28 = vrot.slane %v10325_v61, 4  ;;  %vm11763_vm5 = vmmov %vm11743_vm1  ;;  %vm11764_vm4 = vcmask 736256  }
 0x456   : > { %6249 = vmatpush2.bf16.msra.mxu1 %v6814_v44  ;;  %v10381_v32 = vpop.permute.xlu1 %3558  ;;  %v11182_v2 = vrot.slane %v10375_v39, 4  ;;  %v6726_v58 = vcombine.low %v3767_v54, %v3775_v9  ;;  %v6727_v11 = vcombine.high %v3767_v54, %v3775_v9  ;;  %v11742_v44 = vrot.slane %v9928_v1, 4  ;;  %v6097_v22 = vpop.f32.mrf.mxu1  ;;  %vm11767_vm10 = vmmov %vm11755_vm2 }
 0x457   : > { %4570 = vrot.lane.b32.xlu0 %v4541_v46, %s11232_s10  ;;  %v11746_v54 = vrot.slane %v9602_v33, 4 }
 0x458   : > { %v4594_v60 = vsel %vm11743_vm1, %v11742_v44, %v11182_v2  ;;  %6197 = vmatprep.subr.bf16.mxu0 %v6727_v11  ;;  %v3213_v44 = vld [vmem:[#allocation3 + $0x48] sm:$0xf]  ;;  %vm11765_vm1 = vmmov %vm11764_vm4 }
 0x459   : > { %v10392_v15 = vpop.permute.xlu0 %3666  ;;  %6198 = vmatpush2.bf16.msra.mxu0 %v6726_v58  ;;  %v4595_v3 = vsel %vm11745_vm11, %v9928_v1, %v4594_v60  ;;  %v3684_v9 = vsel %vm11747_vm12, %v11746_v54, %v11187_v63  ;;  %v11750_v58 = vrot.slane %v9888_v31, 4  ;;  %v11760_v63 = vrot.slane %v10019_v47, 4 }
 0x45a   : > { %v3069_v46 = vpop.permute.xlu1 %3068  ;;  %v11184_v11 = vrot.slane %v10392_v15, 4  ;;  %v6806_v22 = vcombine.low %v4587_v50, %v4595_v3  ;;  %v6807_v2 = vcombine.high %v4587_v50, %v4595_v3  ;;  %v3685_v50 = vsel %vm11752_vm15, %v9602_v33, %v3684_v9  ;;  %v6939_v33 = vld [vmem:[#allocation3 + $0x18] ss:$40 sps:$4 sm:$0xff]   ;;  %vm11775_vm15 = vmmov %vm11755_vm2 }
 0x45b   : > { %3242 = vrot.lane.b32.xlu0 %v3213_v44, %s11330_s7  ;;  %v4504_v60 = vsel %vm11751_vm14, %v11750_v58, %v11185_v28  ;;  %vm11768_vm11 = vcmask 7168   ;;  %vm11773_vm14 = vmmov %vm11755_vm2 }
 0x45c   : > { %v3692_v1 = vsel %vm11749_vm13, %v11748_v23, %v11184_v11  ;;  %6250 = vmatprep.subr.bf16.mxu1 %v6807_v2  ;;  %v3166_v2 = vrot.slane %v10354_v27, 4  ;;  %v4505_v27 = vsel %vm11756_vm7, %v9888_v31, %v4504_v60  ;;  %v11762_v31 = vrot.slane %v9679_v5, 4  ;;  %vm11769_vm12 = vmmov %vm11768_vm11 }
 0x45d   : > { %v10415_v54 = vpop.permute.xlu0 %4486  ;;  %6251 = vmatpush2.bf16.msra.mxu1 %v6806_v22  ;;  %v3693_v3 = vsel %vm11753_vm0, %v9697_v17, %v3692_v1  ;;  %v11754_v22 = vrot.slane %v9973_v52, 4  ;;  %v3575_v17 = vrot.slane %v10381_v32, 4  ;;  %vm11771_vm13 = vmmov %vm11755_vm2  ;;  %vm11776_vm0 = vcmask 744448  }
 0x45e   : > { %v10421_v44 = vpop.permute.xlu1 %3476  ;;  %v11186_v23 = vrot.slane %v10415_v54, 4  ;;  %v6718_v18 = vcombine.low %v3685_v50, %v3693_v3  ;;  %v6719_v11 = vcombine.high %v3685_v50, %v3693_v3  ;;  %vm11779_vm7 = vmmov %vm11761_vm3 }
 0x45f   : > { %4488 = vrot.lane.b32.xlu0 %v4459_v29, %s11231_s11  ;;  %v11758_v29 = vrot.slane %v9934_v0, 4 }
 0x460   : > { %v4512_v58 = vsel %vm11755_vm2, %v11754_v22, %v11186_v23  ;;  %6199 = vmatprep.subr.bf16.mxu0 %v6719_v11  ;;  %v6937_v23 = vld [vmem:[#allocation3 + $0x14] ss:$40 sps:$4 sm:$0xff]   ;;  %vm11777_vm2 = vmmov %vm11776_vm0 }
 0x461   : > { %v3161_v9 = vpop.permute.xlu0 %3160  ;;  %6200 = vmatpush2.bf16.msra.mxu0 %v6718_v18  ;;  %v4513_v1 = vsel %vm11757_vm8, %v9973_v52, %v4512_v58  ;;  %v3178_v3 = vsel %vm11759_vm9, %v11758_v29, %v3166_v2  ;;  %v3586_v52 = vsel %vm11763_vm5, %v11762_v31, %v3575_v17  ;;  %vm11780_vm8 = vcmask 72704   ;;  %vm11784_vm5 = vmmov %vm11761_vm3 }
 0x462   : > { %v2987_v50 = vpop.permute.xlu1 %2986  ;;  %v3171_v28 = vrot.slane %v3161_v9, 4  ;;  %6201 = vmatprep.subr.bf16.mxu0 %v6939_v33  ;;  %v6798_v22 = vcombine.low %v4505_v27, %v4513_v1  ;;  %v6799_v11 = vcombine.high %v4505_v27, %v4513_v1  ;;  %v3179_v2 = vsel %vm11764_vm4, %v9934_v0, %v3178_v3  ;;  %vm11781_vm9 = vmmov %vm11780_vm8 }
 0x463   : > { %v11766_v1 = vrot.slane %v9767_v13, 4  ;;  %v3493_v0 = vrot.slane %v10421_v44, 4  ;;  %vm11786_vm4 = vmmov %vm11761_vm3 }
 0x464   : > { %v3186_v18 = vsel %vm11761_vm3, %v11760_v63, %v3171_v28  ;;  %6252 = vmatprep.subr.bf16.mxu1 %v6799_v11  ;;  %v3084_v63 = vrot.slane %v3069_v46, 4 }
 0x465   : > { %v10447_v60 = vpop.permute.xlu0 %3568  ;;  %6202 = vmatpush2.bf16.msra.mxu0 %v6937_v23  ;;  %6253 = vmatpush2.bf16.msra.mxu1 %v6798_v22  ;;  %v3187_v58 = vsel %vm11765_vm1, %v10019_v47, %v3186_v18  ;;  %v3587_v47 = vsel %vm11768_vm11, %v9679_v5, %v3586_v52  ;;  %v11770_v22 = vrot.slane %v9979_v45, 4  ;;  %v11774_v5 = vrot.slane %v9726_v24, 4  ;;  %vm11790_vm11 = vmmov %vm11761_vm3 }
 0x466   : > { %v10453_v33 = vpop.permute.xlu1 %3394  ;;  %v3580_v28 = vrot.slane %v10447_v60, 4  ;;  %v6664_v9 = vcombine.low %v3179_v2, %v3187_v58  ;;  %v6665_v27 = vcombine.high %v3179_v2, %v3187_v58  ;;  %v11772_v58 = vrot.slane %v10067_v59, 4 }
 0x467   : > { %v3096_v11 = vsel %vm11771_vm13, %v11770_v22, %v3084_v63  ;;  %vm11787_vm1 = vcmask 809984  }
 0x468   : > { %v3594_v23 = vsel %vm11767_vm10, %v11766_v1, %v3580_v28  ;;  %6263 = vmatprep.subr.bf16.mxu1 %v6665_v27  ;;  %6255 = vmatmul.mubr.bf16.vlgmr.msra.gmra.mxu1 %v11622_v7  ;;  %v3002_v1 = vrot.slane %v2987_v50, 4  ;;  %vm11788_vm10 = vmmov %vm11787_vm1 }
 0x469   : > { %v3079_v29 = vpop.permute.xlu0 %3078  ;;  %6264 = vmatpush1.bf16.msra.mxu1 %v6664_v9  ;;  %v3595_v46 = vsel %vm11769_vm12, %v9767_v13, %v3594_v23  ;;  %6295 = vmatprep.mubr.bf16.mxu1 %v11629_v4  ;;  %v3504_v13 = vsel %vm11775_vm15, %v11774_v5, %v3493_v0  ;;  %v3097_v4 = vsel %vm11776_vm0, %v9979_v45, %v3096_v11  ;;  %vm11791_vm12 = vcmask 80896   ;;  %vm11796_vm15 = vmmov %vm11761_vm3 }
 0x46a   : > { %v2905_v3 = vpop.permute.xlu1 %2904  ;;  %v3089_v18 = vrot.slane %v3079_v29, 4  ;;  %v6702_v31 = vcombine.low %v3587_v47, %v3595_v46  ;;  %v6703_v2 = vcombine.high %v3587_v47, %v3595_v46  ;;  %v11778_v46 = vrot.slane %v9813_v14, 4  ;;  %vm11792_vm13 = vmmov %vm11791_vm12 }
 0x46b   : > { %vm11798_vm0 = vmmov %vm11761_vm3 }
 0x46c   : > { %v3104_v9 = vsel %vm11773_vm14, %v11772_v58, %v3089_v18  ;;  %6203 = vmatprep.subr.bf16.mxu0 %v6703_v2  ;;  %v3411_v18 = vrot.slane %v10453_v33, 4  ;;  %vm11794_vm14 = vmmov %vm11761_vm3 }
 0x46d   : > { %v10479_v52 = vpop.permute.xlu0 %3486  ;;  %6204 = vmatpush2.bf16.msra.mxu0 %v6702_v31  ;;  %v3105_v63 = vsel %vm11777_vm2, %v10067_v59, %v3104_v9  ;;  %v3505_v59 = vsel %vm11780_vm8, %v9726_v24, %v3504_v13  ;;  %v11782_v31 = vrot.slane %v10025_v42, 4  ;;  %v11785_v24 = vrot.slane %v9773_v36, 4  ;;  %vm11802_vm8 = vmmov %vm11798_vm0 }
 0x46e   : > { %v10485_v27 = vpop.permute.xlu1 %3312  ;;  %v3498_v23 = vrot.slane %v10479_v52, 4  ;;  %v6656_v29 = vcombine.low %v3097_v4, %v3105_v63  ;;  %v6657_v47 = vcombine.high %v3097_v4, %v3105_v63  ;;  %v11783_v4 = vrot.slane %v10111_v48, 4 }
 0x46f   : > { %v3014_v2 = vsel %vm11761_vm3, %v11782_v31, %v3002_v1  ;;  %v3422_v13 = vsel %vm11786_vm4, %v11785_v24, %v3411_v18  ;;  %vm11799_vm2 = vcmask 818176   ;;  %vm11808_vm4 = vmmov %vm11798_vm0 }
 0x470   : > { %v3512_v22 = vsel %vm11779_vm7, %v11778_v46, %v3498_v23  ;;  %6265 = vmatprep.subr.bf16.mxu1 %v6657_v47  ;;  %v3015_v1 = vsel %vm11787_vm1, %v10025_v42, %v3014_v2  ;;  %v2920_v46 = vrot.slane %v2905_v3, 4  ;;  %vm11800_vm7 = vmmov %vm11799_vm2 }
 0x471   : > { %v2997_v45 = vpop.permute.xlu0 %2996  ;;  %6266 = vmatpush1.bf16.msra.mxu1 %v6656_v29  ;;  %v3513_v50 = vsel %vm11781_vm9, %v9813_v14, %v3512_v22  ;;  %vm11803_vm9 = vcmask 89088   ;;  %vm11810_vm1 = vmmov %vm11798_vm0 }
 0x472   : > { %v2823_v11 = vpop.permute.xlu1 %2822  ;;  %v3007_v58 = vrot.slane %v2997_v45, 4  ;;  %v6694_v9 = vcombine.low %v3505_v59, %v3513_v50  ;;  %v6695_v5 = vcombine.high %v3505_v59, %v3513_v50  ;;  %v11789_v50 = vrot.slane %v9859_v56, 4  ;;  %vm11804_vm3 = vmmov %vm11803_vm9 }
 0x474   : > { %v3022_v63 = vsel %vm11784_vm5, %v11783_v4, %v3007_v58  ;;  %6205 = vmatprep.subr.bf16.mxu0 %v6695_v5  ;;  %v3329_v58 = vrot.slane %v10485_v27, 4  ;;  %vm11806_vm5 = vmmov %vm11798_vm0 }
 0x475   : > { %v10509_v14 = vpop.permute.xlu0 %3404  ;;  %6206 = vmatpush2.bf16.msra.mxu0 %v6694_v9  ;;  %v3023_v29 = vsel %vm11788_vm10, %v10111_v48, %v3022_v63  ;;  %v3423_v48 = vsel %vm11791_vm12, %v9773_v36, %v3422_v13  ;;  %v11793_v9 = vrot.slane %v10073_v21, 4  ;;  %v11797_v36 = vrot.slane %v9819_v37, 4  ;;  %vm11814_vm12 = vmmov %vm11798_vm0 }
 0x476   : > { %v10515_v47 = vpop.permute.xlu1 %3230  ;;  %v3416_v22 = vrot.slane %v10509_v14, 4  ;;  %v6648_v45 = vcombine.low %v3015_v1, %v3023_v29  ;;  %v6649_v59 = vcombine.high %v3015_v1, %v3023_v29  ;;  %v11795_v1 = vrot.slane %v10155_v12, 4 }
 0x477   : > { %v2932_v5 = vsel %vm11794_vm14, %v11793_v9, %v2920_v46  ;;  %v3340_v13 = vsel %vm11798_vm0, %v11797_v36, %v3329_v58  ;;  %vm11811_vm10 = vcmask 826368  }
 0x478   : > { %v3430_v31 = vsel %vm11790_vm11, %v11789_v50, %v3416_v22  ;;  %6267 = vmatprep.subr.bf16.mxu1 %v6649_v59  ;;  %v2933_v46 = vsel %vm11799_vm2, %v10073_v21, %v2932_v5  ;;  %v2838_v50 = vrot.slane %v2823_v11, 4  ;;  %v3341_v21 = vsel %vm11803_vm9, %v9819_v37, %v3340_v13  ;;  %vm11812_vm11 = vmmov %vm11811_vm10 }
 0x479   : > { %v2915_v42 = vpop.permute.xlu0 %2914  ;;  %6268 = vmatpush1.bf16.msra.mxu1 %v6648_v45  ;;  %v3431_v3 = vsel %vm11792_vm13, %v9859_v56, %v3430_v31  ;;  %v11805_v5 = vrot.slane %v10117_v49, 4  ;;  %v11809_v37 = vrot.slane %v9865_v10, 4  ;;  %vm11815_vm13 = vcmask 728064   ;;  %vm11821_vm2 = vmmov %vm11798_vm0 }
 0x47a   : > { %v2741_v2 = vpop.permute.xlu1 %2740  ;;  %v2925_v4 = vrot.slane %v2915_v42, 4  ;;  %v6686_v63 = vcombine.low %v3423_v48, %v3431_v3  ;;  %v6687_v24 = vcombine.high %v3423_v48, %v3431_v3  ;;  %v11801_v3 = vrot.slane %v9905_v8, 4  ;;  %vm11816_vm14 = vmmov %vm11815_vm13 }
 0x47b   : > { %vm11825_vm9 = vmmov %vm11798_vm0 }
 0x47c   : > { %v2940_v29 = vsel %vm11796_vm15, %v11795_v1, %v2925_v4  ;;  %6207 = vmatprep.subr.bf16.mxu0 %v6687_v24  ;;  %v3247_v4 = vrot.slane %v10515_v47, 4  ;;  %v2850_v24 = vsel %vm11806_vm5, %v11805_v5, %v2838_v50  ;;  %vm11818_vm15 = vmmov %vm11798_vm0 }
 0x47d   : > { %v10539_v56 = vpop.permute.xlu0 %3322  ;;  %6208 = vmatpush2.bf16.msra.mxu0 %v6686_v63  ;;  %v2941_v45 = vsel %vm11800_vm7, %v10155_v12, %v2940_v29  ;;  %v2851_v50 = vsel %vm11811_vm10, %v10117_v49, %v2850_v24  ;;  %v11817_v24 = vrot.slane %v10161_v6, 4  ;;  %vm11822_vm7 = vcmask 891904  }
 0x47e   : > { %v4397_v59 = vpop.permute.xlu1 %4396  ;;  %v3334_v31 = vrot.slane %v10539_v56, 4  ;;  %v6640_v42 = vcombine.low %v2933_v46, %v2941_v45  ;;  %v6641_v48 = vcombine.high %v2933_v46, %v2941_v45  ;;  %v11807_v46 = vrot.slane %v10199_v51, 4 }
 0x47f   : > { %v3258_v13 = vsel %vm11810_vm1, %v11809_v37, %v3247_v4  ;;  %vm11837_vm1 = vmmov %vm11798_vm0  ;;  %vm11842_vm10 = vcmask 228352  }
 0x480   : > { %v3348_v9 = vsel %vm11802_vm8, %v11801_v3, %v3334_v31  ;;  %6269 = vmatprep.subr.bf16.mxu1 %v6641_v48  ;;  %v2756_v3 = vrot.slane %v2741_v2, 4  ;;  %v3259_v49 = vsel %vm11815_vm13, %v9865_v10, %v3258_v13  ;;  %vm11823_vm8 = vmmov %vm11822_vm7  ;;  %vm11851_vm13 = vcmask 236544  }
 0x481   : > { %v2833_v63 = vpop.permute.xlu0 %2832  ;;  %6270 = vmatpush1.bf16.msra.mxu1 %v6640_v42  ;;  %v3349_v12 = vsel %vm11804_vm3, %v9905_v8, %v3348_v9  ;;  %vm11826_vm3 = vcmask 220160  }
 0x482   : > { %v4315_v11 = vpop.permute.xlu1 %4314  ;;  %v2843_v1 = vrot.slane %v2833_v63, 4  ;;  %v6678_v29 = vcombine.low %v3341_v21, %v3349_v12  ;;  %v6679_v36 = vcombine.high %v3341_v21, %v3349_v12  ;;  %v11813_v12 = vrot.slane %v9950_v30, 4  ;;  %vm11827_vm5 = vmmov %vm11826_vm3 }
 0x484   : > { %v2858_v45 = vsel %vm11808_vm4, %v11807_v46, %v2843_v1  ;;  %6209 = vmatprep.subr.bf16.mxu0 %v6679_v36  ;;  %v4412_v1 = vrot.slane %v4397_v59, 4  ;;  %v2768_v36 = vsel %vm11818_vm15, %v11817_v24, %v2756_v3  ;;  %vm11831_vm4 = vmmov %vm11798_vm0 }
 0x485   : > { %v10567_v8 = vpop.permute.xlu0 %3240  ;;  %6210 = vmatpush2.bf16.msra.mxu0 %v6678_v29  ;;  %v2859_v42 = vsel %vm11812_vm11, %v10199_v51, %v2858_v45  ;;  %vm11843_vm11 = vmmov %vm11842_vm10 }
 0x486   : > { %v4233_v48 = vpop.permute.xlu1 %4232  ;;  %v11188_v9 = vrot.slane %v10567_v8, 4  ;;  %v6632_v63 = vcombine.low %v2851_v50, %v2859_v42  ;;  %v6633_v21 = vcombine.high %v2851_v50, %v2859_v42  ;;  %v11819_v50 = vrot.slane %v10243_v26, 4  ;;  %vm11853_vm15 = vmmov %vm11798_vm0 }
 0x487   : > { %v11820_v42 = vrot.slane %v9911_v41, 4  ;;  %v4248_v24 = vrot.slane %v4233_v48, 4 }
 0x488   : > { %v3266_v5 = vsel %vm11814_vm12, %v11813_v12, %v11188_v9  ;;  %6271 = vmatprep.subr.bf16.mxu1 %v6633_v21  ;;  %v4330_v21 = vrot.slane %v4315_v11, 4  ;;  %v11847_v9 = vld [vmem:[#allocation31_spill] sm:$0xff]  ;;  %vm11849_vm12 = vmmov %vm11798_vm0 }
 0x489   : > { %v2751_v29 = vpop.permute.xlu0 %2750  ;;  %6272 = vmatpush1.bf16.msra.mxu1 %v6632_v63  ;;  %v3267_v51 = vsel %vm11816_vm14, %v9950_v30, %v3266_v5  ;;  %v4424_v10 = vsel %vm11821_vm2, %v11820_v42, %v4412_v1  ;;  %v2769_v30 = vsel %vm11822_vm7, %v10161_v6, %v2768_v36  ;;  %v11828_v36 = vld [vmem:[#allocation28_spill] sm:$0xff]  ;;  %v11832_v42 = vld [vmem:[#allocation45_spill] sm:$0xff]  ;;  %vm11852_vm14 = vmmov %vm11851_vm13  ;;  %vm11858_vm7 = vcmask 973824  }
 0x48a   : > { %v3741_v2 = vpop.permute.xlu1 %3740  ;;  %v2761_v46 = vrot.slane %v2751_v29, 4  ;;  %v6670_v45 = vcombine.low %v3259_v49, %v3267_v51  ;;  %v6671_v37 = vcombine.high %v3259_v49, %v3267_v51  ;;  %v11824_v49 = vrot.slane %v10000_v19, 4  ;;  %vm11857_vm2 = vmmov %vm11798_vm0 }
 0x48b   : > { %v4425_v6 = vsel %vm11826_vm3, %v9911_v41, %v4424_v10  ;;  %v11835_v41 = vld [vmem:[#allocation29_spill] sm:$0xff]  ;;  %vm11863_vm3 = vcmask 302080  }
 0x48c   : > { %v2776_v59 = vsel %vm11798_vm0, %v11819_v50, %v2761_v46  ;;  %6211 = vmatprep.subr.bf16.mxu0 %v6671_v37  ;;  %v11836_v10 = vrot.slane %v11835_v41, 4 }
 0x48d   : > { %v4407_v13 = vpop.permute.xlu0 %4406  ;;  %6212 = vmatpush2.bf16.msra.mxu0 %v6670_v45  ;;  %v2777_v3 = vsel %vm11823_vm8, %v10243_v26, %v2776_v59  ;;  %v11829_v45 = vld [vmem:[#allocation25_spill] sm:$0xff]  ;;  %vm11859_vm8 = vmmov %vm11858_vm7 }
 0x48e   : > { %v4151_v63 = vpop.permute.xlu1 %4150  ;;  %v4417_v12 = vrot.slane %v4407_v13, 4  ;;  %v6624_v5 = vcombine.low %v2769_v30, %v2777_v3  ;;  %v6625_v29 = vcombine.high %v2769_v30, %v2777_v3  ;;  %v11830_v37 = vrot.slane %v11829_v45, 4  ;;  %v11833_v13 = vld [vmem:[#allocation46_spill] sm:$0xff] }
 0x48f   : > { %v11834_v48 = vcombine.high %v11832_v42, %v11833_v13 }
 0x490   : > { %v4432_v51 = vsel %vm11825_vm9, %v11824_v49, %v4417_v12  ;;  %6214 = vmatmul.mubr.bf16.vlgmr.msra.gmra.mxu0 %v9554_v38  ;;  %6273 = vmatprep.subr.bf16.mxu1 %v6625_v29  ;;  %v10600_v1 = vpop.f32.mrf.mxu0  ;;  %v4342_v50 = vsel %vm11831_vm4, %v11830_v37, %v4330_v21  ;;  %v11838_v29 = vld [vmem:[#allocation27_spill] sm:$0xff]  ;;  %v3756_v37 = vrot.slane %v3741_v2, 4  ;;  %vm11862_vm9 = vmmov %vm11798_vm0 }
 0x491   : > { %v4325_v46 = vpop.permute.xlu0 %4324  ;;  %6274 = vmatpush1.bf16.msra.mxu1 %v6624_v5  ;;  %v4433_v26 = vsel %vm11827_vm5, %v10000_v19, %v4432_v51  ;;  %6821 = vmatprep.mubr.msk.bf16.mxu0 %vm6013_vm6, %v11828_v36  ;;  %v11839_v49 = vrot.slane %v11838_v29, 4  ;;  %vm11840_vm6 = vmmov %vm11798_vm0 }
 0x492   : > { %v3659_v11 = vpop.permute.xlu1 %3658  ;;  %v4335_v59 = vrot.slane %v4325_v46, 4  ;;  %6275 = vmatprep.subr.bf16.mxu1 %v11834_v48  ;;  %v6792_v30 = vcombine.low %v4425_v6, %v4433_v26  ;;  %v6793_v3 = vcombine.high %v4425_v6, %v4433_v26  ;;  %v10614_v12 = vpop.f32.mrf.mxu0  ;;  %v11841_v46 = vcombine.low %v11832_v42, %v11833_v13  ;;  %v11844_v48 = vld [vmem:[#allocation40_spill] sm:$0xff]  ;;  %vm11864_vm5 = vmmov %vm11863_vm3 }
 0x493   : > { %v4260_v51 = vsel %vm11840_vm6, %v11839_v49, %v4248_v24  ;;  %v4343_v6 = vsel %vm11842_vm10, %v11829_v45, %v4342_v50  ;;  %v11848_v42 = vrot.slane %v11847_v9, 4  ;;  %vm11866_vm4 = vmmov %vm11798_vm0  ;;  %vm11872_vm10 = vcmask 1039360  }
 0x494   : > { %v4350_v19 = vsel %vm11837_vm1, %v11836_v10, %v4335_v59  ;;  %6304 = vmatprep.subr.bf16.mxu0 %v6793_v3  ;;  %v6055_v5 = vpop.f32.mrf.mxu0  ;;  %v11845_v3 = vld [vmem:[#allocation41_spill] sm:$0xff]  ;;  %v4261_v2 = vsel %vm11851_vm13, %v11838_v29, %v4260_v51  ;;  %vm11868_vm1 = vmmov %vm11798_vm0  ;;  %vm11877_vm13 = vcmask 310272  }
 0x495   : > { %v4243_v21 = vpop.permute.xlu0 %4242  ;;  %6276 = vmatpush1.bf16.msra.mxu1 %v11841_v46  ;;  %6305 = vmatpush1.bf16.msra.mxu0 %v6792_v30  ;;  %v4351_v26 = vsel %vm11843_vm11, %v11835_v41, %v4350_v19  ;;  %v11846_v10 = vcombine.high %v11844_v48, %v11845_v3  ;;  %v4166_v30 = vrot.slane %v4151_v63, 4  ;;  %v11850_v50 = vcombine.low %v11844_v48, %v11845_v3  ;;  %v11855_v48 = vld [vmem:[#allocation30_spill] sm:$0xff]  ;;  %vm11871_vm6 = vmmov %vm11798_vm0 }
 0x496   : > { %v4069_v36 = vpop.permute.xlu1 %4068  ;;  %v4253_v59 = vrot.slane %v4243_v21, 4  ;;  %v6784_v24 = vcombine.low %v4343_v6, %v4351_v26  ;;  %v6785_v5 = vcombine.high %v4343_v6, %v4351_v26  ;;  %v6056_v49 = vpop.f32.mrf.mxu0  ;;  %v3768_v21 = vsel %vm11853_vm15, %v3755_v57, %v3756_v37  ;;  %vm11873_vm11 = vmmov %vm11872_vm10 }
 0x497   : > { %6277 = vmatprep.subr.bf16.mxu1 %v11846_v10  ;;  %v11854_v26 = vrot.slane %v10345_v62, 4  ;;  %v11856_v3 = vrot.slane %v11855_v48, 4  ;;  %v3674_v10 = vrot.slane %v3659_v11, 4  ;;  %v11865_v11 = vrot.slane %v10293_v20, 4  ;;  %vm11881_vm15 = vmmov %vm11798_vm0 }
 0x498   : > { %v4268_v13 = vsel %vm11849_vm12, %v11848_v42, %v4253_v59  ;;  %6306 = vmatprep.subr.bf16.mxu0 %v6785_v5  ;;  %v11860_v42 = vld [vmem:[#allocation34_spill] sm:$0xff]  ;;  %vm11876_vm12 = vmmov %vm11798_vm0 }
 0x499   : > { %v3751_v45 = vpop.permute.xlu0 %3750  ;;  %6278 = vmatpush1.bf16.msra.mxu1 %v11850_v50  ;;  %6307 = vmatpush1.bf16.msra.mxu0 %v6784_v24  ;;  %v4269_v41 = vsel %vm11852_vm14, %v11847_v9, %v4268_v13  ;;  %v4178_v29 = vsel %vm11857_vm2, %v11856_v3, %v4166_v30  ;;  %v3769_v9 = vsel %vm11858_vm7, %v10249_v55, %v3768_v21  ;;  %v11861_v13 = vrot.slane %v11860_v42, 4  ;;  %vm11878_vm14 = vmmov %vm11877_vm13 }
 0x49a   : > { %v3987_v19 = vpop.permute.xlu1 %3986  ;;  %v3761_v46 = vrot.slane %v3751_v45, 4  ;;  %v6776_v6 = vcombine.low %v4261_v2, %v4269_v41  ;;  %v6777_v63 = vcombine.high %v4261_v2, %v4269_v41  ;;  %v4084_v50 = vrot.slane %v4069_v36, 4  ;;  %vm11883_vm2 = vmmov %vm11798_vm0 }
 0x49b   : > { %v4179_v2 = vsel %vm11863_vm3, %v11855_v48, %v4178_v29  ;;  %v3686_v41 = vsel %vm11866_vm4, %v11865_v11, %v3674_v10  ;;  %vm11884_vm7 = vcmask 318464   ;;  %vm11887_vm3 = vcmask 7168   ;;  %vm11890_vm4 = vmmov %vm11798_vm0 }
 0x49c   : > { %v3776_v59 = vsel %vm11798_vm0, %v11854_v26, %v3761_v46  ;;  %6308 = vmatprep.subr.bf16.mxu0 %v6777_v63  ;;  %v11867_v63 = vrot.slane %v10392_v15, 4  ;;  %v11869_v26 = vld [vmem:[#allocation33_spill] sm:$0xff]  ;;  %v3687_v29 = vsel %vm11872_vm10, %v10293_v20, %v3686_v41  ;;  %vm11894_vm10 = vcmask 957440  }
 0x49d   : > { %v4161_v51 = vpop.permute.xlu0 %4160  ;;  %6309 = vmatpush1.bf16.msra.mxu0 %v6776_v6  ;;  %v3777_v57 = vsel %vm11859_vm8, %v10345_v62, %v3776_v59  ;;  %v11870_v59 = vrot.slane %v11869_v26, 4  ;;  %vm11885_vm8 = vmmov %vm11884_vm7 }
 0x49e   : > { %v3561_v37 = vpop.permute.xlu1 %3560  ;;  %v4171_v24 = vrot.slane %v4161_v51, 4  ;;  %v6728_v5 = vcombine.low %v3769_v9, %v3777_v57  ;;  %v6729_v49 = vcombine.high %v3769_v9, %v3777_v57  ;;  %v4002_v57 = vrot.slane %v3987_v19, 4  ;;  %v11879_v19 = vld [vmem:[#allocation35_spill] sm:$0xff] }
 0x49f   : > { %v4096_v48 = vsel %vm11871_vm6, %v11870_v59, %v4084_v50  ;;  %v3576_v50 = vrot.slane %v3561_v37, 4  ;;  %v11882_v37 = vrot.slane %v10225_v25, 4  ;;  %vm11893_vm6 = vmmov %vm11798_vm0 }
 0x4a0   : > { %v4186_v45 = vsel %vm11862_vm9, %v11861_v13, %v4171_v24  ;;  %6279 = vmatprep.subr.bf16.mxu1 %v6729_v49  ;;  %v11874_v49 = vld [vmem:[#allocation36_spill] sm:$0xff]  ;;  %v4097_v20 = vsel %vm11877_vm13, %v11869_v26, %v4096_v48  ;;  %vm11886_vm9 = vmmov %vm11798_vm0  ;;  %vm11897_vm13 = vcmask 72704  }
 0x4a1   : > { %v3669_v30 = vpop.permute.xlu0 %3668  ;;  %6280 = vmatpush2.bf16.msra.mxu1 %v6728_v5  ;;  %v4187_v55 = vsel %vm11864_vm5, %v11860_v42, %v4186_v45  ;;  %v11875_v42 = vrot.slane %v11874_v49, 4  ;;  %v6942_v45 = vld [vmem:[#allocation3 + $0x20] ss:$40 sps:$4 sm:$0xff]   ;;  %vm11888_vm5 = vmmov %vm11887_vm3 }
 0x4a2   : > { %v3905_v62 = vpop.permute.xlu1 %3904  ;;  %v3679_v21 = vrot.slane %v3669_v30, 4  ;;  %v6768_v46 = vcombine.low %v4179_v2, %v4187_v55  ;;  %v6769_v6 = vcombine.high %v4179_v2, %v4187_v55  ;;  %v11880_v55 = vrot.slane %v11879_v19, 4 }
 0x4a4   : > { %v3694_v36 = vsel %vm11868_vm1, %v11867_v63, %v3679_v21  ;;  %6310 = vmatprep.subr.bf16.mxu0 %v6769_v6  ;;  %v4014_v11 = vsel %vm11881_vm15, %v11880_v55, %v4002_v57  ;;  %v6940_v6 = vld [vmem:[#allocation3 + $0x1c] ss:$40 sps:$4 sm:$0xff]   ;;  %vm11892_vm1 = vmmov %vm11798_vm0 }
 0x4a5   : > { %v4079_v3 = vpop.permute.xlu0 %4078  ;;  %6311 = vmatpush1.bf16.msra.mxu0 %v6768_v46  ;;  %v3695_v51 = vsel %vm11873_vm11, %v10392_v15, %v3694_v36  ;;  %v3588_v36 = vsel %vm11883_vm2, %v3575_v17, %v3576_v50  ;;  %v4015_v59 = vsel %vm11884_vm7, %v11879_v19, %v4014_v11  ;;  %vm11895_vm11 = vmmov %vm11894_vm10  ;;  %vm11905_vm7 = vcmask 965632  }
 0x4a6   : > { %v3479_v9 = vpop.permute.xlu1 %3478  ;;  %v4089_v10 = vrot.slane %v4079_v3, 4  ;;  %v6720_v24 = vcombine.low %v3687_v29, %v3695_v51  ;;  %v6721_v5 = vcombine.high %v3687_v29, %v3695_v51  ;;  %v3920_v29 = vrot.slane %v3905_v62, 4  ;;  %vm11901_vm15 = vmmov %vm11798_vm0 }
 0x4a7   : > { %v3494_v17 = vrot.slane %v3479_v9, 4  ;;  %vm11904_vm2 = vmmov %vm11798_vm0 }
 0x4a8   : > { %v4104_v13 = vsel %vm11876_vm12, %v11875_v42, %v4089_v10  ;;  %6281 = vmatprep.subr.bf16.mxu1 %v6721_v5  ;;  %vm11896_vm12 = vmmov %vm11798_vm0 }
 0x4a9   : > { %v3997_v30 = vpop.permute.xlu0 %3996  ;;  %6282 = vmatpush2.bf16.msra.mxu1 %v6720_v24  ;;  %v4105_v15 = vsel %vm11878_vm14, %v11874_v49, %v4104_v13  ;;  %v3589_v49 = vsel %vm11887_vm3, %v10381_v32, %v3588_v36  ;;  %v3506_v32 = vsel %vm11893_vm6, %v3493_v0, %v3494_v17  ;;  %vm11898_vm14 = vmmov %vm11897_vm13  ;;  %vm11908_vm3 = vcmask 80896  }
 0x4aa   : > { %v3823_v2 = vpop.permute.xlu1 %3822  ;;  %v4007_v41 = vrot.slane %v3997_v30, 4  ;;  %6283 = vmatprep.subr.bf16.mxu1 %v6942_v45  ;;  %v6760_v21 = vcombine.low %v4097_v20, %v4105_v15  ;;  %v6761_v46 = vcombine.high %v4097_v20, %v4105_v15  ;;  %vm11915_vm6 = vmmov %vm11798_vm0 }
 0x4ab   : > { %v3838_v19 = vrot.slane %v3823_v2, 4 }
 0x4ac   : > { %v4022_v63 = vsel %vm11798_vm0, %v11882_v37, %v4007_v41  ;;  %6312 = vmatprep.subr.bf16.mxu0 %v6761_v46  ;;  %v3507_v37 = vsel %vm11897_vm13, %v10421_v44, %v3506_v32  ;;  %v11913_v32 = vrot.slane %v10316_v43, 4  ;;  %vm11919_vm13 = vcmask 89088  }
 0x4ad   : > { %v3571_v26 = vpop.permute.xlu0 %3570  ;;  %6284 = vmatpush2.bf16.msra.mxu1 %v6940_v6  ;;  %6313 = vmatpush1.bf16.msra.mxu0 %v6760_v21  ;;  %v4023_v48 = vsel %vm11885_vm8, %v10225_v25, %v4022_v63  ;;  %v11889_v25 = vrot.slane %v10187_v40, 4  ;;  %vm11906_vm8 = vmmov %vm11905_vm7 }
 0x4ae   : > { %v3397_v3 = vpop.permute.xlu1 %3396  ;;  %v3581_v51 = vrot.slane %v3571_v26, 4  ;;  %v6752_v57 = vcombine.low %v4015_v59, %v4023_v48  ;;  %v6753_v10 = vcombine.high %v4015_v59, %v4023_v48  ;;  %v11902_v48 = vld [vmem:[#allocation44_spill] sm:$0xff] }
 0x4af   : > { %v3932_v62 = vsel %vm11890_vm4, %v11889_v25, %v3920_v29  ;;  %v3412_v6 = vrot.slane %v3397_v3, 4  ;;  %vm11912_vm4 = vmmov %vm11798_vm0 }
 0x4b0   : > { %v3596_v24 = vsel %vm11886_vm9, %v3580_v28, %v3581_v51  ;;  %6314 = vmatprep.subr.bf16.mxu0 %v6753_v10  ;;  %v11891_v28 = vrot.slane %v10269_v53, 4  ;;  %vm11907_vm9 = vmmov %vm11798_vm0 }
 0x4b1   : > { %v3915_v5 = vpop.permute.xlu0 %3914  ;;  %6315 = vmatpush1.bf16.msra.mxu0 %v6752_v57  ;;  %v3597_v42 = vsel %vm11888_vm5, %v10447_v60, %v3596_v24  ;;  %v3933_v60 = vsel %vm11894_vm10, %v10187_v40, %v3932_v62  ;;  %v3424_v3 = vsel %vm11904_vm2, %v3411_v18, %v3412_v6  ;;  %vm11909_vm5 = vmmov %vm11908_vm3  ;;  %vm11916_vm10 = vcmask 138240  }
 0x4b2   : > { %v3925_v13 = vrot.slane %v3915_v5, 4  ;;  %v6704_v45 = vcombine.low %v3589_v49, %v3597_v42  ;;  %v6705_v50 = vcombine.high %v3589_v49, %v3597_v42  ;;  %v4643_v30 = vpop.permute.xlu1 %4642  ;;  %v3425_v25 = vsel %vm11908_vm3, %v10453_v33, %v3424_v3  ;;  %vm11924_vm2 = vmmov %vm11798_vm0 }
 0x4b3   : > { %v4658_v57 = vrot.slane %v4643_v30, 4  ;;  %vm11930_vm3 = vcmask 728064  }
 0x4b4   : > { %v3940_v9 = vsel %vm11892_vm1, %v11891_v28, %v3925_v13  ;;  %6285 = vmatprep.subr.bf16.mxu1 %v6705_v50  ;;  %v11910_v13 = vld [vmem:[#allocation32_spill] sm:$0xff]  ;;  %vm11914_vm1 = vmmov %vm11798_vm0 }
 0x4b5   : > { %v3489_v20 = vpop.permute.xlu0 %3488  ;;  %6286 = vmatpush2.bf16.msra.mxu1 %v6704_v45  ;;  %v3941_v15 = vsel %vm11895_vm11, %v10269_v53, %v3940_v9  ;;  %v11899_v53 = vld [vmem:[#allocation37_spill] sm:$0xff]  ;;  %v11911_v45 = vrot.slane %v11910_v13, 4  ;;  %vm11917_vm11 = vmmov %vm11916_vm10 }
 0x4b6   : > { %v3499_v55 = vrot.slane %v3489_v20, 4  ;;  %v6744_v11 = vcombine.low %v3933_v60, %v3941_v15  ;;  %v6745_v41 = vcombine.high %v3933_v60, %v3941_v15  ;;  %v3315_v46 = vpop.permute.xlu1 %3314  ;;  %v11900_v2 = vrot.slane %v11899_v53, 4 }
 0x4b7   : > { %v3330_v42 = vrot.slane %v3315_v46, 4  ;;  %v4670_v50 = vsel %vm11912_vm4, %v11911_v45, %v4658_v57  ;;  %vm11933_vm4 = vmmov %vm11798_vm0 }
 0x4b8   : > { %v3514_v21 = vsel %vm11896_vm12, %v3498_v23, %v3499_v55  ;;  %6316 = vmatprep.subr.bf16.mxu0 %v6745_v41  ;;  %v3850_v63 = vsel %vm11901_vm15, %v11900_v2, %v3838_v19  ;;  %v11903_v23 = vrot.slane %v11902_v48, 4  ;;  %vm11918_vm12 = vmmov %vm11798_vm0 }
 0x4b9   : > { %v3833_v0 = vpop.permute.xlu0 %3832  ;;  %6317 = vmatpush1.bf16.msra.mxu0 %v6744_v11  ;;  %v3515_v40 = vsel %vm11898_vm14, %v10479_v52, %v3514_v21  ;;  %v3851_v52 = vsel %vm11905_vm7, %v11899_v53, %v3850_v63  ;;  %v3342_v33 = vsel %vm11915_vm6, %v3329_v58, %v3330_v42  ;;  %vm11920_vm14 = vmmov %vm11919_vm13  ;;  %vm11925_vm7 = vcmask 146432  }
 0x4ba   : > { %v3843_v36 = vrot.slane %v3833_v0, 4  ;;  %v6696_v26 = vcombine.low %v3507_v37, %v3515_v40  ;;  %v6697_v59 = vcombine.high %v3507_v37, %v3515_v40  ;;  %v4561_v24 = vpop.permute.xlu1 %4560  ;;  %v3343_v58 = vsel %vm11919_vm13, %v10485_v27, %v3342_v33  ;;  %vm11922_vm15 = vmmov %vm11798_vm0 }
 0x4bb   : > { %v4576_v19 = vrot.slane %v4561_v24, 4  ;;  %vm11936_vm6 = vcmask 154624  }
 0x4bc   : > { %v3858_v29 = vsel %vm11798_vm0, %v11903_v23, %v3843_v36  ;;  %6287 = vmatprep.subr.bf16.mxu1 %v6697_v59 }
 0x4bd   : > { %v3407_v44 = vpop.permute.xlu0 %3406  ;;  %6288 = vmatpush2.bf16.msra.mxu1 %v6696_v26  ;;  %v3859_v51 = vsel %vm11906_vm8, %v11902_v48, %v3858_v29  ;;  %vm11926_vm8 = vmmov %vm11925_vm7 }
 0x4be   : > { %v3417_v10 = vrot.slane %v3407_v44, 4  ;;  %v6736_v17 = vcombine.low %v3851_v52, %v3859_v51  ;;  %v6737_v5 = vcombine.high %v3851_v52, %v3859_v51  ;;  %v3233_v20 = vpop.permute.xlu1 %3232  ;;  %v11927_v51 = vrot.slane %v10567_v8, 4 }
 0x4bf   : > { %v3248_v46 = vrot.slane %v3233_v20, 4 }
 0x4c0   : > { %v3432_v49 = vsel %vm11907_vm9, %v3416_v22, %v3417_v10  ;;  %6318 = vmatprep.subr.bf16.mxu0 %v6737_v5  ;;  %vm11928_vm9 = vmmov %vm11798_vm0 }
 0x4c1   : > { %v4653_v18 = vpop.permute.xlu0 %4652  ;;  %6319 = vmatpush1.bf16.msra.mxu0 %v6736_v17  ;;  %v3433_v62 = vsel %vm11909_vm5, %v10509_v14, %v3432_v49  ;;  %v4671_v14 = vsel %vm11916_vm10, %v11910_v13, %v4670_v50  ;;  %v3260_v27 = vsel %vm11924_vm2, %v3247_v4, %v3248_v46  ;;  %vm11931_vm5 = vmmov %vm11930_vm3 }
 0x4c2   : > { %v4663_v30 = vrot.slane %v4653_v18, 4  ;;  %v6688_v28 = vcombine.low %v3425_v25, %v3433_v62  ;;  %v6689_v9 = vcombine.high %v3425_v25, %v3433_v62  ;;  %v4479_v40 = vpop.permute.xlu1 %4478  ;;  %v3261_v24 = vsel %vm11930_vm3, %v10515_v47, %v3260_v27  ;;  %vm11937_vm10 = vmmov %vm11936_vm6 }
 0x4c3   : > { %v4494_v48 = vrot.slane %v4479_v40, 4  ;;  %v11934_v62 = vrot.slane %v10415_v54, 4 }
 0x4c4   : > { %v4678_v22 = vsel %vm11914_vm1, %v11913_v32, %v4663_v30  ;;  %6289 = vmatprep.subr.bf16.mxu1 %v6689_v9  ;;  %vm11935_vm1 = vmmov %vm11798_vm0 }
 0x4c5   : > { %v3325_v60 = vpop.permute.xlu0 %3324  ;;  %6290 = vmatpush2.bf16.msra.mxu1 %v6688_v28  ;;  %v4679_v15 = vsel %vm11917_vm11, %v10316_v43, %v4678_v22  ;;  %v11921_v43 = vrot.slane %v10275_v16, 4 }
 0x4c6   : > { %v3335_v55 = vrot.slane %v3325_v60, 4  ;;  %v6816_v11 = vcombine.low %v4671_v14, %v4679_v15  ;;  %v6817_v41 = vcombine.high %v4671_v14, %v4679_v15 }
 0x4c7   : > { %v4588_v37 = vsel %vm11922_vm15, %v11921_v43, %v4576_v19 }
 0x4c8   : > { %v3350_v21 = vsel %vm11918_vm12, %v3334_v31, %v3335_v55  ;;  %6330 = vmatprep.subr.bf16.mxu0 %v6817_v41  ;;  %v11923_v31 = vrot.slane %v10375_v39, 4 }
 0x4c9   : > { %v4571_v6 = vpop.permute.xlu0 %4570  ;;  %6331 = vmatpush2.bf16.msra.mxu0 %v6816_v11  ;;  %v3351_v0 = vsel %vm11920_vm14, %v10539_v56, %v3350_v21  ;;  %v4589_v56 = vsel %vm11925_vm7, %v10275_v16, %v4588_v37 }
 0x4ca   : > { %v4581_v53 = vrot.slane %v4571_v6, 4  ;;  %v6680_v2 = vcombine.low %v3343_v58, %v3351_v0  ;;  %v6681_v63 = vcombine.high %v3343_v58, %v3351_v0 }
 0x4cc   : > { %v4596_v36 = vsel %vm11798_vm0, %v11923_v31, %v4581_v53  ;;  %6291 = vmatprep.subr.bf16.mxu1 %v6681_v63 }
 0x4cd   : > { %v3243_v26 = vpop.permute.xlu0 %3242  ;;  %6292 = vmatpush2.bf16.msra.mxu1 %v6680_v2  ;;  %v4597_v59 = vsel %vm11926_vm8, %v10375_v39, %v4596_v36 }
 0x4ce   : > { %v3253_v23 = vrot.slane %v3243_v26, 4  ;;  %v6808_v29 = vcombine.low %v4589_v56, %v4597_v59  ;;  %v6809_v3 = vcombine.high %v4589_v56, %v4597_v59 }
 0x4cf   : > { %v10775_v44 = vpop.permute.xlu1 %4917 }
 0x4d0   : > { %v6052_v52 = vadd.f32 %v10600_v1, %v10775_v44  ;;  %v6054_v4 = vadd.f32 %v10614_v12, %v10775_v44  ;;  %v3268_v57 = vsel %vm11928_vm9, %v11927_v51, %v3253_v23  ;;  %6332 = vmatprep.subr.bf16.mxu0 %v6809_v3  ;;  %v11932_v12 = vrot.slane %v10325_v61, 4 }
 0x4d1   : > { %v4489_v16 = vpop.permute.xlu0 %4488  ;;  %6333 = vmatpush2.bf16.msra.mxu0 %v6808_v29  ;;  %v3269_v1 = vsel %vm11931_vm5, %v10567_v8, %v3268_v57 }
 0x4d2   : > { %v6093_v39 = vadd.f32 %v10342_v34, %v6052_v52  ;;  %v6095_v10 = vadd.f32 %v10368_v35, %v6054_v4  ;;  %v4506_v17 = vsel %vm11933_vm4, %v11932_v12, %v4494_v48  ;;  %v4499_v5 = vrot.slane %v4489_v16, 4 }
 0x4d3   : > { %v6672_v49 = vcombine.low %v3261_v24, %v3269_v1  ;;  %v6673_v42 = vcombine.high %v3261_v24, %v3269_v1  ;;  %v4507_v35 = vsel %vm11936_vm6, %v10325_v61, %v4506_v17 }
 0x4d4   : > { %v6345_v18 = vmax.f32 %v6093_v39, 0.0  ;;  %v6346_v25 = vmax.f32 %v6095_v10, 0.0  ;;  %v4514_v34 = vsel %vm11935_vm1, %v11934_v62, %v4499_v5 }
 0x4d5   : > { %6293 = vmatprep.subr.bf16.mxu1 %v6673_v42  ;;  %v4515_v47 = vsel %vm11937_vm10, %v10415_v54, %v4514_v34 }
 0x4d6   : > { %6353 = vst [vmem:[%s11929_s18] sm:$0xff] %v6345_v18  ;;  %6354 = vst [vmem:[%s11929_s18 + $0x8] sm:$0xff] %v6346_v25  ;;  %6294 = vmatpush2.bf16.msra.mxu1 %v6672_v49  ;;  %v6800_v8 = vcombine.low %v4507_v35, %v4515_v47  ;;  %v6801_v13 = vcombine.high %v4507_v35, %v4515_v47 }
 0x4d8   : > { %v6133_v45 = vpop.f32.mrf.mxu1  ;;  %6334 = vmatprep.subr.bf16.mxu0 %v6801_v13 }
 0x4d9   : > { %6296 = vmatmul.mubr.bf16.vlgmr.msra.gmra.mxu1 %v9554_v38  ;;  %6335 = vmatpush2.bf16.msra.mxu0 %v6800_v8  ;;  %v6134_v30 = vadd.f32 %v6133_v45, %v10775_v44 }
 0x4da   : > { %v6135_v50 = vpop.f32.mrf.mxu1 }
 0x4db   : > { %v6136_v61 = vadd.f32 %v6135_v50, %v10775_v44 }
 0x4dc   : > { %6337 = vmatmul.mubr.bf16.vlgmr.msra.gmra.mxu0 %v11622_v7  ;;  %v6137_v9 = vpop.f32.mrf.mxu1 }
 0x4dd   : > { %v6174_v28 = vpop.f32.mrf.mxu0 }
 0x4de   : > { %v6175_v32 = vadd.f32 %v6174_v28, %v6134_v30  ;;  %v6138_v22 = vpop.f32.mrf.mxu1 }
 0x4df   : > { %v6176_v54 = vpop.f32.mrf.mxu0 }
 0x4e0   : > { %v6347_v20 = vmax.f32 %v6175_v32, 0.0  ;;  %v6177_v33 = vadd.f32 %v6176_v54, %v6136_v61 }
 0x4e1   : > { %v6178_v60 = vpop.f32.mrf.mxu0 }
 0x4e2   : > { %6355 = vst [vmem:[%s11929_s18 + $0x10] sm:$0xff] %v6347_v20  ;;  %v6348_v38 = vmax.f32 %v6177_v33, 0.0 }
 0x4e3   : > { %v6179_v14 = vpop.f32.mrf.mxu0 }
 0x4e4   : > { %6356 = vst [vmem:[%s11929_s18 + $0x18] sm:$0xff] %v6348_v38 }
 0x528   : > { %v6256_v15 = vpop.f32.mrf.mxu1 }
 0x52a   : > { %v6258_v19 = vpop.f32.mrf.mxu1 }
 0x52c   : > { %v6260_v55 = vpop.f32.mrf.mxu1 }
 0x52e   : > { %v6261_v11 = vpop.f32.mrf.mxu1 }
 0x550   : > { %v6215_v7 = vpop.f32.mrf.mxu0 }
 0x551   : > { %v6216_v41 = vadd.f32 %v6215_v7, %v10775_v44 }
 0x552   : > { %v6217_v21 = vpop.f32.mrf.mxu0 }
 0x553   : > { %v6218_v46 = vadd.f32 %v6217_v21, %v10775_v44  ;;  %v6257_v6 = vadd.f32 %v6256_v15, %v6216_v41 }
 0x554   : > { %v6219_v58 = vpop.f32.mrf.mxu0 }
 0x555   : > { %v6349_v0 = vmax.f32 %v6257_v6, 0.0  ;;  %v6259_v43 = vadd.f32 %v6258_v19, %v6218_v46 }
 0x556   : > { %v6220_v37 = vpop.f32.mrf.mxu0 }
 0x557   : > { %6357 = vst [vmem:[%s11929_s18 + $0x20] sm:$0xff] %v6349_v0  ;;  %v6350_v40 = vmax.f32 %v6259_v43, 0.0 }
 0x559   : > { %6358 = vst [vmem:[%s11929_s18 + $0x28] sm:$0xff] %v6350_v40 }
 0x599   : > { %v6297_v53 = vpop.f32.mrf.mxu1 }
 0x59a   : > { %v6298_v63 = vadd.f32 %v6297_v53, %v10775_v44 }
 0x59b   : > { %v6299_v2 = vpop.f32.mrf.mxu1 }
 0x59c   : > { %v6338_v36 = vpop.f32.mrf.mxu0  ;;  %v6300_v27 = vadd.f32 %v6299_v2, %v10775_v44 }
 0x59d   : > { %v6301_v31 = vpop.f32.mrf.mxu1  ;;  %v6339_v26 = vadd.f32 %v6338_v36, %v6298_v63 }
 0x59e   : > { %v6340_v59 = vpop.f32.mrf.mxu0 }
 0x59f   : > { %v6302_v56 = vpop.f32.mrf.mxu1  ;;  %v6351_v48 = vmax.f32 %v6339_v26, 0.0  ;;  %v6341_v23 = vadd.f32 %v6340_v59, %v6300_v27 }
 0x5a0   : > { %v6342_v29 = vpop.f32.mrf.mxu0 }
 0x5a1   : > { %6359 = vst [vmem:[%s11929_s18 + $0x30] sm:$0xff] %v6351_v48  ;;  %v6352_v3 = vmax.f32 %v6341_v23, 0.0 }
 0x5a2   : > { %v6343_v52 = vpop.f32.mrf.mxu0 }
 0x5a3   : > { %6360 = vst [vmem:[%s11929_s18 + $0x38] sm:$0xff] %v6352_v3 }
 0x5a4   : > { %7012 = shalt.err (!%p7009_p13)
}
 0x5a5   : > { %s7013_s9 = scalar_lea.hbm %s10820_s30, 1024  ;;  %s7017_s26 = scalar_lea.hbm %s11941_s24, 2048 }
 0x5a6   : > { %p7014_p5 = scmp.ne.s32.totalorder %s10820_s30, %s7013_s9  ;;  %p7018_p4 = scmp.lt.s32.totalorder %s10820_s30, %s11941_s24 }
 0x5a7   : > { %p7019_p9 = scmp.lt.s32.totalorder %s7017_s26, %s7013_s9 }
 0x5a8   : > { %p7015_p7 = pnand %p7014_p5, %p11942_p0 }
 0x5a9   : > { %p7020_p8 = por %p7019_p9, %p7018_p4 }
 0x5aa   : > { %p7016_p6 = pneg %p7015_p7 }
 0x5ac   : > { %p7021_p12 = pnand %p7020_p8, %p7016_p6 }
 0x5ae   : > { %7024 = shalt.err (!%p7021_p12)
}
 0x5af   : > { %6843 = dma.vmem_to_hbm [thread:$0]  (%p11942_p0), %s6377_s29, 1024, %s10820_s30, %s6362_s6  }
 0x5b0 PF: > { %s11943_s4 = sld [smem:[#allocation14_spill]] }
 0x5b1   : > { %s11944_s22 = sld [smem:[#allocation19_spill]] }
 0x5b2   : > { %s11945_s8 = sld [smem:[#allocation17_spill]] }
 0x5b6   : > { %s6388_s27 = sand.u32 1, %s11943_s4  }
 0x5b7   : > { %p11946_p11 = scmp.ne.s32.totalorder %s11944_s22, 0  ;;  %s6389_s7 = scalar_lea.sflag [#allocation7], %s6388_s27 }
 0x5b8   : > { %p11947_p1 = scmp.ge.s32.totalorder %s11945_s8, 2 }
 0x5ba   : > { %p6854_p2 = pnand %p11947_p1, %p11946_p11 }
 0x5bc   : > { %p6855_p10 = pneg %p6854_p2 }
 0x5be   : > { %7050 = dma.done.wait (%p6855_p10), %s6389_s7, 1024  }
 0x5bf   : > { %7052 = vsyncadd (%p6855_p10), %s6389_s7, 4294966272  ;;  %s11948_s21 = sld [smem:[#allocation20_spill]] }
 0x5c0   : > { %s11949_s18 = sld [smem:[#allocation15_spill]] }
 0x5c1   : > { %s11950_s19 = sld [smem:[#allocation16_spill]] }
 0x5c2   : > { %s11951_s20 = sld [smem:[#allocation21_spill]] }
 0x5c5   : > { %p19_p3 = scmp.ge.s32.totalorder %s11948_s21, 4  }
 0x5c7   :  { %21 = sbr.rel (!%p19_p3) target bundleno = 11 (0xb), region = 93 }
 0x5cc   :  { %6394 = vsyncpa [#allocation6], 1 }
 0x5cd   :  { %6396 = vsyncpa [#allocation6 + $0x1], 1 }
 0x5ce   :  { %6397 = vsyncpa [#allocation9], 1 }
 0x5cf   :  { %6398 = vsyncpa [#allocation7], 1 }
 0x5d0   :  { %6400 = vsyncpa [#allocation7 + $0x1], 1 }

</bundles_post_ra>
